<compile_context>
chip_gen: v6e
topology: v6e:2x2x1
jax: 0.10.0
libtpu: 0.0.40
codegen_flags: <defaults>
</compile_context>

<pallas_src>
import jax
import jax.numpy as jnp
from jax import lax
from jax.experimental import pallas as pl
from jax.experimental.pallas import tpu as pltpu

B = 2            # batch (kernel cost ~flat in B; it is weight-DMA-bound)
L_IN = 784       # Conv1d input length (so fc1 in_features = 10*757)
K = 28           # conv kernel size
C_OUT = 10       # conv out channels
L_OUT = L_IN - K + 1    # 757
L_PAD = 768             # 757 zero-padded to a multiple of 128 (lane-aligned)
H1 = 280                # fc1 out features
N_CLS = 10              # final classes

NSLAB = 2                       # grid steps over the fc1 weight stream
CH_PER_SLAB = C_OUT // NSLAB    # 5 conv channels per slab
SLAB_K = CH_PER_SLAB * L_PAD    # 3840 contraction width per slab


def network_kernel(x_ref, conv_w_ref, conv_b_ref, fc1_w_ref, fc1_b_ref,
                   out_w_ref, out_b_ref, o_ref, conv_sc, h_sc):
    # x_ref:      (B, 784)
    # conv_w_ref: (10, 28)
    # conv_b_ref: (10, 1)
    # fc1_w_ref:  (H1, SLAB_K) bf16   -- this step's lane-dense slab of fc1.weight
    # fc1_b_ref:  (1, H1)
    # out_w_ref:  (N_CLS, H1)         -- out.weight, native PyTorch layout
    # out_b_ref:  (1, N_CLS)
    # o_ref:      (B, N_CLS)
    # conv_sc:    VMEM (NSLAB, B, SLAB_K) f32  -- flattened ReLU(conv) acts
    # h_sc:       VMEM (B, H1) f32             -- fc1 accumulator
    s = pl.program_id(0)

    # ---- step 0: Conv1d via im2col + MXU, ReLU, scatter into the flattened,
    # channel-padded activation scratch; zero the fc1 accumulator. -----------
    @pl.when(s == 0)
    def _init():
        conv_sc[...] = jnp.zeros_like(conv_sc)   # zeros incl. the 757->768 pad
        h_sc[...] = jnp.zeros_like(h_sc)
        x = x_ref[...]             # (B, 784)
        cw = conv_w_ref[...]       # (10, 28)
        cb = conv_b_ref[...]       # (10, 1)
        for b in range(B):                                         # static, B=2
            xb = x[b:b + 1, :]                                     # (1, 784)
            patches = jnp.concatenate(
                [xb[:, k:k + L_OUT] for k in range(K)], axis=0)    # (28, 757)
            cv = jnp.dot(cw, patches, preferred_element_type=jnp.float32) + cb
            cv = jnp.maximum(cv, 0.0)                              # (10, 757)
            for c in range(C_OUT):                                 # static scatter
                conv_sc[c // CH_PER_SLAB, pl.ds(b, 1),
                        pl.ds((c % CH_PER_SLAB) * L_PAD, L_OUT)] = cv[c:c + 1, :]

    # ---- every step: one fused MXU matmul for this slab of fc1 (f32 accum).
    # Weight is (H1, SLAB_K) lane-dense; contract last dims (transposed rhs).
    a = conv_sc[s].astype(jnp.bfloat16)          # (B, SLAB_K), cast once per slab
    h_sc[...] += lax.dot_general(
        a, fc1_w_ref[...],
        dimension_numbers=(((1,), (1,)), ((), ())),
        preferred_element_type=jnp.float32)

    # ---- last step: fc1 bias + ReLU, out layer, stable softmax over classes.
    @pl.when(s == pl.num_programs(0) - 1)
    def _final():
        h = jnp.maximum(h_sc[...] + fc1_b_ref[...], 0.0)           # (B, 280)
        logits = lax.dot_general(
            h, out_w_ref[...],
            dimension_numbers=(((1,), (1,)), ((), ())),
            preferred_element_type=jnp.float32) + out_b_ref[...]   # (B, 10)
        m = jnp.max(logits, axis=1, keepdims=True)
        e = jnp.exp(logits - m)
        o_ref[...] = e / jnp.sum(e, axis=1, keepdims=True)


def prepare_params(params):
    """One-time kernel-ready layout (hoisted out of the per-call forward):
    reshape + zero-pad + bf16-cast the 8.5 MB fc1 weight, reshape biases."""
    fc1_w = params["fc1_w"].reshape(H1, C_OUT, L_OUT)        # (280, 10, 757)
    fc1_w = jnp.pad(fc1_w, ((0, 0), (0, 0), (0, L_PAD - L_OUT)))
    fc1_w = fc1_w.reshape(H1, C_OUT * L_PAD).astype(jnp.bfloat16)  # (280, 7680)
    return {
        "conv_w": params["conv_w"][:, 0, :],               # (10, 28) f32
        "conv_b": params["conv_b"].reshape(C_OUT, 1),      # (10, 1)  f32
        "fc1_w": fc1_w,                                    # (280, 7680) bf16
        "fc1_b": params["fc1_b"].reshape(1, H1),           # (1, 280) f32
        "out_w": params["out_w"],                          # (10, 280) f32
        "out_b": params["out_b"].reshape(1, N_CLS),        # (1, 10)  f32
    }


def network_forward(x, p):
    """x: (B, 1, 784) float32. p: output of prepare_params()."""
    assert x.shape == (B, 1, L_IN)
    x2 = x[:, 0, :]                                         # (B, 784)

    grid_spec = pltpu.PrefetchScalarGridSpec(
        num_scalar_prefetch=0,
        grid=(NSLAB,),
        in_specs=[
            pl.BlockSpec((B, L_IN), lambda s: (0, 0)),          # x
            pl.BlockSpec((C_OUT, K), lambda s: (0, 0)),         # conv_w
            pl.BlockSpec((C_OUT, 1), lambda s: (0, 0)),         # conv_b
            pl.BlockSpec((H1, SLAB_K), lambda s: (0, s)),       # fc1_w slab (streamed)
            pl.BlockSpec((1, H1), lambda s: (0, 0)),            # fc1_b
            pl.BlockSpec((N_CLS, H1), lambda s: (0, 0)),        # out_w
            pl.BlockSpec((1, N_CLS), lambda s: (0, 0)),         # out_b
        ],
        out_specs=pl.BlockSpec((B, N_CLS), lambda s: (0, 0)),
        scratch_shapes=[
            pltpu.VMEM((NSLAB, B, SLAB_K), jnp.float32),   # flattened conv acts
            pltpu.VMEM((B, H1), jnp.float32),              # fc1 accumulator
        ],
    )
    return pl.pallas_call(
        network_kernel,
        out_shape=jax.ShapeDtypeStruct((B, N_CLS), jnp.float32),
        grid_spec=grid_spec,
        compiler_params=pltpu.CompilerParams(
            dimension_semantics=("arbitrary",),   # fc1 reduction axis (accumulator)
            vmem_limit_bytes=32 << 20,            # portable to v7x's 64 MiB VMEM
        ),
    )(x2, p["conv_w"], p["conv_b"], p["fc1_w"], p["fc1_b"], p["out_w"], p["out_b"])


def init_params(key):
    """PyTorch default init: U(-1/sqrt(fan_in), 1/sqrt(fan_in))."""
    ks = jax.random.split(key, 6)

    def u(k, shape, fan_in):
        bound = 1.0 / jnp.sqrt(fan_in)
        return jax.random.uniform(k, shape, jnp.float32, -bound, bound)

    return {
        "conv_w": u(ks[0], (C_OUT, 1, K), 1 * K),
        "conv_b": u(ks[1], (C_OUT,), 1 * K),
        "fc1_w": u(ks[2], (H1, C_OUT * L_OUT), C_OUT * L_OUT),
        "fc1_b": u(ks[3], (H1,), C_OUT * L_OUT),
        "out_w": u(ks[4], (N_CLS, H1), H1),
        "out_b": u(ks[5], (N_CLS,), H1),
    }


def reference_forward(x, params):
    """Pure-JAX f32 reference mirroring the PyTorch forward."""
    xs = x[:, 0, :]                                                    # (B, 784)
    patches = jnp.stack([xs[:, k:k + L_OUT] for k in range(K)], axis=1)  # (B,28,757)
    conv = jnp.einsum("ok,bkt->bot", params["conv_w"][:, 0, :], patches)
    conv = conv + params["conv_b"][None, :, None]
    conv = jnp.maximum(conv, 0.0)
    flat = conv.reshape(x.shape[0], -1)                                # (B, 7570)
    h = jnp.maximum(flat @ params["fc1_w"].T + params["fc1_b"], 0.0)
    logits = h @ params["out_w"].T + params["out_b"]
    return jax.nn.softmax(logits, axis=1)


if __name__ == "__main__":
    key = jax.random.PRNGKey(0)
    kx, kp = jax.random.split(key)
    x = jax.random.normal(kx, (B, 1, L_IN), jnp.float32)
    params = init_params(kp)

    # One-time weight layout + bf16 cast (hoisted out of the per-call forward).
    prepped = jax.tree_util.tree_map(jax.block_until_ready, prepare_params(params))

    fwd = jax.jit(network_forward)
    out = jax.block_until_ready(fwd(x, prepped))

    ref = jax.block_until_ready(reference_forward(x, params))
    assert out.shape == (B, N_CLS)
    assert jnp.allclose(jnp.sum(out, axis=1), 1.0, atol=1e-5), "softmax rows must sum to 1"
    # fc1 weights are streamed in bf16 -> relax tolerance vs the f32 reference.
    assert jnp.allclose(out, ref, atol=2e-2), "mismatch vs JAX f32 reference"

    print("KERNEL_OK")
</pallas_src>

<mosaic_0001>
module attributes {stable_mosaic.version = 11 : i64} {
  func.func @network_kernel(%arg0: i32, %arg1: memref<2x784xf32, #tpu.memory_space<vmem>>, %arg2: memref<10x28xf32, #tpu.memory_space<vmem>>, %arg3: memref<10x1xf32, #tpu.memory_space<vmem>>, %arg4: memref<280x3840xbf16, #tpu.memory_space<vmem>>, %arg5: memref<1x280xf32, #tpu.memory_space<vmem>>, %arg6: memref<10x280xf32, #tpu.memory_space<vmem>>, %arg7: memref<1x10xf32, #tpu.memory_space<vmem>>, %arg8: memref<2x10xf32, #tpu.memory_space<vmem>>, %arg9: memref<2x2x3840xf32, #tpu.memory_space<vmem>>, %arg10: memref<2x280xf32, #tpu.memory_space<vmem>>) attributes {dimension_semantics = [#tpu.dimension_semantics<arbitrary>], iteration_bounds = array<i64: 2>, scalar_prefetch = 0 : i64, scratch_operands = 2 : i64, tpu.core_type = #tpu.core_type<tc>, window_params = [{pipeline_mode = #tpu.pipeline_mode<synchronous>, transform_indices = @transform_0, window_bounds = array<i64: 2, 784>}, {pipeline_mode = #tpu.pipeline_mode<synchronous>, transform_indices = @transform_1, window_bounds = array<i64: 10, 28>}, {pipeline_mode = #tpu.pipeline_mode<synchronous>, transform_indices = @transform_2, window_bounds = array<i64: 10, 1>}, {transform_indices = @transform_3, window_bounds = array<i64: 280, 3840>}, {pipeline_mode = #tpu.pipeline_mode<synchronous>, transform_indices = @transform_4, window_bounds = array<i64: 1, 280>}, {pipeline_mode = #tpu.pipeline_mode<synchronous>, transform_indices = @transform_5, window_bounds = array<i64: 10, 280>}, {pipeline_mode = #tpu.pipeline_mode<synchronous>, transform_indices = @transform_6, window_bounds = array<i64: 1, 10>}, {pipeline_mode = #tpu.pipeline_mode<synchronous>, transform_indices = @transform_7, window_bounds = array<i64: 2, 10>}]} {
    %c0_i32 = arith.constant 0 : i32
    %0 = arith.cmpi eq, %arg0, %c0_i32 : i32
    %1 = arith.extui %0 : i1 to i32
    %c0_i32_0 = arith.constant 0 : i32
    %2 = arith.cmpi ne, %1, %c0_i32_0 : i32
    scf.if %2 {
      %cst_9 = arith.constant 0.000000e+00 : f32
      %15 = vector.broadcast %cst_9 : f32 to vector<2x2x3840xf32>
      %c0_10 = arith.constant 0 : index
      %c0_11 = arith.constant 0 : index
      %c0_12 = arith.constant 0 : index
      %16 = vector.load %arg9[%c0_10, %c0_11, %c0_12] : memref<2x2x3840xf32, #tpu.memory_space<vmem>>, vector<2x2x3840xf32>
      tpu.vector_store %arg9[%c0_10, %c0_11, %c0_12], %15 {strides = array<i32>} : memref<2x2x3840xf32, #tpu.memory_space<vmem>>, vector<2x2x3840xf32>,
      %cst_13 = arith.constant 0.000000e+00 : f32
      %17 = vector.broadcast %cst_13 : f32 to vector<2x280xf32>
      %c0_14 = arith.constant 0 : index
      %c0_15 = arith.constant 0 : index
      %18 = vector.load %arg10[%c0_14, %c0_15] : memref<2x280xf32, #tpu.memory_space<vmem>>, vector<2x280xf32>
      tpu.vector_store %arg10[%c0_14, %c0_15], %17 {strides = array<i32>} : memref<2x280xf32, #tpu.memory_space<vmem>>, vector<2x280xf32>,
      %c0_16 = arith.constant 0 : index
      %c0_17 = arith.constant 0 : index
      %19 = vector.load %arg1[%c0_16, %c0_17] : memref<2x784xf32, #tpu.memory_space<vmem>>, vector<2x784xf32>
      %c0_18 = arith.constant 0 : index
      %c0_19 = arith.constant 0 : index
      %20 = vector.load %arg2[%c0_18, %c0_19] : memref<10x28xf32, #tpu.memory_space<vmem>>, vector<10x28xf32>
      %c0_20 = arith.constant 0 : index
      %c0_21 = arith.constant 0 : index
      %21 = vector.load %arg3[%c0_20, %c0_21] : memref<10x1xf32, #tpu.memory_space<vmem>>, vector<10x1xf32>
      %22 = vector.extract_strided_slice %19 {offsets = [0, 0], sizes = [1, 784], strides = [1, 1]} : vector<2x784xf32> to vector<1x784xf32>
      %23 = vector.extract_strided_slice %22 {offsets = [0, 0], sizes = [1, 757], strides = [1, 1]} : vector<1x784xf32> to vector<1x757xf32>
      %24 = vector.extract_strided_slice %22 {offsets = [0, 1], sizes = [1, 757], strides = [1, 1]} : vector<1x784xf32> to vector<1x757xf32>
      %25 = vector.extract_strided_slice %22 {offsets = [0, 2], sizes = [1, 757], strides = [1, 1]} : vector<1x784xf32> to vector<1x757xf32>
      %26 = vector.extract_strided_slice %22 {offsets = [0, 3], sizes = [1, 757], strides = [1, 1]} : vector<1x784xf32> to vector<1x757xf32>
      %27 = vector.extract_strided_slice %22 {offsets = [0, 4], sizes = [1, 757], strides = [1, 1]} : vector<1x784xf32> to vector<1x757xf32>
      %28 = vector.extract_strided_slice %22 {offsets = [0, 5], sizes = [1, 757], strides = [1, 1]} : vector<1x784xf32> to vector<1x757xf32>
      %29 = vector.extract_strided_slice %22 {offsets = [0, 6], sizes = [1, 757], strides = [1, 1]} : vector<1x784xf32> to vector<1x757xf32>
      %30 = vector.extract_strided_slice %22 {offsets = [0, 7], sizes = [1, 757], strides = [1, 1]} : vector<1x784xf32> to vector<1x757xf32>
      %31 = vector.extract_strided_slice %22 {offsets = [0, 8], sizes = [1, 757], strides = [1, 1]} : vector<1x784xf32> to vector<1x757xf32>
      %32 = vector.extract_strided_slice %22 {offsets = [0, 9], sizes = [1, 757], strides = [1, 1]} : vector<1x784xf32> to vector<1x757xf32>
      %33 = vector.extract_strided_slice %22 {offsets = [0, 10], sizes = [1, 757], strides = [1, 1]} : vector<1x784xf32> to vector<1x757xf32>
      %34 = vector.extract_strided_slice %22 {offsets = [0, 11], sizes = [1, 757], strides = [1, 1]} : vector<1x784xf32> to vector<1x757xf32>
      %35 = vector.extract_strided_slice %22 {offsets = [0, 12], sizes = [1, 757], strides = [1, 1]} : vector<1x784xf32> to vector<1x757xf32>
      %36 = vector.extract_strided_slice %22 {offsets = [0, 13], sizes = [1, 757], strides = [1, 1]} : vector<1x784xf32> to vector<1x757xf32>
      %37 = vector.extract_strided_slice %22 {offsets = [0, 14], sizes = [1, 757], strides = [1, 1]} : vector<1x784xf32> to vector<1x757xf32>
      %38 = vector.extract_strided_slice %22 {offsets = [0, 15], sizes = [1, 757], strides = [1, 1]} : vector<1x784xf32> to vector<1x757xf32>
      %39 = vector.extract_strided_slice %22 {offsets = [0, 16], sizes = [1, 757], strides = [1, 1]} : vector<1x784xf32> to vector<1x757xf32>
      %40 = vector.extract_strided_slice %22 {offsets = [0, 17], sizes = [1, 757], strides = [1, 1]} : vector<1x784xf32> to vector<1x757xf32>
      %41 = vector.extract_strided_slice %22 {offsets = [0, 18], sizes = [1, 757], strides = [1, 1]} : vector<1x784xf32> to vector<1x757xf32>
      %42 = vector.extract_strided_slice %22 {offsets = [0, 19], sizes = [1, 757], strides = [1, 1]} : vector<1x784xf32> to vector<1x757xf32>
      %43 = vector.extract_strided_slice %22 {offsets = [0, 20], sizes = [1, 757], strides = [1, 1]} : vector<1x784xf32> to vector<1x757xf32>
      %44 = vector.extract_strided_slice %22 {offsets = [0, 21], sizes = [1, 757], strides = [1, 1]} : vector<1x784xf32> to vector<1x757xf32>
      %45 = vector.extract_strided_slice %22 {offsets = [0, 22], sizes = [1, 757], strides = [1, 1]} : vector<1x784xf32> to vector<1x757xf32>
      %46 = vector.extract_strided_slice %22 {offsets = [0, 23], sizes = [1, 757], strides = [1, 1]} : vector<1x784xf32> to vector<1x757xf32>
      %47 = vector.extract_strided_slice %22 {offsets = [0, 24], sizes = [1, 757], strides = [1, 1]} : vector<1x784xf32> to vector<1x757xf32>
      %48 = vector.extract_strided_slice %22 {offsets = [0, 25], sizes = [1, 757], strides = [1, 1]} : vector<1x784xf32> to vector<1x757xf32>
      %49 = vector.extract_strided_slice %22 {offsets = [0, 26], sizes = [1, 757], strides = [1, 1]} : vector<1x784xf32> to vector<1x757xf32>
      %50 = vector.extract_strided_slice %22 {offsets = [0, 27], sizes = [1, 757], strides = [1, 1]} : vector<1x784xf32> to vector<1x757xf32>
      %51 = tpu.concatenate %23, %24, %25, %26, %27, %28, %29, %30, %31, %32, %33, %34, %35, %36, %37, %38 in 0 : vector<1x757xf32>, vector<1x757xf32>, vector<1x757xf32>, vector<1x757xf32>, vector<1x757xf32>, vector<1x757xf32>, vector<1x757xf32>, vector<1x757xf32>, vector<1x757xf32>, vector<1x757xf32>, vector<1x757xf32>, vector<1x757xf32>, vector<1x757xf32>, vector<1x757xf32>, vector<1x757xf32>, vector<1x757xf32> -> vector<16x757xf32>
      %52 = tpu.concatenate %39, %40, %41, %42, %43, %44, %45, %46, %47, %48, %49, %50 in 0 : vector<1x757xf32>, vector<1x757xf32>, vector<1x757xf32>, vector<1x757xf32>, vector<1x757xf32>, vector<1x757xf32>, vector<1x757xf32>, vector<1x757xf32>, vector<1x757xf32>, vector<1x757xf32>, vector<1x757xf32>, vector<1x757xf32> -> vector<12x757xf32>
      %53 = tpu.concatenate %51, %52 in 0 : vector<16x757xf32>, vector<12x757xf32> -> vector<28x757xf32>
      %cst_22 = arith.constant dense<0.000000e+00> : vector<10x757xf32>
      %54 = tpu.matmul %20, %53, %cst_22 {dimension_numbers = #tpu.dot_dimension_numbers<[1], [0], [0], [1], [0, 0, 1, 1], [], []>} : vector<10x28xf32>, vector<28x757xf32>, vector<10x757xf32> -> vector<10x757xf32>
      %55 = vector.broadcast %21 : vector<10x1xf32> to vector<10x757xf32>
      %56 = arith.addf %54, %55 : vector<10x757xf32>
      %cst_23 = arith.constant 0.000000e+00 : f32
      %57 = vector.broadcast %cst_23 : f32 to vector<10x757xf32>
      %58 = arith.maximumf %56, %57 : vector<10x757xf32>
      %59 = vector.extract_strided_slice %58 {offsets = [0, 0], sizes = [1, 757], strides = [1, 1]} : vector<10x757xf32> to vector<1x757xf32>
      %c0_24 = arith.constant 0 : index
      %c0_25 = arith.constant 0 : index
      %c0_26 = arith.constant 0 : index
      %60 = vector.load %arg9[%c0_24, %c0_25, %c0_26] : memref<2x2x3840xf32, #tpu.memory_space<vmem>>, vector<1x1x757xf32>
      %61 = vector.shape_cast %60 : vector<1x1x757xf32> to vector<1x757xf32>
      %62 = vector.shape_cast %59 : vector<1x757xf32> to vector<1x1x757xf32>
      tpu.vector_store %arg9[%c0_24, %c0_25, %c0_26], %62 {strides = array<i32>} : memref<2x2x3840xf32, #tpu.memory_space<vmem>>, vector<1x1x757xf32>,
      %63 = vector.extract_strided_slice %58 {offsets = [1, 0], sizes = [1, 757], strides = [1, 1]} : vector<10x757xf32> to vector<1x757xf32>
      %c0_27 = arith.constant 0 : index
      %c0_28 = arith.constant 0 : index
      %c768 = arith.constant 768 : index
      %64 = vector.load %arg9[%c0_27, %c0_28, %c768] : memref<2x2x3840xf32, #tpu.memory_space<vmem>>, vector<1x1x757xf32>
      %65 = vector.shape_cast %64 : vector<1x1x757xf32> to vector<1x757xf32>
      %66 = vector.shape_cast %63 : vector<1x757xf32> to vector<1x1x757xf32>
      tpu.vector_store %arg9[%c0_27, %c0_28, %c768], %66 {strides = array<i32>} : memref<2x2x3840xf32, #tpu.memory_space<vmem>>, vector<1x1x757xf32>,
      %67 = vector.extract_strided_slice %58 {offsets = [2, 0], sizes = [1, 757], strides = [1, 1]} : vector<10x757xf32> to vector<1x757xf32>
      %c0_29 = arith.constant 0 : index
      %c0_30 = arith.constant 0 : index
      %c1536 = arith.constant 1536 : index
      %68 = vector.load %arg9[%c0_29, %c0_30, %c1536] : memref<2x2x3840xf32, #tpu.memory_space<vmem>>, vector<1x1x757xf32>
      %69 = vector.shape_cast %68 : vector<1x1x757xf32> to vector<1x757xf32>
      %70 = vector.shape_cast %67 : vector<1x757xf32> to vector<1x1x757xf32>
      tpu.vector_store %arg9[%c0_29, %c0_30, %c1536], %70 {strides = array<i32>} : memref<2x2x3840xf32, #tpu.memory_space<vmem>>, vector<1x1x757xf32>,
      %71 = vector.extract_strided_slice %58 {offsets = [3, 0], sizes = [1, 757], strides = [1, 1]} : vector<10x757xf32> to vector<1x757xf32>
      %c0_31 = arith.constant 0 : index
      %c0_32 = arith.constant 0 : index
      %c2304 = arith.constant 2304 : index
      %72 = vector.load %arg9[%c0_31, %c0_32, %c2304] : memref<2x2x3840xf32, #tpu.memory_space<vmem>>, vector<1x1x757xf32>
      %73 = vector.shape_cast %72 : vector<1x1x757xf32> to vector<1x757xf32>
      %74 = vector.shape_cast %71 : vector<1x757xf32> to vector<1x1x757xf32>
      tpu.vector_store %arg9[%c0_31, %c0_32, %c2304], %74 {strides = array<i32>} : memref<2x2x3840xf32, #tpu.memory_space<vmem>>, vector<1x1x757xf32>,
      %75 = vector.extract_strided_slice %58 {offsets = [4, 0], sizes = [1, 757], strides = [1, 1]} : vector<10x757xf32> to vector<1x757xf32>
      %c0_33 = arith.constant 0 : index
      %c0_34 = arith.constant 0 : index
      %c3072 = arith.constant 3072 : index
      %76 = vector.load %arg9[%c0_33, %c0_34, %c3072] : memref<2x2x3840xf32, #tpu.memory_space<vmem>>, vector<1x1x757xf32>
      %77 = vector.shape_cast %76 : vector<1x1x757xf32> to vector<1x757xf32>
      %78 = vector.shape_cast %75 : vector<1x757xf32> to vector<1x1x757xf32>
      tpu.vector_store %arg9[%c0_33, %c0_34, %c3072], %78 {strides = array<i32>} : memref<2x2x3840xf32, #tpu.memory_space<vmem>>, vector<1x1x757xf32>,
      %79 = vector.extract_strided_slice %58 {offsets = [5, 0], sizes = [1, 757], strides = [1, 1]} : vector<10x757xf32> to vector<1x757xf32>
      %c1 = arith.constant 1 : index
      %c0_35 = arith.constant 0 : index
      %c0_36 = arith.constant 0 : index
      %80 = vector.load %arg9[%c1, %c0_35, %c0_36] : memref<2x2x3840xf32, #tpu.memory_space<vmem>>, vector<1x1x757xf32>
      %81 = vector.shape_cast %80 : vector<1x1x757xf32> to vector<1x757xf32>
      %82 = vector.shape_cast %79 : vector<1x757xf32> to vector<1x1x757xf32>
      tpu.vector_store %arg9[%c1, %c0_35, %c0_36], %82 {strides = array<i32>} : memref<2x2x3840xf32, #tpu.memory_space<vmem>>, vector<1x1x757xf32>,
      %83 = vector.extract_strided_slice %58 {offsets = [6, 0], sizes = [1, 757], strides = [1, 1]} : vector<10x757xf32> to vector<1x757xf32>
      %c1_37 = arith.constant 1 : index
      %c0_38 = arith.constant 0 : index
      %c768_39 = arith.constant 768 : index
      %84 = vector.load %arg9[%c1_37, %c0_38, %c768_39] : memref<2x2x3840xf32, #tpu.memory_space<vmem>>, vector<1x1x757xf32>
      %85 = vector.shape_cast %84 : vector<1x1x757xf32> to vector<1x757xf32>
      %86 = vector.shape_cast %83 : vector<1x757xf32> to vector<1x1x757xf32>
      tpu.vector_store %arg9[%c1_37, %c0_38, %c768_39], %86 {strides = array<i32>} : memref<2x2x3840xf32, #tpu.memory_space<vmem>>, vector<1x1x757xf32>,
      %87 = vector.extract_strided_slice %58 {offsets = [7, 0], sizes = [1, 757], strides = [1, 1]} : vector<10x757xf32> to vector<1x757xf32>
      %c1_40 = arith.constant 1 : index
      %c0_41 = arith.constant 0 : index
      %c1536_42 = arith.constant 1536 : index
      %88 = vector.load %arg9[%c1_40, %c0_41, %c1536_42] : memref<2x2x3840xf32, #tpu.memory_space<vmem>>, vector<1x1x757xf32>
      %89 = vector.shape_cast %88 : vector<1x1x757xf32> to vector<1x757xf32>
      %90 = vector.shape_cast %87 : vector<1x757xf32> to vector<1x1x757xf32>
      tpu.vector_store %arg9[%c1_40, %c0_41, %c1536_42], %90 {strides = array<i32>} : memref<2x2x3840xf32, #tpu.memory_space<vmem>>, vector<1x1x757xf32>,
      %91 = vector.extract_strided_slice %58 {offsets = [8, 0], sizes = [1, 757], strides = [1, 1]} : vector<10x757xf32> to vector<1x757xf32>
      %c1_43 = arith.constant 1 : index
      %c0_44 = arith.constant 0 : index
      %c2304_45 = arith.constant 2304 : index
      %92 = vector.load %arg9[%c1_43, %c0_44, %c2304_45] : memref<2x2x3840xf32, #tpu.memory_space<vmem>>, vector<1x1x757xf32>
      %93 = vector.shape_cast %92 : vector<1x1x757xf32> to vector<1x757xf32>
      %94 = vector.shape_cast %91 : vector<1x757xf32> to vector<1x1x757xf32>
      tpu.vector_store %arg9[%c1_43, %c0_44, %c2304_45], %94 {strides = array<i32>} : memref<2x2x3840xf32, #tpu.memory_space<vmem>>, vector<1x1x757xf32>,
      %95 = vector.extract_strided_slice %58 {offsets = [9, 0], sizes = [1, 757], strides = [1, 1]} : vector<10x757xf32> to vector<1x757xf32>
      %c1_46 = arith.constant 1 : index
      %c0_47 = arith.constant 0 : index
      %c3072_48 = arith.constant 3072 : index
      %96 = vector.load %arg9[%c1_46, %c0_47, %c3072_48] : memref<2x2x3840xf32, #tpu.memory_space<vmem>>, vector<1x1x757xf32>
      %97 = vector.shape_cast %96 : vector<1x1x757xf32> to vector<1x757xf32>
      %98 = vector.shape_cast %95 : vector<1x757xf32> to vector<1x1x757xf32>
      tpu.vector_store %arg9[%c1_46, %c0_47, %c3072_48], %98 {strides = array<i32>} : memref<2x2x3840xf32, #tpu.memory_space<vmem>>, vector<1x1x757xf32>,
      %99 = vector.extract_strided_slice %19 {offsets = [1, 0], sizes = [1, 784], strides = [1, 1]} : vector<2x784xf32> to vector<1x784xf32>
      %100 = vector.extract_strided_slice %99 {offsets = [0, 0], sizes = [1, 757], strides = [1, 1]} : vector<1x784xf32> to vector<1x757xf32>
      %101 = vector.extract_strided_slice %99 {offsets = [0, 1], sizes = [1, 757], strides = [1, 1]} : vector<1x784xf32> to vector<1x757xf32>
      %102 = vector.extract_strided_slice %99 {offsets = [0, 2], sizes = [1, 757], strides = [1, 1]} : vector<1x784xf32> to vector<1x757xf32>
      %103 = vector.extract_strided_slice %99 {offsets = [0, 3], sizes = [1, 757], strides = [1, 1]} : vector<1x784xf32> to vector<1x757xf32>
      %104 = vector.extract_strided_slice %99 {offsets = [0, 4], sizes = [1, 757], strides = [1, 1]} : vector<1x784xf32> to vector<1x757xf32>
      %105 = vector.extract_strided_slice %99 {offsets = [0, 5], sizes = [1, 757], strides = [1, 1]} : vector<1x784xf32> to vector<1x757xf32>
      %106 = vector.extract_strided_slice %99 {offsets = [0, 6], sizes = [1, 757], strides = [1, 1]} : vector<1x784xf32> to vector<1x757xf32>
      %107 = vector.extract_strided_slice %99 {offsets = [0, 7], sizes = [1, 757], strides = [1, 1]} : vector<1x784xf32> to vector<1x757xf32>
      %108 = vector.extract_strided_slice %99 {offsets = [0, 8], sizes = [1, 757], strides = [1, 1]} : vector<1x784xf32> to vector<1x757xf32>
      %109 = vector.extract_strided_slice %99 {offsets = [0, 9], sizes = [1, 757], strides = [1, 1]} : vector<1x784xf32> to vector<1x757xf32>
      %110 = vector.extract_strided_slice %99 {offsets = [0, 10], sizes = [1, 757], strides = [1, 1]} : vector<1x784xf32> to vector<1x757xf32>
      %111 = vector.extract_strided_slice %99 {offsets = [0, 11], sizes = [1, 757], strides = [1, 1]} : vector<1x784xf32> to vector<1x757xf32>
      %112 = vector.extract_strided_slice %99 {offsets = [0, 12], sizes = [1, 757], strides = [1, 1]} : vector<1x784xf32> to vector<1x757xf32>
      %113 = vector.extract_strided_slice %99 {offsets = [0, 13], sizes = [1, 757], strides = [1, 1]} : vector<1x784xf32> to vector<1x757xf32>
      %114 = vector.extract_strided_slice %99 {offsets = [0, 14], sizes = [1, 757], strides = [1, 1]} : vector<1x784xf32> to vector<1x757xf32>
      %115 = vector.extract_strided_slice %99 {offsets = [0, 15], sizes = [1, 757], strides = [1, 1]} : vector<1x784xf32> to vector<1x757xf32>
      %116 = vector.extract_strided_slice %99 {offsets = [0, 16], sizes = [1, 757], strides = [1, 1]} : vector<1x784xf32> to vector<1x757xf32>
      %117 = vector.extract_strided_slice %99 {offsets = [0, 17], sizes = [1, 757], strides = [1, 1]} : vector<1x784xf32> to vector<1x757xf32>
      %118 = vector.extract_strided_slice %99 {offsets = [0, 18], sizes = [1, 757], strides = [1, 1]} : vector<1x784xf32> to vector<1x757xf32>
      %119 = vector.extract_strided_slice %99 {offsets = [0, 19], sizes = [1, 757], strides = [1, 1]} : vector<1x784xf32> to vector<1x757xf32>
      %120 = vector.extract_strided_slice %99 {offsets = [0, 20], sizes = [1, 757], strides = [1, 1]} : vector<1x784xf32> to vector<1x757xf32>
      %121 = vector.extract_strided_slice %99 {offsets = [0, 21], sizes = [1, 757], strides = [1, 1]} : vector<1x784xf32> to vector<1x757xf32>
      %122 = vector.extract_strided_slice %99 {offsets = [0, 22], sizes = [1, 757], strides = [1, 1]} : vector<1x784xf32> to vector<1x757xf32>
      %123 = vector.extract_strided_slice %99 {offsets = [0, 23], sizes = [1, 757], strides = [1, 1]} : vector<1x784xf32> to vector<1x757xf32>
      %124 = vector.extract_strided_slice %99 {offsets = [0, 24], sizes = [1, 757], strides = [1, 1]} : vector<1x784xf32> to vector<1x757xf32>
      %125 = vector.extract_strided_slice %99 {offsets = [0, 25], sizes = [1, 757], strides = [1, 1]} : vector<1x784xf32> to vector<1x757xf32>
      %126 = vector.extract_strided_slice %99 {offsets = [0, 26], sizes = [1, 757], strides = [1, 1]} : vector<1x784xf32> to vector<1x757xf32>
      %127 = vector.extract_strided_slice %99 {offsets = [0, 27], sizes = [1, 757], strides = [1, 1]} : vector<1x784xf32> to vector<1x757xf32>
      %128 = tpu.concatenate %100, %101, %102, %103, %104, %105, %106, %107, %108, %109, %110, %111, %112, %113, %114, %115 in 0 : vector<1x757xf32>, vector<1x757xf32>, vector<1x757xf32>, vector<1x757xf32>, vector<1x757xf32>, vector<1x757xf32>, vector<1x757xf32>, vector<1x757xf32>, vector<1x757xf32>, vector<1x757xf32>, vector<1x757xf32>, vector<1x757xf32>, vector<1x757xf32>, vector<1x757xf32>, vector<1x757xf32>, vector<1x757xf32> -> vector<16x757xf32>
      %129 = tpu.concatenate %116, %117, %118, %119, %120, %121, %122, %123, %124, %125, %126, %127 in 0 : vector<1x757xf32>, vector<1x757xf32>, vector<1x757xf32>, vector<1x757xf32>, vector<1x757xf32>, vector<1x757xf32>, vector<1x757xf32>, vector<1x757xf32>, vector<1x757xf32>, vector<1x757xf32>, vector<1x757xf32>, vector<1x757xf32> -> vector<12x757xf32>
      %130 = tpu.concatenate %128, %129 in 0 : vector<16x757xf32>, vector<12x757xf32> -> vector<28x757xf32>
      %cst_49 = arith.constant dense<0.000000e+00> : vector<10x757xf32>
      %131 = tpu.matmul %20, %130, %cst_49 {dimension_numbers = #tpu.dot_dimension_numbers<[1], [0], [0], [1], [0, 0, 1, 1], [], []>} : vector<10x28xf32>, vector<28x757xf32>, vector<10x757xf32> -> vector<10x757xf32>
      %132 = vector.broadcast %21 : vector<10x1xf32> to vector<10x757xf32>
      %133 = arith.addf %131, %132 : vector<10x757xf32>
      %cst_50 = arith.constant 0.000000e+00 : f32
      %134 = vector.broadcast %cst_50 : f32 to vector<10x757xf32>
      %135 = arith.maximumf %133, %134 : vector<10x757xf32>
      %136 = vector.extract_strided_slice %135 {offsets = [0, 0], sizes = [1, 757], strides = [1, 1]} : vector<10x757xf32> to vector<1x757xf32>
      %c0_51 = arith.constant 0 : index
      %c1_52 = arith.constant 1 : index
      %c0_53 = arith.constant 0 : index
      %137 = vector.load %arg9[%c0_51, %c1_52, %c0_53] : memref<2x2x3840xf32, #tpu.memory_space<vmem>>, vector<1x1x757xf32>
      %138 = vector.shape_cast %137 : vector<1x1x757xf32> to vector<1x757xf32>
      %139 = vector.shape_cast %136 : vector<1x757xf32> to vector<1x1x757xf32>
      tpu.vector_store %arg9[%c0_51, %c1_52, %c0_53], %139 {strides = array<i32>} : memref<2x2x3840xf32, #tpu.memory_space<vmem>>, vector<1x1x757xf32>,
      %140 = vector.extract_strided_slice %135 {offsets = [1, 0], sizes = [1, 757], strides = [1, 1]} : vector<10x757xf32> to vector<1x757xf32>
      %c0_54 = arith.constant 0 : index
      %c1_55 = arith.constant 1 : index
      %c768_56 = arith.constant 768 : index
      %141 = vector.load %arg9[%c0_54, %c1_55, %c768_56] : memref<2x2x3840xf32, #tpu.memory_space<vmem>>, vector<1x1x757xf32>
      %142 = vector.shape_cast %141 : vector<1x1x757xf32> to vector<1x757xf32>
      %143 = vector.shape_cast %140 : vector<1x757xf32> to vector<1x1x757xf32>
      tpu.vector_store %arg9[%c0_54, %c1_55, %c768_56], %143 {strides = array<i32>} : memref<2x2x3840xf32, #tpu.memory_space<vmem>>, vector<1x1x757xf32>,
      %144 = vector.extract_strided_slice %135 {offsets = [2, 0], sizes = [1, 757], strides = [1, 1]} : vector<10x757xf32> to vector<1x757xf32>
      %c0_57 = arith.constant 0 : index
      %c1_58 = arith.constant 1 : index
      %c1536_59 = arith.constant 1536 : index
      %145 = vector.load %arg9[%c0_57, %c1_58, %c1536_59] : memref<2x2x3840xf32, #tpu.memory_space<vmem>>, vector<1x1x757xf32>
      %146 = vector.shape_cast %145 : vector<1x1x757xf32> to vector<1x757xf32>
      %147 = vector.shape_cast %144 : vector<1x757xf32> to vector<1x1x757xf32>
      tpu.vector_store %arg9[%c0_57, %c1_58, %c1536_59], %147 {strides = array<i32>} : memref<2x2x3840xf32, #tpu.memory_space<vmem>>, vector<1x1x757xf32>,
      %148 = vector.extract_strided_slice %135 {offsets = [3, 0], sizes = [1, 757], strides = [1, 1]} : vector<10x757xf32> to vector<1x757xf32>
      %c0_60 = arith.constant 0 : index
      %c1_61 = arith.constant 1 : index
      %c2304_62 = arith.constant 2304 : index
      %149 = vector.load %arg9[%c0_60, %c1_61, %c2304_62] : memref<2x2x3840xf32, #tpu.memory_space<vmem>>, vector<1x1x757xf32>
      %150 = vector.shape_cast %149 : vector<1x1x757xf32> to vector<1x757xf32>
      %151 = vector.shape_cast %148 : vector<1x757xf32> to vector<1x1x757xf32>
      tpu.vector_store %arg9[%c0_60, %c1_61, %c2304_62], %151 {strides = array<i32>} : memref<2x2x3840xf32, #tpu.memory_space<vmem>>, vector<1x1x757xf32>,
      %152 = vector.extract_strided_slice %135 {offsets = [4, 0], sizes = [1, 757], strides = [1, 1]} : vector<10x757xf32> to vector<1x757xf32>
      %c0_63 = arith.constant 0 : index
      %c1_64 = arith.constant 1 : index
      %c3072_65 = arith.constant 3072 : index
      %153 = vector.load %arg9[%c0_63, %c1_64, %c3072_65] : memref<2x2x3840xf32, #tpu.memory_space<vmem>>, vector<1x1x757xf32>
      %154 = vector.shape_cast %153 : vector<1x1x757xf32> to vector<1x757xf32>
      %155 = vector.shape_cast %152 : vector<1x757xf32> to vector<1x1x757xf32>
      tpu.vector_store %arg9[%c0_63, %c1_64, %c3072_65], %155 {strides = array<i32>} : memref<2x2x3840xf32, #tpu.memory_space<vmem>>, vector<1x1x757xf32>,
      %156 = vector.extract_strided_slice %135 {offsets = [5, 0], sizes = [1, 757], strides = [1, 1]} : vector<10x757xf32> to vector<1x757xf32>
      %c1_66 = arith.constant 1 : index
      %c1_67 = arith.constant 1 : index
      %c0_68 = arith.constant 0 : index
      %157 = vector.load %arg9[%c1_66, %c1_67, %c0_68] : memref<2x2x3840xf32, #tpu.memory_space<vmem>>, vector<1x1x757xf32>
      %158 = vector.shape_cast %157 : vector<1x1x757xf32> to vector<1x757xf32>
      %159 = vector.shape_cast %156 : vector<1x757xf32> to vector<1x1x757xf32>
      tpu.vector_store %arg9[%c1_66, %c1_67, %c0_68], %159 {strides = array<i32>} : memref<2x2x3840xf32, #tpu.memory_space<vmem>>, vector<1x1x757xf32>,
      %160 = vector.extract_strided_slice %135 {offsets = [6, 0], sizes = [1, 757], strides = [1, 1]} : vector<10x757xf32> to vector<1x757xf32>
      %c1_69 = arith.constant 1 : index
      %c1_70 = arith.constant 1 : index
      %c768_71 = arith.constant 768 : index
      %161 = vector.load %arg9[%c1_69, %c1_70, %c768_71] : memref<2x2x3840xf32, #tpu.memory_space<vmem>>, vector<1x1x757xf32>
      %162 = vector.shape_cast %161 : vector<1x1x757xf32> to vector<1x757xf32>
      %163 = vector.shape_cast %160 : vector<1x757xf32> to vector<1x1x757xf32>
      tpu.vector_store %arg9[%c1_69, %c1_70, %c768_71], %163 {strides = array<i32>} : memref<2x2x3840xf32, #tpu.memory_space<vmem>>, vector<1x1x757xf32>,
      %164 = vector.extract_strided_slice %135 {offsets = [7, 0], sizes = [1, 757], strides = [1, 1]} : vector<10x757xf32> to vector<1x757xf32>
      %c1_72 = arith.constant 1 : index
      %c1_73 = arith.constant 1 : index
      %c1536_74 = arith.constant 1536 : index
      %165 = vector.load %arg9[%c1_72, %c1_73, %c1536_74] : memref<2x2x3840xf32, #tpu.memory_space<vmem>>, vector<1x1x757xf32>
      %166 = vector.shape_cast %165 : vector<1x1x757xf32> to vector<1x757xf32>
      %167 = vector.shape_cast %164 : vector<1x757xf32> to vector<1x1x757xf32>
      tpu.vector_store %arg9[%c1_72, %c1_73, %c1536_74], %167 {strides = array<i32>} : memref<2x2x3840xf32, #tpu.memory_space<vmem>>, vector<1x1x757xf32>,
      %168 = vector.extract_strided_slice %135 {offsets = [8, 0], sizes = [1, 757], strides = [1, 1]} : vector<10x757xf32> to vector<1x757xf32>
      %c1_75 = arith.constant 1 : index
      %c1_76 = arith.constant 1 : index
      %c2304_77 = arith.constant 2304 : index
      %169 = vector.load %arg9[%c1_75, %c1_76, %c2304_77] : memref<2x2x3840xf32, #tpu.memory_space<vmem>>, vector<1x1x757xf32>
      %170 = vector.shape_cast %169 : vector<1x1x757xf32> to vector<1x757xf32>
      %171 = vector.shape_cast %168 : vector<1x757xf32> to vector<1x1x757xf32>
      tpu.vector_store %arg9[%c1_75, %c1_76, %c2304_77], %171 {strides = array<i32>} : memref<2x2x3840xf32, #tpu.memory_space<vmem>>, vector<1x1x757xf32>,
      %172 = vector.extract_strided_slice %135 {offsets = [9, 0], sizes = [1, 757], strides = [1, 1]} : vector<10x757xf32> to vector<1x757xf32>
      %c1_78 = arith.constant 1 : index
      %c1_79 = arith.constant 1 : index
      %c3072_80 = arith.constant 3072 : index
      %173 = vector.load %arg9[%c1_78, %c1_79, %c3072_80] : memref<2x2x3840xf32, #tpu.memory_space<vmem>>, vector<1x1x757xf32>
      %174 = vector.shape_cast %173 : vector<1x1x757xf32> to vector<1x757xf32>
      %175 = vector.shape_cast %172 : vector<1x757xf32> to vector<1x1x757xf32>
      tpu.vector_store %arg9[%c1_78, %c1_79, %c3072_80], %175 {strides = array<i32>} : memref<2x2x3840xf32, #tpu.memory_space<vmem>>, vector<1x1x757xf32>,
    } else {
    }
    %3 = arith.index_cast %arg0 : i32 to index
    %c0 = arith.constant 0 : index
    %c0_1 = arith.constant 0 : index
    %4 = vector.load %arg9[%3, %c0, %c0_1] : memref<2x2x3840xf32, #tpu.memory_space<vmem>>, vector<1x2x3840xf32>
    %5 = vector.shape_cast %4 : vector<1x2x3840xf32> to vector<2x3840xf32>
    %6 = arith.truncf %5 : vector<2x3840xf32> to vector<2x3840xbf16>
    %c0_2 = arith.constant 0 : index
    %c0_3 = arith.constant 0 : index
    %7 = vector.load %arg10[%c0_2, %c0_3] : memref<2x280xf32, #tpu.memory_space<vmem>>, vector<2x280xf32>
    %c0_4 = arith.constant 0 : index
    %c0_5 = arith.constant 0 : index
    %8 = vector.load %arg4[%c0_4, %c0_5] : memref<280x3840xbf16, #tpu.memory_space<vmem>>, vector<280x3840xbf16>
    %cst = arith.constant dense<0.000000e+00> : vector<2x280xf32>
    %9 = tpu.matmul %6, %8, %cst {dimension_numbers = #tpu.dot_dimension_numbers<[1], [1], [0], [0], [0, 0, 1, 0], [], []>} : vector<2x3840xbf16>, vector<280x3840xbf16>, vector<2x280xf32> -> vector<2x280xf32>
    %10 = arith.addf %7, %9 : vector<2x280xf32>
    %c0_6 = arith.constant 0 : index
    %c0_7 = arith.constant 0 : index
    %11 = vector.load %arg10[%c0_6, %c0_7] : memref<2x280xf32, #tpu.memory_space<vmem>>, vector<2x280xf32>
    tpu.vector_store %arg10[%c0_6, %c0_7], %10 {strides = array<i32>} : memref<2x280xf32, #tpu.memory_space<vmem>>, vector<2x280xf32>,
    %c1_i32 = arith.constant 1 : i32
    %12 = arith.cmpi eq, %arg0, %c1_i32 : i32
    %13 = arith.extui %12 : i1 to i32
    %c0_i32_8 = arith.constant 0 : i32
    %14 = arith.cmpi ne, %13, %c0_i32_8 : i32
    scf.if %14 {
      %c0_9 = arith.constant 0 : index
      %c0_10 = arith.constant 0 : index
      %15 = vector.load %arg10[%c0_9, %c0_10] : memref<2x280xf32, #tpu.memory_space<vmem>>, vector<2x280xf32>
      %c0_11 = arith.constant 0 : index
      %c0_12 = arith.constant 0 : index
      %16 = vector.load %arg5[%c0_11, %c0_12] : memref<1x280xf32, #tpu.memory_space<vmem>>, vector<1x280xf32>
      %17 = vector.broadcast %16 : vector<1x280xf32> to vector<2x280xf32>
      %18 = arith.addf %15, %17 : vector<2x280xf32>
      %cst_13 = arith.constant 0.000000e+00 : f32
      %19 = vector.broadcast %cst_13 : f32 to vector<2x280xf32>
      %20 = arith.maximumf %18, %19 : vector<2x280xf32>
      %c0_14 = arith.constant 0 : index
      %c0_15 = arith.constant 0 : index
      %21 = vector.load %arg6[%c0_14, %c0_15] : memref<10x280xf32, #tpu.memory_space<vmem>>, vector<10x280xf32>
      %cst_16 = arith.constant dense<0.000000e+00> : vector<2x10xf32>
      %22 = tpu.matmul %20, %21, %cst_16 {dimension_numbers = #tpu.dot_dimension_numbers<[1], [1], [0], [0], [0, 0, 1, 0], [], []>} : vector<2x280xf32>, vector<10x280xf32>, vector<2x10xf32> -> vector<2x10xf32>
      %c0_17 = arith.constant 0 : index
      %c0_18 = arith.constant 0 : index
      %23 = vector.load %arg7[%c0_17, %c0_18] : memref<1x10xf32, #tpu.memory_space<vmem>>, vector<1x10xf32>
      %24 = vector.broadcast %23 : vector<1x10xf32> to vector<2x10xf32>
      %25 = arith.addf %22, %24 : vector<2x10xf32>
      %cst_19 = arith.constant dense<0xFF800000> : vector<2xf32>
      %26 = vector.multi_reduction <maximumf>, %25, %cst_19 [1] : vector<2x10xf32> to vector<2xf32>
      %27 = vector.shape_cast %26 : vector<2xf32> to vector<2x1xf32>
      %28 = vector.broadcast %27 : vector<2x1xf32> to vector<2x10xf32>
      %29 = arith.subf %25, %28 : vector<2x10xf32>
      %30 = math.exp %29 : vector<2x10xf32>
      %cst_20 = arith.constant dense<0.000000e+00> : vector<2xf32>
      %31 = vector.multi_reduction <add>, %30, %cst_20 [1] : vector<2x10xf32> to vector<2xf32>
      %32 = vector.shape_cast %31 : vector<2xf32> to vector<2x1xf32>
      %33 = vector.broadcast %32 : vector<2x1xf32> to vector<2x10xf32>
      %34 = arith.divf %30, %33 : vector<2x10xf32>
      %c0_21 = arith.constant 0 : index
      %c0_22 = arith.constant 0 : index
      %35 = vector.load %arg8[%c0_21, %c0_22] : memref<2x10xf32, #tpu.memory_space<vmem>>, vector<2x10xf32>
      tpu.vector_store %arg8[%c0_21, %c0_22], %34 {strides = array<i32>} : memref<2x10xf32, #tpu.memory_space<vmem>>, vector<2x10xf32>,
    } else {
    }
    return
  }
  func.func @transform_0(%arg0: i32) -> (i32, i32) {
    %c0_i32 = arith.constant 0 : i32
    %c0_i32_0 = arith.constant 0 : i32
    %c0_i32_1 = arith.constant 0 : i32
    return %c0_i32, %c0_i32_0 : i32, i32
  }
  func.func @transform_1(%arg0: i32) -> (i32, i32) {
    %c0_i32 = arith.constant 0 : i32
    %c0_i32_0 = arith.constant 0 : i32
    %c0_i32_1 = arith.constant 0 : i32
    return %c0_i32, %c0_i32_0 : i32, i32
  }
  func.func @transform_2(%arg0: i32) -> (i32, i32) {
    %c0_i32 = arith.constant 0 : i32
    %c0_i32_0 = arith.constant 0 : i32
    %c0_i32_1 = arith.constant 0 : i32
    return %c0_i32, %c0_i32_0 : i32, i32
  }
  func.func @transform_3(%arg0: i32) -> (i32, i32) {
    %c0_i32 = arith.constant 0 : i32
    %c0_i32_0 = arith.constant 0 : i32
    return %c0_i32, %arg0 : i32, i32
  }
  func.func @transform_4(%arg0: i32) -> (i32, i32) {
    %c0_i32 = arith.constant 0 : i32
    %c0_i32_0 = arith.constant 0 : i32
    %c0_i32_1 = arith.constant 0 : i32
    return %c0_i32, %c0_i32_0 : i32, i32
  }
  func.func @transform_5(%arg0: i32) -> (i32, i32) {
    %c0_i32 = arith.constant 0 : i32
    %c0_i32_0 = arith.constant 0 : i32
    %c0_i32_1 = arith.constant 0 : i32
    return %c0_i32, %c0_i32_0 : i32, i32
  }
  func.func @transform_6(%arg0: i32) -> (i32, i32) {
    %c0_i32 = arith.constant 0 : i32
    %c0_i32_0 = arith.constant 0 : i32
    %c0_i32_1 = arith.constant 0 : i32
    return %c0_i32, %c0_i32_0 : i32, i32
  }
  func.func @transform_7(%arg0: i32) -> (i32, i32) {
    %c0_i32 = arith.constant 0 : i32
    %c0_i32_0 = arith.constant 0 : i32
    %c0_i32_1 = arith.constant 0 : i32
    return %c0_i32, %c0_i32_0 : i32, i32
  }
}

</mosaic_0001>

<bundles_post_ra>
// kernel: network_forward.1
= control target key start
LH: loop header
LB: loop body
LE: loop exit
PB: predicated region body
PF: predicated region fallthrough
CT: control target
= control target key end

     0   :  { %12 = vsyncpa [#allocation5], 0  ;;  %s12298_s0 = inlined_call_operand.vmem [shape: f32[2,784], index: 0, kind: input, shape index: {}]   ;;  %s12299_s1 = inlined_call_operand.hbm [shape: f32[10,28], index: 1, kind: input, shape index: {}]   ;;  %s12300_s2 = inlined_call_operand.vmem [shape: f32[10,1], index: 2, kind: input, shape index: {}]   ;;  %s12301_s3 = inlined_call_operand.hbm [shape: bf16[280,7680], index: 3, kind: input, shape index: {}]   ;;  %s12302_s4 = inlined_call_operand.hbm [shape: f32[1,280], index: 4, kind: input, shape index: {}]   ;;  %s12303_s5 = inlined_call_operand.hbm [shape: f32[10,280], index: 5, kind: input, shape index: {}]   ;;  %s12304_s6 = inlined_call_operand.hbm [shape: f32[1,10], index: 6, kind: input, shape index: {}]   ;;  %s12305_s7 = inlined_call_operand.hbm [shape: f32[2,10], index: 7, kind: output, shape index: {}]  }
   0x1   :  { %13 = vsyncpa [#allocation8], 0 }
   0x2   :  { %15 = vsyncpa [#allocation8 + $0x1], 0 }
   0x3   :  { %16 = vsyncpa [#allocation11], 0 }
   0x4   :  { %17 = vsyncpa [#allocation6], 0  ;;  %s9363_s24 = smov 0   ;;  %s9365_s25 = smov 0  }
   0x5   :  { %s9367_s26 = smov 0   ;;  %s9369_s27 = smov 0  }
   0x6 LB: > { %s9382_s28 = sadd.s32 4294967295, %s9286_s27   ;;  %s9385_s29 = sadd.s32 1, %s9286_s27   ;;  %s9286_s27 = sphi %s9369_s27, %s12714_s27   ;;  %s9282_s26 = sphi %s9367_s26, %s12713_s26   ;;  %s9278_s25 = sphi %s9365_s25, %s12712_s25   ;;  %s9274_s24 = sphi %s9363_s24, %s12711_s24  }
   0x7   : > { %s90_s30 = ssub.s32 %s9286_s27, %s9385_s29  ;;  %s93_s8 = sadd.s32 1, %s9282_s26 }
   0x8   : > { %p91_p0 = scmp.eq.s32.totalorder %s90_s30, 0  ;;  %p100_p1 = scmp.ne.s32.totalorder %s9282_s26, %s9278_s25 }
   0x9   : > { %p101_p2 = scmp.eq.s32.totalorder %s9286_s27, 0  ;;  %p106_p3 = scmp.ne.s32.totalorder %s9278_s25, %s9274_s24 }
   0xa   : > { %s9395_s9 = scalar_select %p91_p0, %s9282_s26, %s93_s8  }
   0xb   : > { %p9397_p4 = por %p101_p2, %p100_p1  ;;  %p12306_p5 = scmp.eq.s32.totalorder %s9382_s28, 0 }
   0xc   : > { %p7553_p6 = scmp.ge.s32.totalorder %s9286_s27, 1  ;;  %p201_p7 = scmp.lt.s32.totalorder %s9286_s27, 3 }
   0xd   : > { %p9406_p8 = por %p12306_p5, %p106_p3  ;;  %s9288_s13 = smov [#allocation9]  }
   0xe   : > { %p9411_p10 = pnand %p7553_p6, %p201_p7  ;;  %s233_s14 = sshll.u32 %s9288_s13, 4  ;;  %s234_s14 = int_to_ptr.vmem [resolvable:$true] %s233_s14 }
   0xf   : > { %s12415_s11 = scalar_select %p9406_p8, 1, 0 }
  0x10   : > { %s12416_s12 = scalar_select %p9411_p10, 1, 0 }
  0x11   : > { %p8177_p11 = pneg %p9411_p10  ;;  %p8198_p12 = scmp.lt.s32.totalorder %s9286_s27, 2 }
  0x12   : > { %s9289_s16 = smov [#allocation10]   ;;  %s9091_s19 = scalar_lea.vmem %s234_s14, 48 }
  0x13   : > { %p9420_p13 = pnand %p8177_p11, %p12306_p5  ;;  %s243_s17 = sshll.u32 %s9289_s16, 4  ;;  %s244_s17 = int_to_ptr.vmem [resolvable:$true] %s243_s17 }
  0x14   : > { %p9426_p0 = pnand %p8198_p12, %p9397_p4  ;;  %p9092_p2 = scmp.ne.s32.totalorder %s234_s14, %s9091_s19 }
  0x15   : > { %p9082_p1 = pneg %p9420_p13  ;;  %s9098_s20 = scalar_lea.vmem %s234_s14, 64 }
  0x16   : > { %s12418_s18 = scalar_select %p9426_p0, 1, 0 }
  0x17   : > { %p9094_p3 = pnand %p9092_p2, %p9082_p1  ;;  %p9099_p7 = scmp.lt.s32.totalorder %s234_s14, %s234_s14 }
  0x18   : > { %p9100_p11 = scmp.lt.s32.totalorder %s9098_s20, %s9091_s19 }
  0x19   : > { %p9095_p6 = pneg %p9094_p3 }
  0x1a   : > { %p9101_p9 = por %p9100_p11, %p9099_p7 }
  0x1c   : > { %p9102_p5 = pnand %p9101_p9, %p9095_p6 }
  0x1e   : > { %9105 = shalt.err (!%p9102_p5)
}
  0x1f   : > { %8183 = dma.hbm_to_vmem [thread:$0]  (!%p9420_p13), %s12302_s4, 48, %s234_s14, [#allocation8]  }
  0x20   : > { %s9117_s23 = scalar_lea.vmem %s244_s17, 768  ;;  %p9125_p3 = scmp.lt.s32.totalorder %s244_s17, %s244_s17 }
  0x21   : > { %p9118_p4 = scmp.ne.s32.totalorder %s244_s17, %s9117_s23  ;;  %p9126_p8 = scmp.lt.s32.totalorder %s9117_s23, %s9117_s23 }
  0x23   : > { %p9120_p12 = pnand %p9118_p4, %p9082_p1  ;;  %p9127_p10 = por %p9126_p8, %p9125_p3 }
  0x25   : > { %p9121_p2 = pneg %p9120_p12 }
  0x27   : > { %p9128_p0 = pnand %p9127_p10, %p9121_p2 }
  0x29   : > { %9131 = shalt.err (!%p9128_p0)
}
  0x2a   : > { %s9290_s24 = smov 384   ;;  %s9291_s30 = smov 24  }
  0x2b   : > { %8186 = dma.hbm_to_vmem [thread:$0]  (!%p9420_p13), %s12303_s5, 768, %s244_s17, [#allocation11], %s9290_s24, %s9290_s24, %s9291_s30  }
  0x2c   : > { %s9292_s13 = smov [#allocation4]  }
  0x2d   : > { %s216_s14 = sshll.u32 %s9292_s13, 4  ;;  %s217_s14 = int_to_ptr.vmem [resolvable:$true] %s216_s14 }
  0x2e   : > { %s9143_s16 = scalar_lea.vmem %s217_s14, 256  ;;  %p9151_p10 = scmp.lt.s32.totalorder %s217_s14, %s217_s14 }
  0x2f   : > { %p9144_p5 = scmp.ne.s32.totalorder %s217_s14, %s9143_s16  ;;  %p9152_p0 = scmp.lt.s32.totalorder %s9143_s16, %s9143_s16 }
  0x31   : > { %p9146_p9 = pnand %p9144_p5, %p9082_p1  ;;  %p9153_p6 = por %p9152_p0, %p9151_p10 }
  0x33   : > { %p9147_p8 = pneg %p9146_p9 }
  0x35   : > { %p9154_p7 = pnand %p9153_p6, %p9147_p8 }
  0x37   : > { %9157 = shalt.err (!%p9154_p7)
}
  0x38   : > { %s9293_s19 = smov 128   ;;  %s9294_s20 = smov 8  }
  0x39   : > { %8180 = dma.hbm_to_vmem [thread:$0]  (!%p9420_p13), %s12299_s1, 256, %s217_s14, [#allocation5], %s9293_s19, %s9293_s19, %s9294_s20  }
  0x3a   : > { %s9295_s22 = smov [#allocation12]   ;;  %s268_s24 = sand.u32 1, %s9286_s27  }
  0x3b   : > { %s257_s23 = sshll.u32 %s9295_s22, 4  ;;  %s258_s23 = int_to_ptr.vmem [resolvable:$true] %s257_s23 }
  0x3c   : > { %s9169_s30 = scalar_lea.vmem %s258_s23, 16  ;;  %s9176_s8 = scalar_lea.vmem %s258_s23, 32 }
  0x3d   : > { %p9170_p11 = scmp.ne.s32.totalorder %s258_s23, %s9169_s30  ;;  %p9177_p2 = scmp.lt.s32.totalorder %s258_s23, %s258_s23 }
  0x3e   : > { %p9178_p3 = scmp.lt.s32.totalorder %s9176_s8, %s9169_s30 }
  0x3f   : > { %p9172_p4 = pnand %p9170_p11, %p9082_p1 }
  0x40   : > { %p9179_p5 = por %p9178_p3, %p9177_p2 }
  0x41   : > { %p9173_p12 = pneg %p9172_p4 }
  0x43   : > { %p9180_p9 = pnand %p9179_p5, %p9173_p12 }
  0x45   : > { %9183 = shalt.err (!%p9180_p9)
}
  0x46   : > { %8189 = dma.hbm_to_vmem [thread:$0]  (!%p9420_p13), %s12304_s6, 16, %s258_s23, [#allocation11]  }
  0x47   : > { %s270_s14 = sand.u32 1, %s9282_s26   ;;  %s8141_s16 = smul.u32 1920, %s9286_s27 }
  0x48   : > { %s8153_s19 = smul.u32 4200, %s270_s14  ;;  %s9474_s30 = scalar_lea.sflag [#allocation8], %s268_s24 }
  0x49   : > { %s9470_s21 = scalar_lea.hbm %s12301_s3, %s8141_s16  ;;  %p12419_p13 = scmp.ne.s32.totalorder %s12418_s18, 0 }
  0x4a   : > { %s272_s22 = scalar_lea.vmem [#allocation7], %s8153_s19  ;;  %s9184_s8 = scalar_lea.hbm %s9470_s21, 67200 }
  0x4b   : > { %s279_s15 = sshll.u32 %s272_s22, 4  ;;  %p9185_p1 = scmp.ne.s32.totalorder %s9470_s21, %s9184_s8  ;;  %s9472_s15 = int_to_ptr.vmem [resolvable:$true] %s279_s15 }
  0x4c   : > { %p9186_p8 = pneg %p12419_p13  ;;  %s9189_s10 = scalar_lea.hbm %s12301_s3, 134400 }
  0x4d   : > { %p9190_p6 = scmp.lt.s32.totalorder %s9470_s21, %s12301_s3  ;;  %p9191_p7 = scmp.lt.s32.totalorder %s9189_s10, %s9184_s8 }
  0x4e   : > { %p9187_p10 = pnand %p9186_p8, %p9185_p1 }
  0x4f   : > { %p9192_p11 = por %p9191_p7, %p9190_p6 }
  0x50   : > { %p9188_p0 = pneg %p9187_p10 }
  0x52   : > { %p9193_p4 = pnand %p9192_p11, %p9188_p0 }
  0x54   : > { %9196 = shalt.err (!%p9193_p4)
}
  0x55   : > { %s9197_s24 = scalar_lea.vmem %s9472_s15, 67200  ;;  %s9296_s16 = smov [#allocation7]  }
  0x56   : > { %p9198_p12 = scmp.ne.s32.totalorder %s9472_s15, %s9197_s24  ;;  %s9202_s19 = sshll.u32 %s9296_s16, 4  ;;  %s9203_s19 = int_to_ptr.vmem [resolvable:$false] %s9202_s19 }
  0x57   : > { %s9204_s20 = scalar_lea.vmem %s9203_s19, 134400  ;;  %p9205_p5 = scmp.lt.s32.totalorder %s9472_s15, %s9203_s19 }
  0x58   : > { %p9200_p2 = pnand %p9198_p12, %p9186_p8  ;;  %p9206_p9 = scmp.lt.s32.totalorder %s9204_s20, %s9197_s24 }
  0x5a   : > { %p9201_p3 = pneg %p9200_p2  ;;  %p9207_p1 = por %p9206_p9, %p9205_p5 }
  0x5c   : > { %p9208_p10 = pnand %p9207_p1, %p9201_p3 }
  0x5e   : > { %9211 = shalt.err (!%p9208_p10)
}
  0x5f   : > { %s9297_s17 = smov 3840   ;;  %s9298_s22 = smov 1920  }
  0x60   : > { %s9299_s8 = smov 120   ;;  %p12420_p8 = scmp.ne.s32.totalorder %s12416_s12, 0 }
  0x61   : > { %8193 = dma.hbm_to_vmem [thread:$0]  (!%p12419_p13), %s9470_s21, 67200, %s9472_s15, %s9474_s30, %s9297_s17, %s9298_s22, %s9299_s8  }
  0x62   : > { %291 = sbr.rel (%p12420_p8) target bundleno = 2777 (0xad9), region = 48  ;;  %p12421_p0 = scmp.eq.s32.totalorder (!%p12420_p8), %s9382_s28, 0 }
  0x67   : > { %9253 = dma.done.wait (%p12421_p0), [#allocation5], 256   ;;  %p12422_p6 = pmov %p12421_p0 }
  0x68   : > { %s297_s27 = sand.u32 1, %s9382_s28   ;;  %s299_s23 = sand.u32 1, %s9278_s25  }
  0x69   : > { %9255 = vsyncadd (%p12422_p6), [#allocation5], 4294967040  ;;  %s8154_s10 = smul.u32 4200, %s299_s23  ;;  %s298_s13 = scalar_lea.sflag [#allocation8], %s297_s27 }
  0x6a   : > { %p12423_p7 = scmp.ne.s32.totalorder %s12415_s11, 0 }
  0x6b   : > { %s9503_s14 = scalar_lea.vmem [#allocation7], %s8154_s10 }
  0x6c   : > { %9257 = dma.done.wait (%p12423_p7), %s298_s13, 67200  }
  0x6d   : > { %9259 = vsyncadd (%p12423_p7), %s298_s13, 4294900096  ;;  %p12424_p13 = pmov %p12421_p0 }
  0x6e   : > { %p12425_p11 = pmov %p12421_p0 }
  0x6f   : > { %9261 = dma.done.wait (%p12424_p13), [#allocation8], 48  }
  0x70   : > { %9263 = vsyncadd (%p12425_p11), [#allocation8], 4294967248  ;;  %p12426_p4 = pmov %p12421_p0 }
  0x71   : > { %p12427_p12 = pmov %p12421_p0 }
  0x72   : > { %9265 = dma.done.wait (%p12426_p4), [#allocation11], 784  }
  0x73   : > { %9267 = vsyncadd (%p12427_p12), [#allocation11], 4294966512  ;;  %p12428_p2 = scmp.ne.s32.totalorder %s9382_s28, 0 }
  0x75   : > { %344 = sbr.rel (%p12428_p2) target bundleno = 941 (0x3ad), region = 72 }
  0x7a   : > { %v12310_v0 = vlaneseq  ;;  %v9525_v2 = vld [vmem:[%s12298_s0] sm:$0xff]  ;;  %s9300_s18 = smov 127   ;;  %v9553_v12 = vld [vmem:[%s12298_s0 + $0x8] sm:$0x3f]  ;;  %s9301_s30 = smov 126   ;;  %vm781_vm0 = vcmask 1040384  }
  0x7b   : > { %s9302_s24 = smov 125   ;;  %s9303_s16 = smov 124   ;;  %vm12381_vm1 = vcmask 973824   ;;  %vm12380_vm2 = vcmask 982016   ;;  %vm12375_vm3 = vcmask 965632   ;;  %vm12374_vm4 = vcmask 957440  }
  0x7c   : > { %v9520_v1 = vshrl.u32 %v12310_v0, 7  ;;  %s9304_s19 = smov 123   ;;  %s9305_s20 = smov 122   ;;  %vm361_vm5 = vcmask 1041408   ;;  %vm794_vm6 = vcmask 1042432   ;;  %vm417_vm7 = vcmask 1039360  }
  0x7d   : > { %s9306_s17 = smov 121   ;;  %s9307_s22 = smov 120   ;;  %vm441_vm8 = vcmask 1031168   ;;  %vm465_vm9 = vcmask 1022976   ;;  %vm489_vm10 = vcmask 1014784   ;;  %vm801_vm11 = vcmask 1043456  }
  0x7e   : > { %12429 = vst [vmem:[#allocation19_spill] sm:$0xff] %v9520_v1  ;;  %v385_v3 = vsub.s32 4, %v9520_v1  ;;  %v377_v4 = vsub.s32 0, %v9520_v1  ;;  %v389_v5 = vsub.s32 6, %v9520_v1  ;;  %v381_v6 = vsub.s32 2, %v9520_v1  ;;  %s9308_s8 = smov 119  }
  0x7f   : > { %v12312_v11 = vsub.s32 3, %v9520_v1  ;;  %v1514_v16 = vsub.s32 7, %v9520_v1  ;;  %s9309_s27 = smov 118   ;;  %s9310_s23 = smov 117   ;;  %v12311_v27 = vsub.s32 5, %v9520_v1  ;;  %v12313_v31 = vsub.s32 1, %v9520_v1 }
  0x80   : > { %v9534_v7 = vrot.slane %v9525_v2, %v385_v3  ;;  %v9537_v8 = vrot.slane %v9525_v2, %v377_v4  ;;  %v9544_v9 = vrot.slane %v9525_v2, %v389_v5  ;;  %v9547_v10 = vrot.slane %v9525_v2, %v381_v6  ;;  %s9311_s10 = smov 116   ;;  %s9312_s13 = smov 112  }
  0x81   : > { %v9558_v13 = vrot.slane %v9525_v2, %v12312_v11  ;;  %v9563_v14 = vrot.slane %v9553_v12, %v381_v6  ;;  %v9568_v15 = vrot.slane %v9553_v12, %v377_v4  ;;  %v9572_v17 = vrot.slane %v9525_v2, %v1514_v16  ;;  %s9313_s11 = smov 115   ;;  %s9314_s12 = smov 114  }
  0x82   : > { %409 = vrot.lane.b32.xlu1 %v9534_v7, %s9300_s18  ;;  %405 = vrot.lane.b32.xlu0 %v9537_v8, %s9300_s18  ;;  %v9717_v26 = vrot.slane %v9553_v12, %v385_v3  ;;  %v9731_v30 = vrot.slane %v9525_v2, %v12311_v27  ;;  %v9745_v34 = vrot.slane %v9525_v2, %v12313_v31  ;;  %vm513_vm12 = vcmask 1006592  }
  0x83   : > { %12430 = vst [vmem:[#allocation20_spill] sm:$0xff] %v9558_v13  ;;  %12431 = vst [vmem:[#allocation21_spill] sm:$0xff] %v9563_v14  ;;  %vm12384_vm13 = vcmask 1044480   ;;  %vm537_vm14 = vcmask 998400   ;;  %vm12383_vm15 = vcmask 1045504  }
  0x84   : > { %12432 = vst [vmem:[#allocation22_spill] sm:$0xff] %v9572_v17  ;;  %12436 = vst [vmem:[#allocation26_spill] sm:$0xff] %v9717_v26 }
  0x85   : > { %12437 = vst [vmem:[#allocation27_spill] sm:$0xff] %v9731_v30  ;;  %12439 = vst [vmem:[#allocation29_spill] sm:$0xff] %v9745_v34 }
  0x86   : > { %411 = vrot.lane.b32.xlu1 %v9544_v9, %s9300_s18  ;;  %407 = vrot.lane.b32.xlu0 %v9547_v10, %s9300_s18 }
  0x8a   : > { %415 = vrot.lane.b32.xlu1 %v9563_v14, %s9300_s18  ;;  %413 = vrot.lane.b32.xlu0 %v9568_v15, %s9300_s18 }
  0x8e   : > { %431 = vrot.lane.b32.xlu1 %v9547_v10, %s9301_s30  ;;  %429 = vrot.lane.b32.xlu0 %v9537_v8, %s9301_s30 }
  0x92   : > { %435 = vrot.lane.b32.xlu1 %v9544_v9, %s9301_s30  ;;  %433 = vrot.lane.b32.xlu0 %v9534_v7, %s9301_s30 }
  0x96   : > { %439 = vrot.lane.b32.xlu1 %v9563_v14, %s9301_s30  ;;  %437 = vrot.lane.b32.xlu0 %v9568_v15, %s9301_s30 }
  0x9a   : > { %455 = vrot.lane.b32.xlu1 %v9547_v10, %s9302_s24  ;;  %453 = vrot.lane.b32.xlu0 %v9537_v8, %s9302_s24 }
  0x9e   : > { %459 = vrot.lane.b32.xlu1 %v9544_v9, %s9302_s24  ;;  %457 = vrot.lane.b32.xlu0 %v9534_v7, %s9302_s24 }
  0xa2   : > { %463 = vrot.lane.b32.xlu1 %v9563_v14, %s9302_s24  ;;  %461 = vrot.lane.b32.xlu0 %v9568_v15, %s9302_s24 }
  0xa6   : > { %479 = vrot.lane.b32.xlu1 %v9547_v10, %s9303_s16  ;;  %477 = vrot.lane.b32.xlu0 %v9537_v8, %s9303_s16 }
  0xaa   : > { %483 = vrot.lane.b32.xlu1 %v9544_v9, %s9303_s16  ;;  %481 = vrot.lane.b32.xlu0 %v9534_v7, %s9303_s16 }
  0xae   : > { %487 = vrot.lane.b32.xlu1 %v9563_v14, %s9303_s16  ;;  %485 = vrot.lane.b32.xlu0 %v9568_v15, %s9303_s16 }
  0xb2   : > { %503 = vrot.lane.b32.xlu1 %v9547_v10, %s9304_s19  ;;  %501 = vrot.lane.b32.xlu0 %v9537_v8, %s9304_s19 }
  0xb6   : > { %507 = vrot.lane.b32.xlu1 %v9544_v9, %s9304_s19  ;;  %505 = vrot.lane.b32.xlu0 %v9534_v7, %s9304_s19 }
  0xba   : > { %511 = vrot.lane.b32.xlu1 %v9563_v14, %s9304_s19  ;;  %509 = vrot.lane.b32.xlu0 %v9568_v15, %s9304_s19 }
  0xbe   : > { %527 = vrot.lane.b32.xlu1 %v9547_v10, %s9305_s20  ;;  %525 = vrot.lane.b32.xlu0 %v9537_v8, %s9305_s20 }
  0xc2   : > { %531 = vrot.lane.b32.xlu1 %v9544_v9, %s9305_s20  ;;  %529 = vrot.lane.b32.xlu0 %v9534_v7, %s9305_s20 }
  0xc6   : > { %535 = vrot.lane.b32.xlu1 %v9563_v14, %s9305_s20  ;;  %533 = vrot.lane.b32.xlu0 %v9568_v15, %s9305_s20 }
  0xca   : > { %551 = vrot.lane.b32.xlu1 %v9547_v10, %s9306_s17  ;;  %549 = vrot.lane.b32.xlu0 %v9537_v8, %s9306_s17 }
  0xce   : > { %555 = vrot.lane.b32.xlu1 %v9544_v9, %s9306_s17  ;;  %553 = vrot.lane.b32.xlu0 %v9534_v7, %s9306_s17 }
  0xd2   : > { %559 = vrot.lane.b32.xlu1 %v9563_v14, %s9306_s17  ;;  %557 = vrot.lane.b32.xlu0 %v9568_v15, %s9306_s17 }
  0xd6   : > { %575 = vrot.lane.b32.xlu1 %v9547_v10, %s9307_s22  ;;  %573 = vrot.lane.b32.xlu0 %v9537_v8, %s9307_s22 }
  0xda   : > { %579 = vrot.lane.b32.xlu1 %v9544_v9, %s9307_s22  ;;  %577 = vrot.lane.b32.xlu0 %v9534_v7, %s9307_s22 }
  0xde   : > { %583 = vrot.lane.b32.xlu1 %v9563_v14, %s9307_s22  ;;  %581 = vrot.lane.b32.xlu0 %v9568_v15, %s9307_s22 }
  0xe2   : > { %599 = vrot.lane.b32.xlu1 %v9547_v10, %s9308_s8  ;;  %597 = vrot.lane.b32.xlu0 %v9537_v8, %s9308_s8 }
  0xe6   : > { %603 = vrot.lane.b32.xlu1 %v9544_v9, %s9308_s8  ;;  %601 = vrot.lane.b32.xlu0 %v9534_v7, %s9308_s8 }
  0xea   : > { %607 = vrot.lane.b32.xlu1 %v9563_v14, %s9308_s8  ;;  %605 = vrot.lane.b32.xlu0 %v9568_v15, %s9308_s8 }
  0xee   : > { %623 = vrot.lane.b32.xlu1 %v9547_v10, %s9309_s27  ;;  %621 = vrot.lane.b32.xlu0 %v9537_v8, %s9309_s27 }
  0xf2   : > { %627 = vrot.lane.b32.xlu1 %v9544_v9, %s9309_s27  ;;  %625 = vrot.lane.b32.xlu0 %v9534_v7, %s9309_s27 }
  0xf4   : > { %v9682_v18 = vpop.permute.xlu1 %409  ;;  %v9684_v19 = vpop.permute.xlu0 %405 }
  0xf5   : > { %12433 = vst [vmem:[#allocation23_spill] sm:$0xff] %v9684_v19 }
  0xf6   : > { %631 = vrot.lane.b32.xlu1 %v9563_v14, %s9309_s27  ;;  %629 = vrot.lane.b32.xlu0 %v9568_v15, %s9309_s27 }
  0xf8   : > { %v9690_v20 = vpop.permute.xlu1 %411  ;;  %v9692_v21 = vpop.permute.xlu0 %407 }
  0xfa   : > { %647 = vrot.lane.b32.xlu1 %v9547_v10, %s9310_s23  ;;  %645 = vrot.lane.b32.xlu0 %v9537_v8, %s9310_s23 }
  0xfc   : > { %v9698_v22 = vpop.permute.xlu1 %415  ;;  %v9700_v23 = vpop.permute.xlu0 %413 }
  0xfd   : > { %12434 = vst [vmem:[#allocation24_spill] sm:$0xff] %v9698_v22 }
  0xfe   : > { %651 = vrot.lane.b32.xlu1 %v9544_v9, %s9310_s23  ;;  %649 = vrot.lane.b32.xlu0 %v9534_v7, %s9310_s23 }
 0x100   : > { %v9706_v24 = vpop.permute.xlu1 %431  ;;  %v9708_v25 = vpop.permute.xlu0 %429 }
 0x101   : > { %12435 = vst [vmem:[#allocation25_spill] sm:$0xff] %v9708_v25 }
 0x102   : > { %655 = vrot.lane.b32.xlu1 %v9563_v14, %s9310_s23  ;;  %653 = vrot.lane.b32.xlu0 %v9568_v15, %s9310_s23 }
 0x104   : > { %v9720_v28 = vpop.permute.xlu1 %435  ;;  %v9722_v29 = vpop.permute.xlu0 %433 }
 0x106   : > { %1532 = vrot.lane.b32.xlu1 %v9558_v13, %s9300_s18  ;;  %872 = vrot.lane.b32.xlu0 %v9717_v26, %s9300_s18 }
 0x108   : > { %v9734_v32 = vpop.permute.xlu1 %439  ;;  %v9736_v33 = vpop.permute.xlu0 %437 }
 0x109   : > { %12438 = vst [vmem:[#allocation28_spill] sm:$0xff] %v9734_v32 }
 0x10a   : > { %1536 = vrot.lane.b32.xlu1 %v9572_v17, %s9300_s18  ;;  %1534 = vrot.lane.b32.xlu0 %v9731_v30, %s9300_s18 }
 0x10c   : > { %v9747_v35 = vpop.permute.xlu1 %455  ;;  %v9749_v36 = vpop.permute.xlu0 %453 }
 0x10d   : > { %12440 = vst [vmem:[#allocation30_spill] sm:$0xff] %v9749_v36 }
 0x10e   : > { %1530 = vrot.lane.b32.xlu1 %v9745_v34, %s9300_s18  ;;  %877 = vrot.lane.b32.xlu0 %v9717_v26, %s9301_s30 }
 0x110   : > { %v9755_v37 = vpop.permute.xlu1 %459  ;;  %v9757_v38 = vpop.permute.xlu0 %457 }
 0x112   : > { %1557 = vrot.lane.b32.xlu1 %v9731_v30, %s9301_s30  ;;  %1555 = vrot.lane.b32.xlu0 %v9558_v13, %s9301_s30 }
 0x114   : > { %v9763_v39 = vpop.permute.xlu1 %463  ;;  %v9765_v40 = vpop.permute.xlu0 %461 }
 0x115   : > { %12441 = vst [vmem:[#allocation31_spill] sm:$0xff] %v9763_v39 }
 0x116   : > { %882 = vrot.lane.b32.xlu1 %v9717_v26, %s9302_s24  ;;  %1559 = vrot.lane.b32.xlu0 %v9572_v17, %s9301_s30 }
 0x118   : > { %v9771_v41 = vpop.permute.xlu1 %479  ;;  %v9773_v42 = vpop.permute.xlu0 %477 }
 0x119   : > { %12442 = vst [vmem:[#allocation32_spill] sm:$0xff] %v9773_v42 }
 0x11a   : > { %912 = vrot.lane.b32.xlu1 %v9717_v26, %s9308_s8  ;;  %907 = vrot.lane.b32.xlu0 %v9717_v26, %s9307_s22 }
 0x11c   : > { %v9779_v43 = vpop.permute.xlu1 %483  ;;  %v9781_v44 = vpop.permute.xlu0 %481 }
 0x11e   : > { %1578 = vrot.lane.b32.xlu1 %v9558_v13, %s9302_s24  ;;  %1553 = vrot.lane.b32.xlu0 %v9745_v34, %s9301_s30 }
 0x120   : > { %v9787_v45 = vpop.permute.xlu1 %487  ;;  %v9789_v46 = vpop.permute.xlu0 %485 }
 0x121   : > { %12443 = vst [vmem:[#allocation33_spill] sm:$0xff] %v9787_v45  ;;  %12444 = vst [vmem:[#allocation34_spill] sm:$0xff] %v9789_v46 }
 0x122   : > { %1582 = vrot.lane.b32.xlu1 %v9572_v17, %s9302_s24  ;;  %1580 = vrot.lane.b32.xlu0 %v9731_v30, %s9302_s24 }
 0x124   : > { %v9795_v47 = vpop.permute.xlu1 %503  ;;  %v9797_v48 = vpop.permute.xlu0 %501 }
 0x125   : > { %12445 = vst [vmem:[#allocation35_spill] sm:$0xff] %v9797_v48 }
 0x126   : > { %1695 = vrot.lane.b32.xlu1 %v9731_v30, %s9307_s22  ;;  %1693 = vrot.lane.b32.xlu0 %v9558_v13, %s9307_s22 }
 0x128   : > { %v9803_v49 = vpop.permute.xlu1 %507  ;;  %v9805_v50 = vpop.permute.xlu0 %505 }
 0x129   : > { %12446 = vst [vmem:[#allocation36_spill] sm:$0xff] %v9803_v49 }
 0x12a   : > { %1716 = vrot.lane.b32.xlu1 %v9558_v13, %s9308_s8  ;;  %1697 = vrot.lane.b32.xlu0 %v9572_v17, %s9307_s22 }
 0x12c   : > { %v9811_v51 = vpop.permute.xlu1 %511  ;;  %v9813_v52 = vpop.permute.xlu0 %509 }
 0x12d   : > { %12447 = vst [vmem:[#allocation37_spill] sm:$0xff] %v9811_v51  ;;  %12448 = vst [vmem:[#allocation38_spill] sm:$0xff] %v9813_v52 }
 0x12e   : > { %1720 = vrot.lane.b32.xlu1 %v9572_v17, %s9308_s8  ;;  %1718 = vrot.lane.b32.xlu0 %v9731_v30, %s9308_s8 }
 0x130   : > { %v9819_v53 = vpop.permute.xlu1 %527  ;;  %v9821_v54 = vpop.permute.xlu0 %525 }
 0x131   : > { %12449 = vst [vmem:[#allocation39_spill] sm:$0xff] %v9821_v54 }
 0x132   : > { %917 = vrot.lane.b32.xlu1 %v9717_v26, %s9309_s27  ;;  %887 = vrot.lane.b32.xlu0 %v9717_v26, %s9303_s16 }
 0x134   : > { %v9827_v55 = vpop.permute.xlu1 %531  ;;  %v9829_v56 = vpop.permute.xlu0 %529 }
 0x135   : > { %12450 = vst [vmem:[#allocation40_spill] sm:$0xff] %v9827_v55 }
 0x136   : > { %1601 = vrot.lane.b32.xlu1 %v9558_v13, %s9303_s16  ;;  %1576 = vrot.lane.b32.xlu0 %v9745_v34, %s9302_s24 }
 0x138   : > { %v9835_v57 = vpop.permute.xlu1 %535  ;;  %v9837_v58 = vpop.permute.xlu0 %533 }
 0x139   : > { %12451 = vst [vmem:[#allocation41_spill] sm:$0xff] %v9835_v57  ;;  %12452 = vst [vmem:[#allocation42_spill] sm:$0xff] %v9837_v58 }
 0x13a   : > { %1605 = vrot.lane.b32.xlu1 %v9572_v17, %s9303_s16  ;;  %1603 = vrot.lane.b32.xlu0 %v9731_v30, %s9303_s16 }
 0x13c   : > { %v9843_v59 = vpop.permute.xlu1 %551  ;;  %v9845_v60 = vpop.permute.xlu0 %549 }
 0x13d   : > { %12453 = vst [vmem:[#allocation43_spill] sm:$0xff] %v9845_v60 }
 0x13e   : > { %1714 = vrot.lane.b32.xlu1 %v9745_v34, %s9308_s8  ;;  %1691 = vrot.lane.b32.xlu0 %v9745_v34, %s9307_s22 }
 0x140   : > { %v9851_v61 = vpop.permute.xlu1 %555  ;;  %v9853_v62 = vpop.permute.xlu0 %553 }
 0x141   : > { %12454 = vst [vmem:[#allocation44_spill] sm:$0xff] %v9851_v61  ;;  %v12462_v61 = vsub.s32 3, %v9520_v1 }
 0x142   : > { %1741 = vrot.lane.b32.xlu1 %v9731_v30, %s9309_s27  ;;  %1739 = vrot.lane.b32.xlu0 %v9558_v13, %s9309_s27 }
 0x143   : > { %v9959_v58 = vrot.slane %v9553_v12, %v12462_v61 }
 0x144   : > { %v9859_v63 = vpop.permute.xlu1 %559  ;;  %v9861_v2 = vpop.permute.xlu0 %557 }
 0x145   : > { %12455 = vst [vmem:[#allocation45_spill] sm:$0xff] %v9859_v63  ;;  %12456 = vst [vmem:[#allocation46_spill] sm:$0xff] %v9861_v2 }
 0x146   : > { %892 = vrot.lane.b32.xlu1 %v9717_v26, %s9304_s19  ;;  %1743 = vrot.lane.b32.xlu0 %v9572_v17, %s9309_s27  ;;  %12463 = vst [vmem:[#allocation51_spill] sm:$0xff] %v9959_v58 }
 0x148   : > { %v9867_v3 = vpop.permute.xlu1 %575  ;;  %v9869_v4 = vpop.permute.xlu0 %573 }
 0x14a   : > { %1599 = vrot.lane.b32.xlu1 %v9745_v34, %s9303_s16  ;;  %922 = vrot.lane.b32.xlu0 %v9717_v26, %s9310_s23 }
 0x14c   : > { %v9875_v5 = vpop.permute.xlu1 %579  ;;  %v9877_v6 = vpop.permute.xlu0 %577 }
 0x14e   : > { %1626 = vrot.lane.b32.xlu1 %v9731_v30, %s9304_s19  ;;  %1624 = vrot.lane.b32.xlu0 %v9558_v13, %s9304_s19 }
 0x150   : > { %v9883_v16 = vpop.permute.xlu1 %583  ;;  %v9885_v0 = vpop.permute.xlu0 %581 }
 0x151   : > { %12457 = vst [vmem:[#allocation47_spill] sm:$0xff] %v9883_v16 }
 0x152   : > { %1737 = vrot.lane.b32.xlu1 %v9745_v34, %s9309_s27  ;;  %1628 = vrot.lane.b32.xlu0 %v9572_v17, %s9304_s19 }
 0x154   : > { %v9891_v27 = vpop.permute.xlu1 %599  ;;  %v9893_v11 = vpop.permute.xlu0 %597 }
 0x156   : > { %1764 = vrot.lane.b32.xlu1 %v9731_v30, %s9310_s23  ;;  %1762 = vrot.lane.b32.xlu0 %v9558_v13, %s9310_s23 }
 0x158   : > { %v9899_v31 = vpop.permute.xlu1 %603  ;;  %v9901_v14 = vpop.permute.xlu0 %601 }
 0x15a   : > { %897 = vrot.lane.b32.xlu1 %v9717_v26, %s9305_s20  ;;  %1766 = vrot.lane.b32.xlu0 %v9572_v17, %s9310_s23 }
 0x15c   : > { %v9907_v60 = vpop.permute.xlu1 %607  ;;  %v9909_v54 = vpop.permute.xlu0 %605 }
 0x15d   : > { %12458 = vst [vmem:[#allocation48_spill] sm:$0xff] %v9907_v60 }
 0x15e   : > { %1647 = vrot.lane.b32.xlu1 %v9558_v13, %s9305_s20  ;;  %1622 = vrot.lane.b32.xlu0 %v9745_v34, %s9304_s19 }
 0x160   : > { %v9915_v48 = vpop.permute.xlu1 %623  ;;  %v9917_v42 = vpop.permute.xlu0 %621 }
 0x162   : > { %1651 = vrot.lane.b32.xlu1 %v9572_v17, %s9305_s20  ;;  %1649 = vrot.lane.b32.xlu0 %v9731_v30, %s9305_s20 }
 0x164   : > { %v9923_v36 = vpop.permute.xlu1 %627  ;;  %v9925_v25 = vpop.permute.xlu0 %625 }
 0x166   : > { %902 = vrot.lane.b32.xlu1 %v9717_v26, %s9306_s17  ;;  %1760 = vrot.lane.b32.xlu0 %v9745_v34, %s9310_s23  ;;  %v12460_v26 = vsub.s32 1, %v9520_v1 }
 0x168   : > { %v9931_v19 = vpop.permute.xlu1 %631  ;;  %v9933_v63 = vpop.permute.xlu0 %629  ;;  %v9950_v45 = vrot.slane %v9553_v12, %v12460_v26 }
 0x169   : > { %12459 = vst [vmem:[#allocation49_spill] sm:$0xff] %v9931_v19 }
 0x16a   : > { %1670 = vrot.lane.b32.xlu1 %v9558_v13, %s9306_s17  ;;  %1645 = vrot.lane.b32.xlu0 %v9745_v34, %s9305_s20  ;;  %12461 = vst [vmem:[#allocation50_spill] sm:$0xff] %v9950_v45 }
 0x16c   : > { %v9939_v57 = vpop.permute.xlu1 %647  ;;  %v9941_v51 = vpop.permute.xlu0 %645 }
 0x16e   : > { %1674 = vrot.lane.b32.xlu1 %v9572_v17, %s9306_s17  ;;  %1672 = vrot.lane.b32.xlu0 %v9731_v30, %s9306_s17  ;;  %v12464_v17 = vsub.s32 5, %v9520_v1 }
 0x170   : > { %v9952_v2 = vpop.permute.xlu1 %651  ;;  %v9954_v13 = vpop.permute.xlu0 %649  ;;  %v9968_v26 = vrot.slane %v9553_v12, %v12464_v17 }
 0x172   : > { %1538 = vrot.lane.b32.xlu1 %v9950_v45, %s9300_s18  ;;  %1668 = vrot.lane.b32.xlu0 %v9745_v34, %s9306_s17  ;;  %12465 = vst [vmem:[#allocation52_spill] sm:$0xff] %v9968_v26 }
 0x174   : > { %v9970_v30 = vpop.permute.xlu1 %655  ;;  %v9972_v55 = vpop.permute.xlu0 %653 }
 0x175   : > { %12466 = vst [vmem:[#allocation53_spill] sm:$0xff] %v9970_v30 }
 0x176   : > { %1976 = vrot.lane.b32.xlu1 %v9968_v26, %s9300_s18  ;;  %1540 = vrot.lane.b32.xlu0 %v9959_v58, %s9300_s18  ;;  %s9315_s18 = smov 113  }
 0x178   : > { %v9978_v61 = vpop.permute.xlu1 %1532  ;;  %v9980_v52 = vpop.permute.xlu0 %872 }
 0x179   : > { %12467 = vst [vmem:[#allocation54_spill] sm:$0xff] %v9978_v61  ;;  %12468 = vst [vmem:[#allocation55_spill] sm:$0xff] %v9980_v52 }
 0x17a   : > { %1563 = vrot.lane.b32.xlu1 %v9959_v58, %s9301_s30  ;;  %1561 = vrot.lane.b32.xlu0 %v9950_v45, %s9301_s30 }
 0x17c   : > { %v9986_v12 = vpop.permute.xlu1 %1536  ;;  %v9988_v17 = vpop.permute.xlu0 %1534 }
 0x17d   : > { %12469 = vst [vmem:[#allocation56_spill] sm:$0xff] %v9986_v12  ;;  %12470 = vst [vmem:[#allocation57_spill] sm:$0xff] %v9988_v17 }
 0x17e   : > { %1584 = vrot.lane.b32.xlu1 %v9950_v45, %s9302_s24  ;;  %1981 = vrot.lane.b32.xlu0 %v9968_v26, %s9301_s30 }
 0x180   : > { %v9994_v1 = vpop.permute.xlu1 %1530  ;;  %v9996_v61 = vpop.permute.xlu0 %877 }
 0x181   : > { %12471 = vst [vmem:[#allocation58_spill] sm:$0xff] %v9994_v1  ;;  %12472 = vst [vmem:[#allocation59_spill] sm:$0xff] %v9996_v61 }
 0x182   : > { %1699 = vrot.lane.b32.xlu1 %v9950_v45, %s9307_s22  ;;  %1586 = vrot.lane.b32.xlu0 %v9959_v58, %s9302_s24 }
 0x184   : > { %v10002_v52 = vpop.permute.xlu1 %1557  ;;  %v10004_v12 = vpop.permute.xlu0 %1555 }
 0x185   : > { %12473 = vst [vmem:[#allocation60_spill] sm:$0xff] %v10002_v52  ;;  %12474 = vst [vmem:[#allocation61_spill] sm:$0xff] %v10004_v12 }
 0x186   : > { %1722 = vrot.lane.b32.xlu1 %v9950_v45, %s9308_s8  ;;  %1701 = vrot.lane.b32.xlu0 %v9959_v58, %s9307_s22 }
 0x188   : > { %v10010_v17 = vpop.permute.xlu1 %882  ;;  %v10012_v1 = vpop.permute.xlu0 %1559 }
 0x189   : > { %12475 = vst [vmem:[#allocation62_spill] sm:$0xff] %v10010_v17  ;;  %12476 = vst [vmem:[#allocation63_spill] sm:$0xff] %v10012_v1 }
 0x18a   : > { %1986 = vrot.lane.b32.xlu1 %v9968_v26, %s9302_s24  ;;  %1724 = vrot.lane.b32.xlu0 %v9959_v58, %s9308_s8 }
 0x18c   : > { %v10018_v61 = vpop.permute.xlu1 %912  ;;  %v10020_v52 = vpop.permute.xlu0 %907 }
 0x18d   : > { %12477 = vst [vmem:[#allocation64_spill] sm:$0xff] %v10018_v61  ;;  %12478 = vst [vmem:[#allocation65_spill] sm:$0xff] %v10020_v52  ;;  %v613_v61 = vsel %vm12381_vm1, %v9899_v31, %v9909_v54 }
 0x18e   : > { %2016 = vrot.lane.b32.xlu1 %v9968_v26, %s9308_s8  ;;  %2011 = vrot.lane.b32.xlu0 %v9968_v26, %s9307_s22 }
 0x190   : > { %v10026_v12 = vpop.permute.xlu1 %1578  ;;  %v10028_v17 = vpop.permute.xlu0 %1553 }
 0x191   : > { %12479 = vst [vmem:[#allocation66_spill] sm:$0xff] %v10026_v12  ;;  %12480 = vst [vmem:[#allocation67_spill] sm:$0xff] %v10028_v17 }
 0x192   : > { %1609 = vrot.lane.b32.xlu1 %v9959_v58, %s9303_s16  ;;  %1607 = vrot.lane.b32.xlu0 %v9950_v45, %s9303_s16 }
 0x194   : > { %v10034_v1 = vpop.permute.xlu1 %1582  ;;  %v10036_v34 = vpop.permute.xlu0 %1580 }
 0x195   : > { %12481 = vst [vmem:[#allocation68_spill] sm:$0xff] %v10034_v1  ;;  %12482 = vst [vmem:[#allocation69_spill] sm:$0xff] %v10036_v34 }
 0x196   : > { %1747 = vrot.lane.b32.xlu1 %v9959_v58, %s9309_s27  ;;  %1745 = vrot.lane.b32.xlu0 %v9950_v45, %s9309_s27 }
 0x198   : > { %v10042_v52 = vpop.permute.xlu1 %1695  ;;  %v10044_v12 = vpop.permute.xlu0 %1693 }
 0x199   : > { %12483 = vst [vmem:[#allocation70_spill] sm:$0xff] %v10042_v52  ;;  %12484 = vst [vmem:[#allocation71_spill] sm:$0xff] %v10044_v12 }
 0x19a   : > { %2021 = vrot.lane.b32.xlu1 %v9968_v26, %s9309_s27  ;;  %1991 = vrot.lane.b32.xlu0 %v9968_v26, %s9303_s16 }
 0x19c   : > { %v10050_v17 = vpop.permute.xlu1 %1716  ;;  %v10052_v1 = vpop.permute.xlu0 %1697 }
 0x19d   : > { %12485 = vst [vmem:[#allocation72_spill] sm:$0xff] %v10050_v17  ;;  %12486 = vst [vmem:[#allocation73_spill] sm:$0xff] %v10052_v1 }
 0x19e   : > { %1632 = vrot.lane.b32.xlu1 %v9959_v58, %s9304_s19  ;;  %1630 = vrot.lane.b32.xlu0 %v9950_v45, %s9304_s19 }
 0x1a0   : > { %v10058_v34 = vpop.permute.xlu1 %1720  ;;  %v10060_v52 = vpop.permute.xlu0 %1718 }
 0x1a1   : > { %12487 = vst [vmem:[#allocation74_spill] sm:$0xff] %v10058_v34  ;;  %12488 = vst [vmem:[#allocation75_spill] sm:$0xff] %v10060_v52 }
 0x1a2   : > { %1770 = vrot.lane.b32.xlu1 %v9959_v58, %s9310_s23  ;;  %1768 = vrot.lane.b32.xlu0 %v9950_v45, %s9310_s23 }
 0x1a4   : > { %v10066_v12 = vpop.permute.xlu1 %917  ;;  %v10068_v17 = vpop.permute.xlu0 %887 }
 0x1a5   : > { %12489 = vst [vmem:[#allocation76_spill] sm:$0xff] %v10066_v12  ;;  %12490 = vst [vmem:[#allocation77_spill] sm:$0xff] %v10068_v17 }
 0x1a6   : > { %2026 = vrot.lane.b32.xlu1 %v9968_v26, %s9310_s23  ;;  %1996 = vrot.lane.b32.xlu0 %v9968_v26, %s9304_s19 }
 0x1a8   : > { %v10074_v1 = vpop.permute.xlu1 %1601  ;;  %v10076_v34 = vpop.permute.xlu0 %1576 }
 0x1a9   : > { %12491 = vst [vmem:[#allocation78_spill] sm:$0xff] %v10074_v1  ;;  %12492 = vst [vmem:[#allocation79_spill] sm:$0xff] %v10076_v34 }
 0x1aa   : > { %1655 = vrot.lane.b32.xlu1 %v9959_v58, %s9305_s20  ;;  %1653 = vrot.lane.b32.xlu0 %v9950_v45, %s9305_s20 }
 0x1ac   : > { %v10082_v52 = vpop.permute.xlu1 %1605  ;;  %v10084_v12 = vpop.permute.xlu0 %1603 }
 0x1ad   : > { %12493 = vst [vmem:[#allocation80_spill] sm:$0xff] %v10082_v52  ;;  %12494 = vst [vmem:[#allocation81_spill] sm:$0xff] %v10084_v12 }
 0x1ae   : > { %1676 = vrot.lane.b32.xlu1 %v9950_v45, %s9306_s17  ;;  %2001 = vrot.lane.b32.xlu0 %v9968_v26, %s9305_s20  ;;  %v612_v45 = vsel %vm12381_vm1, %v9901_v14, %v9899_v31  ;;  %v638_v31 = vsel %vm12375_vm3, %v9933_v63, %v9931_v19 }
 0x1b0   : > { %v10090_v17 = vpop.permute.xlu1 %1714  ;;  %v10092_v1 = vpop.permute.xlu0 %1691 }
 0x1b1   : > { %12495 = vst [vmem:[#allocation82_spill] sm:$0xff] %v10090_v17  ;;  %12496 = vst [vmem:[#allocation83_spill] sm:$0xff] %v10092_v1  ;;  %v587_v1 = vsel %vm12380_vm2, %v9867_v3, %v9877_v6  ;;  %v635_v17 = vsel %vm12375_vm3, %v9915_v48, %v9925_v25 }
 0x1b2   : > { %2006 = vrot.lane.b32.xlu1 %v9968_v26, %s9306_s17  ;;  %1678 = vrot.lane.b32.xlu0 %v9959_v58, %s9306_s17  ;;  %v611_v26 = vsel %vm12381_vm1, %v9891_v27, %v9901_v14  ;;  %v588_v14 = vsel %vm12380_vm2, %v9877_v6, %v9875_v5 }
 0x1b3   : > { %v830_v6 = vsel %vm781_vm0, %v587_v1, %v611_v26  ;;  %v637_v1 = vsel %vm12375_vm3, %v9923_v36, %v9933_v63 }
 0x1b4   : > { %v10098_v34 = vpop.permute.xlu1 %1741  ;;  %v10100_v52 = vpop.permute.xlu0 %1739 }
 0x1b5   : > { %12497 = vst [vmem:[#allocation84_spill] sm:$0xff] %v10098_v34  ;;  %12498 = vst [vmem:[#allocation85_spill] sm:$0xff] %v10100_v52  ;;  %v636_v52 = vsel %vm12375_vm3, %v9925_v25, %v9923_v36  ;;  %v589_v25 = vsel %vm12380_vm2, %v9875_v5, %v9885_v0  ;;  %v831_v34 = vsel %vm781_vm0, %v588_v14, %v612_v45 }
 0x1b6   : > { %677 = vrot.lane.b32.xlu1 %v9534_v7, %s9311_s10  ;;  %675 = vrot.lane.b32.xlu0 %v9547_v10, %s9311_s10  ;;  %v837_v39 = vsel %vm361_vm5, %v831_v34, %v636_v52  ;;  %v836_v5 = vsel %vm361_vm5, %v830_v6, %v635_v17  ;;  %v590_v34 = vsel %vm12380_vm2, %v9885_v0, %v9883_v16 }
 0x1b7   : > { %v661_v52 = vsel %vm12374_vm4, %v9952_v2, %v9972_v55  ;;  %v662_v36 = vsel %vm12374_vm4, %v9972_v55, %v9970_v30  ;;  %v610_v14 = vsel %vm12381_vm1, %v9893_v11, %v9891_v27 }
 0x1b8   : > { %v10112_v58 = vpop.permute.xlu1 %892  ;;  %v10114_v12 = vpop.permute.xlu0 %1743 }
 0x1b9   : > { %12499 = vst [vmem:[#allocation86_spill] sm:$0xff] %v10112_v58  ;;  %12500 = vst [vmem:[#allocation87_spill] sm:$0xff] %v10114_v12  ;;  %v659_v58 = vsel %vm12374_vm4, %v9939_v57, %v9954_v13  ;;  %v660_v12 = vsel %vm12374_vm4, %v9954_v13, %v9952_v2  ;;  %v614_v13 = vsel %vm12381_vm1, %v9909_v54, %v9907_v60 }
 0x1ba   : > { %681 = vrot.lane.b32.xlu1 %v9568_v15, %s9311_s10  ;;  %679 = vrot.lane.b32.xlu0 %v9544_v9, %s9311_s10  ;;  %v10162_v45 = vsel %vm794_vm6, %v837_v39, %v660_v12  ;;  %v10165_v54 = vsel %vm794_vm6, %v836_v5, %v659_v58  ;;  %v832_v39 = vsel %vm781_vm0, %v589_v25, %v613_v61 }
 0x1bb   : > { %12501 = vst [vmem:[#allocation88_spill] sm:$0xff] %v10162_v45  ;;  %12502 = vst [vmem:[#allocation89_spill] sm:$0xff] %v10165_v54  ;;  %v833_v58 = vsel %vm781_vm0, %v590_v34, %v614_v13  ;;  %v838_v26 = vsel %vm361_vm5, %v832_v39, %v637_v1  ;;  %v634_v13 = vsel %vm12375_vm3, %v9917_v42, %v9915_v48  ;;  %vm12382_vm3 = vcmask 1046528  }
 0x1bc   : > { %v10149_v49 = vpop.permute.xlu1 %1599  ;;  %v10151_v46 = vpop.permute.xlu0 %922  ;;  %v839_v2 = vsel %vm361_vm5, %v833_v58, %v638_v31  ;;  %v10192_v12 = vsel %vm794_vm6, %v838_v26, %v661_v52  ;;  %v586_v5 = vsel %vm12380_vm2, %v9869_v4, %v9867_v3  ;;  %v658_v1 = vsel %vm12374_vm4, %v9941_v51, %v9939_v57 }
 0x1bd   : > { %v10189_v55 = vsel %vm794_vm6, %v839_v2, %v662_v36  ;;  %12504 = vst [vmem:[#allocation91_spill] sm:$0xff] %v10192_v12  ;;  %v829_v11 = vsel %vm781_vm0, %v586_v5, %v610_v14  ;;  %v420_v51 = vsel %vm417_vm7, %v9682_v18, %v9690_v20  ;;  %v419_v57 = vsel %vm417_vm7, %v9692_v21, %v9682_v18 }
 0x1be   : > { %979 = vrot.lane.b32.xlu1 %v10162_v45, %s9312_s13  ;;  %977 = vrot.lane.b32.xlu0 %v10165_v54, %s9312_s13  ;;  %12503 = vst [vmem:[#allocation90_spill] sm:$0xff] %v10189_v55  ;;  %v835_v27 = vsel %vm361_vm5, %v829_v11, %v634_v13  ;;  %v421_v4 = vsel %vm417_vm7, %v9690_v20, %v9700_v23  ;;  %vm12388_vm4 = vcmask 990208   ;;  %v12517_v54 = vld [vmem:[#allocation41_spill] sm:$0xff]  ;;  %vm362_vm2 = vcmask 1043458  }
 0x1bf   : > { %v10233_v3 = vsel %vm794_vm6, %v835_v27, %v658_v1  ;;  %v443_v31 = vsel %vm441_vm8, %v9706_v24, %v9722_v29  ;;  %v784_v18 = vsel %vm781_vm0, %v9534_v7, %v420_v51  ;;  %v444_v36 = vsel %vm441_vm8, %v9722_v29, %v9720_v28  ;;  %vm363_vm1 = vmor %vm362_vm2, %vm361_vm5 }
 0x1c0   : > { %v10182_v0 = vpop.permute.xlu1 %1626  ;;  %v10184_v63 = vpop.permute.xlu0 %1624  ;;  %12505 = vst [vmem:[#allocation92_spill] sm:$0xff] %v10233_v3  ;;  %v783_v20 = vsel %vm781_vm0, %v9547_v10, %v419_v57  ;;  %v445_v39 = vsel %vm441_vm8, %v9720_v28, %v9736_v33  ;;  %v467_v58 = vsel %vm465_vm9, %v9747_v35, %v9757_v38  ;;  %v422_v29 = vsel %vm417_vm7, %v9700_v23, %v9698_v22 }
 0x1c1   : > { %v785_v2 = vsel %vm781_vm0, %v9544_v9, %v421_v4  ;;  %v789_v28 = vsel %vm361_vm5, %v783_v20, %v443_v31  ;;  %v491_v26 = vsel %vm489_vm10, %v9771_v41, %v9781_v44  ;;  %v790_v14 = vsel %vm361_vm5, %v784_v18, %v444_v36  ;;  %v12506_v18 = vld [vmem:[#allocation31_spill] sm:$0xff] }
 0x1c2   : > { %983 = vrot.lane.b32.xlu1 %v10189_v55, %s9312_s13  ;;  %981 = vrot.lane.b32.xlu0 %v10192_v12, %s9312_s13  ;;  %v446_v13 = vsel %vm441_vm8, %v9736_v33, %v9734_v32  ;;  %v468_v5 = vsel %vm465_vm9, %v9757_v38, %v9755_v37  ;;  %v515_v23 = vsel %vm513_vm12, %v9795_v47, %v9805_v50  ;;  %v12510_v55 = vld [vmem:[#allocation40_spill] sm:$0xff] }
 0x1c3   : > { %v791_v27 = vsel %vm361_vm5, %v785_v2, %v445_v39  ;;  %v796_v51 = vsel %vm794_vm6, %v789_v28, %v467_v58  ;;  %v469_v33 = vsel %vm465_vm9, %v9755_v37, %v9765_v40  ;;  %v539_v38 = vsel %vm537_vm14, %v9819_v53, %v9829_v56  ;;  %v12508_v2 = vld [vmem:[#allocation36_spill] sm:$0xff] }
 0x1c4   : > { %v10198_v61 = vpop.permute.xlu1 %1737  ;;  %v10200_v17 = vpop.permute.xlu0 %1628  ;;  %v492_v57 = vsel %vm489_vm10, %v9781_v44, %v9779_v43  ;;  %v803_v4 = vsel %vm801_vm11, %v796_v51, %v491_v26  ;;  %v563_v31 = vsel %vm12388_vm4, %v9843_v59, %v9853_v62  ;;  %v797_v37 = vsel %vm794_vm6, %v790_v14, %v468_v5  ;;  %v12507_v44 = vld [vmem:[#allocation34_spill] sm:$0xff] }
 0x1c5   : > { %v470_v36 = vsel %vm465_vm9, %v9765_v40, %v12506_v18  ;;  %v493_v20 = vsel %vm489_vm10, %v9779_v43, %v12507_v44  ;;  %v810_v39 = vsel %vm12384_vm13, %v803_v4, %v515_v23  ;;  %v798_v58 = vsel %vm794_vm6, %v791_v27, %v469_v33  ;;  %v12509_v26 = vld [vmem:[#allocation38_spill] sm:$0xff] }
 0x1c6   : > { %702 = vrot.lane.b32.xlu1 %v9547_v10, %s9313_s11  ;;  %673 = vrot.lane.b32.xlu0 %v9537_v8, %s9311_s10  ;;  %v516_v28 = vsel %vm513_vm12, %v9805_v50, %v12508_v2  ;;  %v517_v14 = vsel %vm513_vm12, %v12508_v2, %v12509_v26  ;;  %v817_v40 = vsel %vm12383_vm15, %v810_v39, %v539_v38  ;;  %v12511_v27 = vld [vmem:[#allocation42_spill] sm:$0xff]  ;;  %v12513_v2 = vld [vmem:[#allocation44_spill] sm:$0xff]  ;;  %v12516_v39 = vld [vmem:[#allocation37_spill] sm:$0xff] }
 0x1c7   : > { %v804_v43 = vsel %vm801_vm11, %v797_v37, %v492_v57  ;;  %v540_v23 = vsel %vm537_vm14, %v9829_v56, %v12510_v55  ;;  %v541_v50 = vsel %vm537_vm14, %v12510_v55, %v12511_v27  ;;  %v10342_v33 = vsel %vm12382_vm3, %v817_v40, %v563_v31  ;;  %v12514_v38 = vld [vmem:[#allocation46_spill] sm:$0xff]  ;;  %v12515_v55 = vld [vmem:[#allocation33_spill] sm:$0xff] }
 0x1c8   : > { %v10209_v25 = vpop.permute.xlu1 %1764  ;;  %v10211_v6 = vpop.permute.xlu0 %1762  ;;  %12512 = vst [vmem:[#allocation34_spill] sm:$0xff] %v10342_v33  ;;  %v805_v4 = vsel %vm801_vm11, %v798_v58, %v493_v20  ;;  %v565_v57 = vsel %vm12388_vm4, %v12513_v2, %v12514_v38  ;;  %v786_v56 = vsel %vm781_vm0, %v9568_v15, %v422_v29  ;;  %v494_v31 = vsel %vm489_vm10, %v12507_v44, %v12515_v55 }
 0x1c9   : > { %v811_v37 = vsel %vm12384_vm13, %v804_v43, %v516_v28  ;;  %v792_v20 = vsel %vm361_vm5, %v786_v56, %v446_v13  ;;  %v518_v58 = vsel %vm513_vm12, %v12509_v26, %v12516_v39  ;;  %v542_v28 = vsel %vm537_vm14, %v12511_v27, %v12517_v54  ;;  %v12520_v43 = vld [vmem:[#allocation45_spill] sm:$0xff] }
 0x1ca   : > { %706 = vrot.lane.b32.xlu1 %v9544_v9, %s9313_s11  ;;  %704 = vrot.lane.b32.xlu0 %v9534_v7, %s9313_s11  ;;  %v818_v29 = vsel %vm12383_vm15, %v811_v37, %v540_v23  ;;  %v799_v44 = vsel %vm794_vm6, %v792_v20, %v470_v36  ;;  %v566_v23 = vsel %vm12388_vm4, %v12514_v38, %v12520_v43 }
 0x1cb   : > { %v806_v26 = vsel %vm801_vm11, %v799_v44, %v494_v31  ;;  %v12523_v31 = vld [vmem:[#allocation25_spill] sm:$0xff]  ;;  %v12526_v44 = vld [vmem:[#allocation35_spill] sm:$0xff] }
 0x1cc   : > { %v10228_v42 = vpop.permute.xlu1 %897  ;;  %v10230_v48 = vpop.permute.xlu0 %1766  ;;  %v813_v36 = vsel %vm12384_vm13, %v806_v26, %v518_v58  ;;  %v442_v37 = vsel %vm441_vm8, %v12523_v31, %v9706_v24  ;;  %v12525_v58 = vld [vmem:[#allocation32_spill] sm:$0xff] }
 0x1cd   : > { %v490_v24 = vsel %vm489_vm10, %v12525_v58, %v9771_v41  ;;  %v12528_v41 = vld [vmem:[#allocation43_spill] sm:$0xff]  ;;  %v12537_v58 = vld [vmem:[#allocation76_spill] sm:$0xff] }
 0x1ce   : > { %708 = vrot.lane.b32.xlu0 %v9568_v15, %s9313_s11  ;;  %975 = vrot.lane.b32.xlu1 %v10233_v3, %s9312_s13  ;;  %v564_v3 = vsel %vm12388_vm4, %v9853_v62, %v12513_v2  ;;  %v812_v62 = vsel %vm12384_vm13, %v805_v4, %v517_v14  ;;  %v12522_v4 = vld [vmem:[#allocation23_spill] sm:$0xff] }
 0x1cf   : > { %v10377_v13 = vsel %vm12382_vm3, %v818_v29, %v564_v3  ;;  %v418_v38 = vsel %vm417_vm7, %v12522_v4, %v9692_v21  ;;  %v12385_v4 = vmov 0.0  }
 0x1d0   : > { %v10251_v34 = vpop.permute.xlu1 %1647  ;;  %v10253_v52 = vpop.permute.xlu0 %1622  ;;  %12518 = vst [vmem:[#allocation36_spill] sm:$0xff] %v10377_v13  ;;  %v782_v21 = vsel %vm781_vm0, %v9537_v8, %v418_v38  ;;  %1101 = vmatprep.mubr.f32.mxu0 %v12385_v4  ;;  %345 = vst [vmem:[#allocation2] sm:$0xff] %v12385_v4  ;;  %1178 = vmatprep.mubr.f32.mxu1 %v12385_v4  ;;  %v12531_v38 = vld [vmem:[#allocation64_spill] sm:$0xff] }
 0x1d1   : > { %v788_v29 = vsel %vm361_vm5, %v782_v21, %v442_v37  ;;  %346 = vst [vmem:[#allocation2 + $0x8] sm:$0xff] %v12385_v4  ;;  %347 = vst [vmem:[#allocation2 + $0x10] sm:$0xff] %v12385_v4  ;;  %v12533_v37 = vld [vmem:[#allocation65_spill] sm:$0xff] }
 0x1d2   : > { %700 = vrot.lane.b32.xlu0 %v9537_v8, %s9313_s11  ;;  %729 = vrot.lane.b32.xlu1 %v9547_v10, %s9314_s12  ;;  %348 = vst [vmem:[#allocation2 + $0x18] sm:$0xff] %v12385_v4  ;;  %349 = vst [vmem:[#allocation2 + $0x20] sm:$0xff] %v12385_v4 }
 0x1d3   : > { %350 = vst [vmem:[#allocation2 + $0x28] sm:$0xff] %v12385_v4  ;;  %351 = vst [vmem:[#allocation2 + $0x30] sm:$0xff] %v12385_v4 }
 0x1d4   : > { %v10291_v1 = vpop.permute.xlu1 %1651  ;;  %v10293_v11 = vpop.permute.xlu0 %1649  ;;  %352 = vst [vmem:[#allocation2 + $0x38] sm:$0xf] %v12385_v4  ;;  %353 = vst [vmem:[#allocation2 + $0x3c] sm:$0xff] %v12385_v4 }
 0x1d5   : > { %354 = vst [vmem:[#allocation2 + $0x44] sm:$0xff] %v12385_v4  ;;  %355 = vst [vmem:[#allocation2 + $0x4c] sm:$0xff] %v12385_v4 }
 0x1d6   : > { %731 = vrot.lane.b32.xlu0 %v9534_v7, %s9314_s12  ;;  %733 = vrot.lane.b32.xlu1 %v9544_v9, %s9314_s12  ;;  %356 = vst [vmem:[#allocation2 + $0x54] sm:$0xff] %v12385_v4  ;;  %357 = vst [vmem:[#allocation2 + $0x5c] sm:$0xff] %v12385_v4 }
 0x1d7   : > { %358 = vst [vmem:[#allocation2 + $0x64] sm:$0xff] %v12385_v4  ;;  %359 = vst [vmem:[#allocation2 + $0x6c] sm:$0xff] %v12385_v4 }
 0x1d8   : > { %v10329_v5 = vpop.permute.xlu1 %902  ;;  %v10331_v51 = vpop.permute.xlu0 %1760  ;;  %360 = vst [vmem:[#allocation2 + $0x74] sm:$0xf] %v12385_v4 }
 0x1da   : > { %735 = vrot.lane.b32.xlu0 %v9568_v15, %s9314_s12  ;;  %963 = vrot.lane.b32.xlu1 %v10342_v33, %s9312_s13  ;;  %v819_v33 = vsel %vm12383_vm15, %v812_v62, %v541_v50  ;;  %v820_v50 = vsel %vm12383_vm15, %v813_v36, %v542_v28  ;;  %v12524_v62 = vld [vmem:[#allocation30_spill] sm:$0xff] }
 0x1db   : > { %v10380_v14 = vsel %vm12382_vm3, %v819_v33, %v565_v57  ;;  %v10397_v33 = vsel %vm12382_vm3, %v820_v50, %v566_v23  ;;  %vm364_vm3 = vcmask 193540   ;;  %v466_v20 = vsel %vm465_vm9, %v12524_v62, %v9747_v35 }
 0x1dc   : > { %v10366_v40 = vpop.permute.xlu1 %1670  ;;  %v10368_v2 = vpop.permute.xlu0 %1645  ;;  %12519 = vst [vmem:[#allocation38_spill] sm:$0xff] %v10380_v14  ;;  %12521 = vst [vmem:[#allocation40_spill] sm:$0xff] %v10397_v33  ;;  %v514_v35 = vsel %vm513_vm12, %v12526_v44, %v9795_v47  ;;  %v562_v50 = vsel %vm12388_vm4, %v12528_v41, %v9843_v59  ;;  %v12541_v44 = vld [vmem:[#allocation21_spill] sm:$0xff] }
 0x1dd   : > { %vm365_vm2 = vmor %vm364_vm3, %vm363_vm1  ;;  %vm12529_vm1 = vcmask 1046528   ;;  %vm12532_vm3 = vcmask 973824  }
 0x1de   : > { %965 = vrot.lane.b32.xlu0 %v10377_v13, %s9312_s13  ;;  %967 = vrot.lane.b32.xlu1 %v10380_v14, %s9312_s13  ;;  %366 = vst.msk [vmem:[#allocation3] sm:$0x3f] %vm365_vm2, %v12385_v4  ;;  %v914_v31 = vsel %vm12532_vm3, %v9907_v60, %v12531_v38  ;;  %vm12534_vm2 = vcmask 982016   ;;  %v12552_v4 = vld [vmem:[#allocation73_spill] sm:$0xff] }
 0x1df   : > { %v909_v62 = vsel %vm12534_vm2, %v9883_v16, %v12533_v37  ;;  %v12557_v16 = vld [vmem:[#allocation20_spill] sm:$0xff] }
 0x1e0   : > { %v10391_v27 = vpop.permute.xlu1 %1674  ;;  %v10393_v3 = vpop.permute.xlu0 %1672 }
 0x1e2   : > { %969 = vrot.lane.b32.xlu0 %v10397_v33, %s9312_s13  ;;  %727 = vrot.lane.b32.xlu1 %v9537_v8, %s9314_s12 }
 0x1e4   : > { %v10406_v57 = vpop.permute.xlu1 %1538  ;;  %v10408_v56 = vpop.permute.xlu0 %1668 }
 0x1e6   : > { %756 = vrot.lane.b32.xlu0 %v9547_v10, %s9315_s18  ;;  %758 = vrot.lane.b32.xlu1 %v9534_v7, %s9315_s18  ;;  %v795_v7 = vsel %vm794_vm6, %v788_v29, %v466_v20  ;;  %v12527_v10 = vld [vmem:[#allocation39_spill] sm:$0xff]  ;;  %v12540_v29 = vld [vmem:[#allocation26_spill] sm:$0xff] }
 0x1e7   : > { %v538_v23 = vsel %vm537_vm14, %v12527_v10, %v9819_v53  ;;  %v802_v36 = vsel %vm801_vm11, %v795_v7, %v490_v24  ;;  %v942_v7 = vsel %vm781_vm0, %v12533_v37, %v12531_v38  ;;  %v12543_v38 = vld [vmem:[#allocation72_spill] sm:$0xff]  ;;  %v12545_v37 = vld [vmem:[#allocation74_spill] sm:$0xff] }
 0x1e8   : > { %v10430_v28 = vpop.permute.xlu1 %1976  ;;  %v10432_v26 = vpop.permute.xlu0 %1540  ;;  %v809_v47 = vsel %vm12384_vm13, %v802_v36, %v514_v35  ;;  %v941_v35 = vsel %vm781_vm0, %v909_v62, %v914_v31  ;;  %v944_v10 = vsel %vm361_vm5, %v942_v7, %v12537_v58  ;;  %v12548_v7 = vld [vmem:[#allocation84_spill] sm:$0xff] }
 0x1ea   : > { %760 = vrot.lane.b32.xlu0 %v9544_v9, %s9315_s18  ;;  %762 = vrot.lane.b32.xlu1 %v9568_v15, %s9315_s18  ;;  %v816_v9 = vsel %vm12383_vm15, %v809_v47, %v538_v23  ;;  %vm12539_vm15 = vcmask 957440  }
 0x1eb   : > { %v10472_v59 = vsel %vm12529_vm1, %v816_v9, %v562_v50  ;;  %vm12538_vm1 = vcmask 965632   ;;  %v946_v50 = vsel %vm794_vm6, %v944_v10, %v10151_v46  ;;  %v12542_v9 = vld [vmem:[#allocation75_spill] sm:$0xff]  ;;  %v12549_v10 = vld [vmem:[#allocation85_spill] sm:$0xff] }
 0x1ec   : > { %v10467_v15 = vpop.permute.xlu1 %1563  ;;  %v10469_v53 = vpop.permute.xlu0 %1561  ;;  %12530 = vst [vmem:[#allocation42_spill] sm:$0xff] %v10472_v59  ;;  %v919_v24 = vsel %vm12538_vm1, %v9931_v19, %v12537_v58  ;;  %v1728_v62 = vsel %vm12532_vm3, %v12542_v9, %v12545_v37  ;;  %vm12551_vm13 = vmmov %vm12538_vm1  ;;  %v12556_v19 = vld [vmem:[#allocation27_spill] sm:$0xff] }
 0x1ed   : > { %v943_v41 = vsel %vm361_vm5, %v941_v35, %v919_v24  ;;  %v12546_v35 = vld [vmem:[#allocation70_spill] sm:$0xff] }
 0x1ee   : > { %754 = vrot.lane.b32.xlu1 %v9537_v8, %s9315_s18  ;;  %961 = vrot.lane.b32.xlu0 %v10472_v59, %s9312_s13  ;;  %v924_v8 = vsel %vm12539_vm15, %v9970_v30, %v10151_v46  ;;  %vm12544_vm15 = vmmov %vm12532_vm3  ;;  %v12547_v46 = vld [vmem:[#allocation71_spill] sm:$0xff]  ;;  %vm12554_vm3 = vcmask 957440  }
 0x1ef   : > { %v945_v47 = vsel %vm794_vm6, %v943_v41, %v924_v8  ;;  %v1727_v31 = vsel %vm12544_vm15, %v12543_v38, %v12542_v9  ;;  %v1704_v8 = vsel %vm12534_vm2, %v12547_v46, %v12546_v35  ;;  %v1750_v41 = vsel %vm12538_vm1, %v12549_v10, %v12548_v7  ;;  %vm12553_vm15 = vmmov %vm12534_vm2 }
 0x1f0   : > { %v10484_v20 = vpop.permute.xlu1 %1584  ;;  %v10486_v21 = vpop.permute.xlu0 %1981  ;;  %v1705_v9 = vsel %vm12553_vm15, %v12546_v35, %v12552_v4  ;;  %v1773_v33 = vsel %vm12554_vm3, %v10211_v6, %v10209_v25  ;;  %vm12555_vm4 = vmmov %vm12554_vm3  ;;  %vm12576_vm15 = vcmask 990208  }
 0x1f1   : > { %12535 = vst [vmem:[#allocation44_spill] sm:$0xff] %v10484_v20  ;;  %12536 = vst [vmem:[#allocation46_spill] sm:$0xff] %v10486_v21  ;;  %v1774_v30 = vsel %vm12555_vm4, %v10209_v25, %v10230_v48  ;;  %v1935_v60 = vsel %vm781_vm0, %v1705_v9, %v1728_v62  ;;  %vm12562_vm4 = vcmask 973824   ;;  %v12569_v9 = vld [vmem:[#allocation55_spill] sm:$0xff] }
 0x1f2   : > { %685 = vrot.lane.b32.xlu1 %v12540_v29, %s9311_s10  ;;  %683 = vrot.lane.b32.xlu0 %v12541_v44, %s9311_s10 }
 0x1f4   : > { %v10504_v23 = vpop.permute.xlu1 %1699  ;;  %v10506_v36 = vpop.permute.xlu0 %1586 }
 0x1f6   : > { %987 = vrot.lane.b32.xlu1 %v946_v50, %s9312_s13  ;;  %985 = vrot.lane.b32.xlu0 %v945_v47, %s9312_s13  ;;  %v12550_v50 = vld [vmem:[#allocation87_spill] sm:$0xff] }
 0x1f7   : > { %v1751_v47 = vsel %vm12551_vm13, %v12548_v7, %v12550_v50  ;;  %v1934_v7 = vsel %vm781_vm0, %v1704_v8, %v1727_v31  ;;  %vm12564_vm13 = vmmov %vm12534_vm2 }
 0x1f8   : > { %v10520_v58 = vpop.permute.xlu1 %1722  ;;  %v10522_v24 = vpop.permute.xlu0 %1701  ;;  %v1941_v13 = vsel %vm361_vm5, %v1935_v60, %v1751_v47  ;;  %v1940_v14 = vsel %vm361_vm5, %v1934_v7, %v1750_v41  ;;  %vm12566_vm2 = vmmov %vm12538_vm1  ;;  %v874_v7 = vsel %vm417_vm7, %v9698_v22, %v12569_v9 }
 0x1f9   : > { %v10555_v25 = vsel %vm794_vm6, %v1941_v13, %v1774_v30  ;;  %v10558_v12 = vsel %vm794_vm6, %v1940_v14, %v1773_v33  ;;  %v12561_v30 = vld [vmem:[#allocation82_spill] sm:$0xff]  ;;  %v12563_v13 = vld [vmem:[#allocation83_spill] sm:$0xff]  ;;  %v1749_v41 = vsel %vm12566_vm2, %v10198_v61, %v12549_v10  ;;  %vm12567_vm1 = vmmov %vm12554_vm3  ;;  %vm12577_vm3 = vcmask 1044480  }
 0x1fa   : > { %1791 = vrot.lane.b32.xlu1 %v12556_v19, %s9311_s10  ;;  %1789 = vrot.lane.b32.xlu0 %v12557_v16, %s9311_s10  ;;  %12559 = vst [vmem:[#allocation25_spill] sm:$0xff] %v10555_v25  ;;  %12560 = vst [vmem:[#allocation30_spill] sm:$0xff] %v10558_v12  ;;  %v1726_v60 = vsel %vm12562_vm4, %v12561_v30, %v12543_v38  ;;  %v1703_v14 = vsel %vm12564_vm13, %v12563_v13, %v12547_v46  ;;  %v12568_v38 = vld [vmem:[#allocation29_spill] sm:$0xff]  ;;  %v12570_v10 = vld [vmem:[#allocation59_spill] sm:$0xff]  ;;  %vm12581_vm13 = vcmask 1045504  }
 0x1fb   : > { %v1772_v47 = vsel %vm12567_vm1, %v10331_v51, %v10211_v6  ;;  %v1933_v46 = vsel %vm781_vm0, %v1703_v14, %v1726_v60  ;;  %v879_v6 = vsel %vm441_vm8, %v9734_v32, %v12570_v10  ;;  %v927_v14 = vsel %vm781_vm0, %v12541_v44, %v874_v7  ;;  %vm12578_vm4 = vmmov %vm12577_vm3 }
 0x1fc   : > { %v10548_v59 = vpop.permute.xlu1 %1986  ;;  %v10550_v35 = vpop.permute.xlu0 %1724  ;;  %v1939_v30 = vsel %vm361_vm5, %v1933_v46, %v1749_v41  ;;  %v928_v41 = vsel %vm781_vm0, %v12540_v29, %v12569_v9  ;;  %v12573_v46 = vld [vmem:[#allocation77_spill] sm:$0xff]  ;;  %vm12583_vm2 = vmmov %vm12581_vm13  ;;  %vm12586_vm1 = vcmask 1046528  }
 0x1fd   : > { %12558 = vst [vmem:[#allocation23_spill] sm:$0xff] %v10548_v59  ;;  %v10605_v51 = vsel %vm794_vm6, %v1939_v30, %v1772_v47  ;;  %v889_v47 = vsel %vm489_vm10, %v12515_v55, %v12573_v46  ;;  %v929_v30 = vsel %vm361_vm5, %v927_v14, %v879_v6  ;;  %v899_v6 = vsel %vm537_vm14, %v12517_v54, %v10228_v42  ;;  %v12584_v54 = vld [vmem:[#allocation60_spill] sm:$0xff]  ;;  %v12589_v55 = vld [vmem:[#allocation66_spill] sm:$0xff] }
 0x1fe   : > { %2083 = vrot.lane.b32.xlu1 %v10555_v25, %s9312_s13  ;;  %2081 = vrot.lane.b32.xlu0 %v10558_v12, %s9312_s13  ;;  %12571 = vst [vmem:[#allocation35_spill] sm:$0xff] %v10605_v51  ;;  %v12572_v25 = vld [vmem:[#allocation62_spill] sm:$0xff]  ;;  %v930_v12 = vsel %vm361_vm5, %v928_v41, %v12570_v10  ;;  %v904_v41 = vsel %vm12576_vm15, %v12520_v43, %v10329_v5  ;;  %vm12587_vm15 = vmmov %vm12586_vm1 }
 0x1ff   : > { %v884_v60 = vsel %vm465_vm9, %v12506_v18, %v12572_v25  ;;  %v932_v9 = vsel %vm794_vm6, %v930_v12, %v12572_v25 }
 0x200   : > { %v10564_v31 = vpop.permute.xlu1 %2016  ;;  %v10566_v62 = vpop.permute.xlu0 %2011  ;;  %v931_v22 = vsel %vm794_vm6, %v929_v30, %v884_v60  ;;  %v934_v10 = vsel %vm801_vm11, %v932_v9, %v12573_v46  ;;  %v12579_v60 = vld [vmem:[#allocation57_spill] sm:$0xff] }
 0x201   : > { %v933_v14 = vsel %vm801_vm11, %v931_v22, %v889_v47  ;;  %v12580_v22 = vld [vmem:[#allocation54_spill] sm:$0xff] }
 0x202   : > { %712 = vrot.lane.b32.xlu1 %v12540_v29, %s9313_s11  ;;  %710 = vrot.lane.b32.xlu0 %v12541_v44, %s9313_s11  ;;  %v1543_v47 = vsel %vm417_vm7, %v12580_v22, %v12579_v60 }
 0x204   : > { %v10578_v33 = vpop.permute.xlu1 %1609  ;;  %v10580_v8 = vpop.permute.xlu0 %1607 }
 0x205   : > { %12565 = vst [vmem:[#allocation32_spill] sm:$0xff] %v10580_v8  ;;  %v12597_v8 = vld [vmem:[#allocation51_spill] sm:$0xff] }
 0x206   : > { %1815 = vrot.lane.b32.xlu1 %v12557_v16, %s9313_s11  ;;  %1787 = vrot.lane.b32.xlu0 %v12568_v38, %s9311_s10 }
 0x208   : > { %v10597_v13 = vpop.permute.xlu1 %1747  ;;  %v10599_v61 = vpop.permute.xlu0 %1745 }
 0x20a   : > { %2079 = vrot.lane.b32.xlu1 %v10605_v51, %s9312_s13  ;;  %1817 = vrot.lane.b32.xlu0 %v12556_v19, %s9313_s11  ;;  %v12574_v51 = vld [vmem:[#allocation86_spill] sm:$0xff] }
 0x20b   : > { %v894_v18 = vsel %vm513_vm12, %v12516_v39, %v12574_v51  ;;  %v936_v25 = vsel %vm12578_vm4, %v934_v10, %v12574_v51  ;;  %v12585_v39 = vld [vmem:[#allocation61_spill] sm:$0xff] }
 0x20c   : > { %v10628_v32 = vpop.permute.xlu1 %2021  ;;  %v10630_v7 = vpop.permute.xlu0 %1991  ;;  %v935_v12 = vsel %vm12577_vm3, %v933_v14, %v894_v18  ;;  %v938_v46 = vsel %vm12581_vm13, %v936_v25, %v10228_v42  ;;  %v1566_v18 = vsel %vm441_vm8, %v12585_v39, %v12584_v54  ;;  %v12588_v10 = vld [vmem:[#allocation69_spill] sm:$0xff]  ;;  %v1892_v42 = vsel %vm781_vm0, %v12557_v16, %v1543_v47  ;;  %vm12598_vm13 = vmmov %vm12583_vm2 }
 0x20d   : > { %12575 = vst [vmem:[#allocation39_spill] sm:$0xff] %v10630_v7  ;;  %v937_v43 = vsel %vm12583_vm2, %v935_v12, %v899_v6  ;;  %v940_v51 = vsel %vm12586_vm1, %v938_v46, %v10329_v5  ;;  %v1589_v45 = vsel %vm465_vm9, %v12589_v55, %v12588_v10  ;;  %v12590_v6 = vld [vmem:[#allocation81_spill] sm:$0xff]  ;;  %v12591_v12 = vld [vmem:[#allocation78_spill] sm:$0xff]  ;;  %v12592_v7 = vld [vmem:[#allocation56_spill] sm:$0xff]  ;;  %vm12595_vm3 = vcmask 990208  }
 0x20e   : > { %739 = vrot.lane.b32.xlu1 %v12540_v29, %s9314_s12  ;;  %737 = vrot.lane.b32.xlu0 %v12541_v44, %s9314_s12  ;;  %v939_v14 = vsel %vm12587_vm15, %v937_v43, %v904_v41  ;;  %v1612_v25 = vsel %vm489_vm10, %v12591_v12, %v12590_v6  ;;  %v1544_v5 = vsel %vm417_vm7, %v12579_v60, %v12592_v7  ;;  %vm12599_vm2 = vmmov %vm12586_vm1 }
 0x20f   : > { %v1898_v43 = vsel %vm361_vm5, %v1892_v42, %v1566_v18  ;;  %v1635_v41 = vsel %vm513_vm12, %v10184_v63, %v10182_v0  ;;  %v1658_v60 = vsel %vm537_vm14, %v10251_v34, %v10293_v11  ;;  %v1681_v21 = vsel %vm12595_vm3, %v10366_v40, %v10393_v3  ;;  %vm12600_vm1 = vmmov %vm12595_vm3 }
 0x210   : > { %v10656_v30 = vpop.permute.xlu1 %1632  ;;  %v10658_v9 = vpop.permute.xlu0 %1630  ;;  %v1904_v59 = vsel %vm794_vm6, %v1898_v43, %v1589_v45  ;;  %v1893_v45 = vsel %vm781_vm0, %v12556_v19, %v1544_v5  ;;  %vm12601_vm15 = vmmov %vm12578_vm4 }
 0x211   : > { %12582 = vst [vmem:[#allocation43_spill] sm:$0xff] %v10658_v9  ;;  %v12594_v9 = vld [vmem:[#allocation68_spill] sm:$0xff]  ;;  %v1910_v42 = vsel %vm801_vm11, %v1904_v59, %v1612_v25  ;;  %v1636_v25 = vsel %vm513_vm12, %v10182_v0, %v10200_v17  ;;  %vm12602_vm3 = vmmov %vm12578_vm4 }
 0x212   : > { %973 = vrot.lane.b32.xlu1 %v940_v51, %s9312_s13  ;;  %971 = vrot.lane.b32.xlu0 %v939_v14, %s9312_s13  ;;  %v12593_v14 = vld [vmem:[#allocation63_spill] sm:$0xff]  ;;  %v1590_v18 = vsel %vm465_vm9, %v12588_v10, %v12594_v9  ;;  %v1916_v10 = vsel %vm12578_vm4, %v1910_v42, %v1635_v41  ;;  %v1896_v9 = vsel %vm781_vm0, %v12597_v8, %v10432_v26  ;;  %vm12603_vm4 = vmmov %vm12598_vm13 }
 0x213   : > { %v1567_v47 = vsel %vm441_vm8, %v12584_v54, %v12593_v14  ;;  %v12596_v54 = vld [vmem:[#allocation80_spill] sm:$0xff]  ;;  %v1922_v5 = vsel %vm12598_vm13, %v1916_v10, %v1658_v60  ;;  %v1659_v41 = vsel %vm537_vm14, %v10293_v11, %v10291_v1  ;;  %vm12604_vm13 = vmmov %vm12603_vm4 }
 0x214   : > { %v10684_v46 = vpop.permute.xlu1 %1770  ;;  %v10686_v51 = vpop.permute.xlu0 %1768  ;;  %v1613_v43 = vsel %vm489_vm10, %v12590_v6, %v12596_v54  ;;  %v1899_v59 = vsel %vm361_vm5, %v1893_v45, %v1567_v47  ;;  %v1902_v47 = vsel %vm361_vm5, %v1896_v9, %v10467_v15  ;;  %v10731_v0 = vsel %vm12599_vm2, %v1922_v5, %v1681_v21 }
 0x215   : > { %v1905_v6 = vsel %vm794_vm6, %v1899_v59, %v1590_v18  ;;  %v1682_v45 = vsel %vm12600_vm1, %v10393_v3, %v10391_v27  ;;  %v1908_v60 = vsel %vm794_vm6, %v1902_v47, %v10506_v36  ;;  %vm12608_vm1 = vmmov %vm12599_vm2 }
 0x216   : > { %1841 = vrot.lane.b32.xlu1 %v12557_v16, %s9314_s12  ;;  %1813 = vrot.lane.b32.xlu0 %v12568_v38, %s9313_s11  ;;  %v1911_v42 = vsel %vm801_vm11, %v1905_v6, %v1613_v43  ;;  %v1914_v21 = vsel %vm801_vm11, %v1908_v60, %v10578_v33 }
 0x217   : > { %v1917_v11 = vsel %vm12601_vm15, %v1911_v42, %v1636_v25  ;;  %v1920_v9 = vsel %vm12602_vm3, %v1914_v21, %v10656_v30  ;;  %v12605_v25 = vld [vmem:[#allocation58_spill] sm:$0xff]  ;;  %vm12609_vm15 = vcmask 990208  }
 0x218   : > { %v10719_v20 = vpop.permute.xlu1 %2026  ;;  %v10721_v14 = vpop.permute.xlu0 %1996  ;;  %v1923_v43 = vsel %vm12603_vm4, %v1917_v11, %v1659_v41  ;;  %v1542_v5 = vsel %vm417_vm7, %v12605_v25, %v12580_v22  ;;  %v12606_v41 = vld [vmem:[#allocation67_spill] sm:$0xff]  ;;  %v1611_v11 = vsel %vm489_vm10, %v10149_v49, %v12591_v12 }
 0x219   : > { %v10756_v59 = vsel %vm12599_vm2, %v1923_v43, %v1682_v45  ;;  %v1565_v42 = vsel %vm441_vm8, %v12606_v41, %v12585_v39  ;;  %v12607_v45 = vld [vmem:[#allocation79_spill] sm:$0xff]  ;;  %v1891_v22 = vsel %vm781_vm0, %v12568_v38, %v1542_v5  ;;  %v1634_v39 = vsel %vm513_vm12, %v10253_v52, %v10184_v63 }
 0x21a   : > { %2067 = vrot.lane.b32.xlu1 %v10731_v0, %s9312_s13  ;;  %1843 = vrot.lane.b32.xlu0 %v12556_v19, %s9314_s12  ;;  %v1588_v60 = vsel %vm465_vm9, %v12607_v45, %v12589_v55  ;;  %v1897_v21 = vsel %vm361_vm5, %v1891_v22, %v1565_v42  ;;  %v1680_v63 = vsel %vm12609_vm15, %v10408_v56, %v10366_v40  ;;  %v12611_v40 = vld [vmem:[#allocation50_spill] sm:$0xff]  ;;  %vm989_vm2 = vcmask 916480  }
 0x21b   : > { %v1903_v43 = vsel %vm794_vm6, %v1897_v21, %v1588_v60  ;;  %v12612_v56 = vld [vmem:[#allocation22_spill] sm:$0xff] }
 0x21c   : > { %v10748_v18 = vpop.permute.xlu1 %1655  ;;  %v10750_v3 = vpop.permute.xlu0 %1653  ;;  %v1909_v49 = vsel %vm801_vm11, %v1903_v43, %v1611_v11 }
 0x21d   : > { %v1926_v10 = vsel %vm12604_vm13, %v1920_v9, %v10748_v18  ;;  %v1915_v52 = vsel %vm12602_vm3, %v1909_v49, %v1634_v39  ;;  %vm12610_vm13 = vmmov %vm12608_vm1  ;;  %vm12615_vm3 = vcmask 965632  }
 0x21e   : > { %764 = vrot.lane.b32.xlu1 %v12541_v44, %s9315_s18  ;;  %2069 = vrot.lane.b32.xlu0 %v10756_v59, %s9312_s13  ;;  %v1753_v45 = vsel %vm12615_vm3, %v10599_v61, %v10597_v13 }
 0x220   : > { %v10765_v6 = vpop.permute.xlu1 %1676  ;;  %v10767_v47 = vpop.permute.xlu0 %2001 }
 0x222   : > { %1839 = vrot.lane.b32.xlu1 %v12568_v38, %s9314_s12  ;;  %766 = vrot.lane.b32.xlu0 %v12540_v29, %s9315_s18  ;;  %v1657_v29 = vsel %vm537_vm14, %v10368_v2, %v10251_v34 }
 0x223   : > { %v1921_v34 = vsel %vm12603_vm4, %v1915_v52, %v1657_v29  ;;  %vm12616_vm4 = vcmask 982016  }
 0x224   : > { %v10788_v55 = vpop.permute.xlu1 %2006  ;;  %v10790_v9 = vpop.permute.xlu0 %1678  ;;  %v1707_v22 = vsel %vm12616_vm4, %v10504_v23, %v10522_v24 }
 0x225   : > { %v10798_v25 = vsel %vm12608_vm1, %v1926_v10, %v10790_v9  ;;  %v10815_v10 = vsel %vm12610_vm13, %v1921_v34, %v1680_v63  ;;  %vm12613_vm1 = vcmask 973824   ;;  %vm12617_vm13 = vmmov %vm12615_vm3 }
 0x226   : > { %1869 = vrot.lane.b32.xlu1 %v12556_v19, %s9315_s18  ;;  %1867 = vrot.lane.b32.xlu0 %v12557_v16, %s9315_s18  ;;  %v1730_v5 = vsel %vm12613_vm1, %v10520_v58, %v10550_v35  ;;  %vm12614_vm15 = vmmov %vm12613_vm1  ;;  %v1752_v11 = vsel %vm12617_vm13, %v12550_v50, %v10599_v61  ;;  %vm12618_vm1 = vcmask 957440  }
 0x227   : > { %v1729_v42 = vsel %vm12614_vm15, %v12545_v37, %v10520_v58  ;;  %v1776_v21 = vsel %vm12618_vm1, %v10686_v51, %v10684_v46  ;;  %v12619_v37 = vld [vmem:[#allocation52_spill] sm:$0xff]  ;;  %vm12620_vm15 = vmmov %vm12616_vm4  ;;  %v1937_v50 = vsel %vm781_vm0, %v1707_v22, %v1730_v5  ;;  %vm12622_vm4 = vcmask 973824  }
 0x228   : > { %v10810_v2 = vpop.permute.xlu1 %677  ;;  %v10812_v12 = vpop.permute.xlu0 %675  ;;  %v1706_v58 = vsel %vm12620_vm15, %v12552_v4, %v10504_v23  ;;  %vm12621_vm3 = vmmov %vm12618_vm1  ;;  %v2018_v43 = vsel %vm12622_vm4, %v10550_v35, %v10564_v31  ;;  %vm12624_vm1 = vcmask 965632  }
 0x229   : > { %v1775_v39 = vsel %vm12621_vm3, %v10230_v48, %v10686_v51  ;;  %v1936_v61 = vsel %vm781_vm0, %v1706_v58, %v1729_v42  ;;  %vm12623_vm13 = vmmov %vm12620_vm15  ;;  %v1943_v48 = vsel %vm361_vm5, %v1937_v50, %v1753_v45  ;;  %v2023_v34 = vsel %vm12624_vm1, %v10597_v13, %v10628_v32 }
 0x22a   : > { %1865 = vrot.lane.b32.xlu1 %v12568_v38, %s9315_s18  ;;  %2065 = vrot.lane.b32.xlu0 %v10815_v10, %s9312_s13  ;;  %v2013_v29 = vsel %vm12623_vm13, %v10522_v24, %v10566_v62  ;;  %v10873_v49 = vsel %vm794_vm6, %v1943_v48, %v1776_v21  ;;  %v1942_v63 = vsel %vm361_vm5, %v1936_v61, %v1752_v11  ;;  %vm12625_vm15 = vmmov %vm12621_vm3  ;;  %vm12640_vm1 = vcmask 1046528  }
 0x22b   : > { %v10884_v5 = vsel %vm794_vm6, %v1942_v63, %v1775_v39  ;;  %v2046_v42 = vsel %vm781_vm0, %v10566_v62, %v10564_v31  ;;  %v2045_v45 = vsel %vm781_vm0, %v2013_v29, %v2018_v43  ;;  %v1545_v61 = vsel %vm417_vm7, %v12592_v7, %v10406_v57  ;;  %v12626_v29 = vld [vmem:[#allocation63_spill] sm:$0xff] }
 0x22c   : > { %v10821_v19 = vpop.permute.xlu1 %681  ;;  %v10823_v16 = vpop.permute.xlu0 %679  ;;  %v2047_v62 = vsel %vm361_vm5, %v2045_v45, %v2023_v34  ;;  %v1546_v43 = vsel %vm417_vm7, %v10406_v57, %v10432_v26  ;;  %v1569_v7 = vsel %vm441_vm8, %v10469_v53, %v10467_v15  ;;  %v1894_v57 = vsel %vm781_vm0, %v12612_v56, %v1545_v61 }
 0x22d   : > { %v2032_v63 = vsel %vm781_vm0, %v12619_v37, %v10430_v28 }
 0x22e   : > { %1795 = vrot.lane.b32.xlu1 %v12611_v40, %s9311_s10  ;;  %1793 = vrot.lane.b32.xlu0 %v12612_v56, %s9311_s10 }
 0x230   : > { %v980_v41 = vpop.permute.xlu1 %979  ;;  %v978_v38 = vpop.permute.xlu0 %977 }
 0x231   : > { %v997_v60 = vsel %vm989_vm2, %v978_v38, %v980_v41 }
 0x232   : > { %7566 = vmatprep.subr.msk.mxu0 %vm801_vm11, %v997_v60  ;;  %1799 = vrot.lane.b32.xlu1 %v12619_v37, %s9311_s10  ;;  %v2048_v60 = vsel %vm361_vm5, %v2046_v42, %v10628_v32 }
 0x233   : > { %1797 = vrot.lane.b32.xlu0 %v12597_v8, %s9311_s10  ;;  %v2050_v31 = vsel %vm794_vm6, %v2048_v60, %v10719_v20 }
 0x234   : > { %v10867_v4 = vpop.permute.xlu1 %983  ;;  %v982_v23 = vpop.permute.xlu0 %981 }
 0x235   : > { %v999_v51 = vsel %vm989_vm2, %v982_v23, %v10867_v4  ;;  %v998_v52 = vsel %vm989_vm2, %v980_v41, %v982_v23  ;;  %v2028_v41 = vsel %vm12625_vm15, %v10684_v46, %v10719_v20  ;;  %v1568_v23 = vsel %vm441_vm8, %v12626_v29, %v10469_v53  ;;  %v12628_v53 = vld [vmem:[#allocation68_spill] sm:$0xff] }
 0x236   : > { %7570 = vmatprep.subr.msk.mxu1 %vm801_vm11, %v999_v51  ;;  %2087 = vrot.lane.b32.xlu1 %v10873_v49, %s9312_s13  ;;  %v2049_v21 = vsel %vm794_vm6, %v2047_v62, %v2028_v41  ;;  %v1900_v42 = vsel %vm361_vm5, %v1894_v57, %v1568_v23  ;;  %v12630_v62 = vld [vmem:[#allocation46_spill] sm:$0xff] }
 0x237   : > { %2085 = vrot.lane.b32.xlu0 %v10884_v5, %s9312_s13  ;;  %7571 = vmatpush1.msk.msra.mxu1 %vm801_vm11, %v998_v52  ;;  %v12627_v52 = vld [vmem:[#allocation44_spill] sm:$0xff]  ;;  %v2034_v29 = vsel %vm361_vm5, %v2032_v63, %v12630_v62 }
 0x238   : > { %v10898_v22 = vpop.permute.xlu1 %702  ;;  %v10900_v11 = vpop.permute.xlu0 %673  ;;  %v1592_v34 = vsel %vm465_vm9, %v12627_v52, %v10506_v36  ;;  %v1591_v41 = vsel %vm465_vm9, %v12628_v53, %v12627_v52 }
 0x23a   : > { %2091 = vrot.lane.b32.xlu1 %v2050_v31, %s9312_s13 }
 0x23b   : > { %2089 = vrot.lane.b32.xlu0 %v2049_v21, %s9312_s13  ;;  %v1983_v21 = vsel %vm441_vm8, %v10467_v15, %v12630_v62  ;;  %vm12634_vm8 = vcmask 1044480  }
 0x23c   : > { %v10908_v58 = vpop.permute.xlu1 %706  ;;  %v10910_v39 = vpop.permute.xlu0 %704  ;;  %vm12637_vm4 = vmmov %vm12634_vm8 }
 0x23e   : > { %1821 = vrot.lane.b32.xlu1 %v12611_v40, %s9313_s11 }
 0x23f   : > { %1819 = vrot.lane.b32.xlu0 %v12612_v56, %s9313_s11 }
 0x240   : > { %v10916_v32 = vpop.permute.xlu0 %708  ;;  %v976_v20 = vpop.permute.xlu1 %975 }
 0x241   : > { %v996_v50 = vsel %vm989_vm2, %v976_v20, %v978_v38  ;;  %v1978_v38 = vsel %vm417_vm7, %v10432_v26, %v10430_v28  ;;  %v1895_v26 = vsel %vm781_vm0, %v12611_v40, %v1546_v43  ;;  %v12629_v28 = vld [vmem:[#allocation32_spill] sm:$0xff]  ;;  %vm12632_vm7 = vcmask 990208  }
 0x242   : > { %7567 = vmatpush1.msk.msra.mxu0 %vm801_vm11, %v996_v50  ;;  %1825 = vrot.lane.b32.xlu1 %v12619_v37, %s9313_s11  ;;  %v2031_v45 = vsel %vm781_vm0, %v12597_v8, %v1978_v38  ;;  %v1615_v60 = vsel %vm489_vm10, %v12629_v28, %v10578_v33  ;;  %v1901_v31 = vsel %vm361_vm5, %v1895_v26, %v1569_v7  ;;  %v12631_v50 = vld [vmem:[#allocation43_spill] sm:$0xff]  ;;  %vm12635_vm3 = vmmov %vm12632_vm7 }
 0x243   : > { %1823 = vrot.lane.b32.xlu0 %v12597_v8, %s9313_s11  ;;  %v1614_v20 = vsel %vm489_vm10, %v12596_v54, %v12629_v28  ;;  %v1638_v61 = vsel %vm513_vm12, %v12631_v50, %v10656_v30  ;;  %v1907_v23 = vsel %vm794_vm6, %v1901_v31, %v1592_v34  ;;  %v1637_v15 = vsel %vm513_vm12, %v10200_v17, %v12631_v50  ;;  %v12633_v17 = vld [vmem:[#allocation23_spill] sm:$0xff]  ;;  %vm12643_vm15 = vmmov %vm12635_vm3 }
 0x244   : > { %v10936_v48 = vpop.permute.xlu0 %700  ;;  %v10938_v51 = vpop.permute.xlu1 %729  ;;  %v1661_v54 = vsel %vm537_vm14, %v10750_v3, %v10748_v18  ;;  %v1906_v7 = vsel %vm794_vm6, %v1900_v42, %v1591_v41  ;;  %v1913_v57 = vsel %vm801_vm11, %v1907_v23, %v1615_v60  ;;  %v1660_v26 = vsel %vm537_vm14, %v10291_v1, %v10750_v3  ;;  %v12636_v3 = vld [vmem:[#allocation39_spill] sm:$0xff] }
 0x245   : > { %v1684_v63 = vsel %vm12632_vm7, %v10765_v6, %v10790_v9  ;;  %v1988_v52 = vsel %vm465_vm9, %v10506_v36, %v12633_v17  ;;  %v1912_v34 = vsel %vm801_vm11, %v1906_v7, %v1614_v20  ;;  %v1919_v42 = vsel %vm12634_vm8, %v1913_v57, %v1638_v61  ;;  %vm12644_vm7 = vmmov %vm12637_vm4 }
 0x246   : > { %1847 = vrot.lane.b32.xlu1 %v12611_v40, %s9314_s12  ;;  %v1683_v53 = vsel %vm12635_vm3, %v10391_v27, %v10765_v6  ;;  %v2033_v1 = vsel %vm361_vm5, %v2031_v45, %v1983_v21  ;;  %v1993_v41 = vsel %vm489_vm10, %v10578_v33, %v12636_v3  ;;  %v1918_v28 = vsel %vm12637_vm4, %v1912_v34, %v1637_v15  ;;  %vm12641_vm10 = vmmov %vm12640_vm1 }
 0x247   : > { %1845 = vrot.lane.b32.xlu0 %v12612_v56, %s9314_s12  ;;  %vm12638_vm9 = vcmask 1045504   ;;  %v2036_v27 = vsel %vm794_vm6, %v2034_v29, %v12633_v17  ;;  %v1998_v6 = vsel %vm513_vm12, %v10656_v30, %v10721_v14  ;;  %v2035_v33 = vsel %vm794_vm6, %v2033_v1, %v1988_v52  ;;  %vm12642_vm12 = vmmov %vm12637_vm4 }
 0x248   : > { %v10976_v43 = vpop.permute.xlu0 %731  ;;  %v10978_v38 = vpop.permute.xlu1 %733  ;;  %v1925_v36 = vsel %vm12638_vm9, %v1919_v42, %v1661_v54  ;;  %vm12639_vm13 = vmmov %vm12638_vm9  ;;  %v2038_v21 = vsel %vm801_vm11, %v2036_v27, %v12636_v3  ;;  %v2003_v20 = vsel %vm537_vm14, %v10748_v18, %v10767_v47  ;;  %v2037_v30 = vsel %vm801_vm11, %v2035_v33, %v1993_v41 }
 0x249   : > { %v1924_v45 = vsel %vm12639_vm13, %v1918_v28, %v1660_v26  ;;  %v11026_v62 = vsel %vm12640_vm1, %v1925_v36, %v1684_v63  ;;  %v2040_v61 = vsel %vm12642_vm12, %v2038_v21, %v10721_v14  ;;  %v2008_v29 = vsel %vm12643_vm15, %v10790_v9, %v10788_v55  ;;  %vm12645_vm14 = vmmov %vm12638_vm9  ;;  %v12650_v28 = vld [vmem:[#allocation91_spill] sm:$0xff] }
 0x24a   : > { %1851 = vrot.lane.b32.xlu1 %v12619_v37, %s9314_s12  ;;  %v11037_v50 = vsel %vm12641_vm10, %v1924_v45, %v1683_v53  ;;  %v2039_v18 = vsel %vm12644_vm7, %v2037_v30, %v1998_v6  ;;  %v2042_v23 = vsel %vm12645_vm14, %v2040_v61, %v10767_v47  ;;  %vm12646_vm8 = vmmov %vm12638_vm9  ;;  %vm714_vm9 = vcmask 941056  }
 0x24b   : > { %1849 = vrot.lane.b32.xlu0 %v12597_v8, %s9314_s12  ;;  %v2041_v7 = vsel %vm12646_vm8, %v2039_v18, %v2003_v20  ;;  %vm12647_vm3 = vmmov %vm12640_vm1  ;;  %vm687_vm13 = vcmask 949248   ;;  %v718_v53 = vsel %vm714_vm9, %v10908_v58, %v10916_v32  ;;  %vm768_vm10 = vcmask 924672  }
 0x24c   : > { %v11015_v60 = vpop.permute.xlu0 %735  ;;  %v11017_v31 = vpop.permute.xlu1 %963  ;;  %v2044_v57 = vsel %vm12647_vm3, %v2042_v23, %v10788_v55  ;;  %vm12648_vm4 = vmmov %vm12640_vm1  ;;  %vm741_vm1 = vcmask 932864   ;;  %v690_v17 = vsel %vm687_vm13, %v10810_v2, %v10823_v16  ;;  %v691_v52 = vsel %vm687_vm13, %v10823_v16, %v10821_v19  ;;  %v12657_v23 = vld [vmem:[#allocation92_spill] sm:$0xff] }
 0x24d   : > { %v2043_v9 = vsel %vm12648_vm4, %v2041_v7, %v2008_v29  ;;  %v744_v1 = vsel %vm741_vm1, %v10976_v43, %v10978_v38  ;;  %v745_v16 = vsel %vm741_vm1, %v10978_v38, %v11015_v60  ;;  %v689_v3 = vsel %vm687_vm13, %v10812_v12, %v10810_v2  ;;  %vm12651_vm12 = vmmov %vm12644_vm7  ;;  %v12656_v29 = vld [vmem:[#allocation89_spill] sm:$0xff] }
 0x24e   : > { %2073 = vrot.lane.b32.xlu1 %v11026_v62, %s9312_s13  ;;  %v850_v36 = vsel %vm801_vm11, %v12650_v28, %v691_v52  ;;  %v688_v27 = vsel %vm687_vm13, %v10900_v11, %v10812_v12  ;;  %v716_v2 = vsel %vm714_vm9, %v10898_v22, %v10910_v39  ;;  %vm12652_vm15 = vmmov %vm12644_vm7  ;;  %v715_v45 = vsel %vm714_vm9, %v10936_v48, %v10898_v22 }
 0x24f   : > { %2071 = vrot.lane.b32.xlu0 %v11037_v50, %s9312_s13  ;;  %v856_v6 = vsel %vm12652_vm15, %v850_v36, %v718_v53  ;;  %vm12653_vm7 = vmmov %vm12646_vm8  ;;  %v743_v22 = vsel %vm741_vm1, %v10938_v51, %v10976_v43  ;;  %v848_v18 = vsel %vm801_vm11, %v12656_v29, %v689_v3  ;;  %v12665_v53 = vmov 0.0  }
 0x250   : > { %v966_v15 = vpop.permute.xlu0 %965  ;;  %v968_v54 = vpop.permute.xlu1 %967  ;;  %v862_v21 = vsel %vm12653_vm7, %v856_v6, %v745_v16  ;;  %vm12654_vm14 = vmmov %vm12653_vm7  ;;  %v11150_v16 = vld [vmem:[#allocation4 + $0x8] sm:$0x3] }
 0x251   : > { %v991_v14 = vsel %vm989_vm2, %v11017_v31, %v966_v15  ;;  %v992_v55 = vsel %vm989_vm2, %v966_v15, %v968_v54  ;;  %vm12655_vm8 = vmmov %vm12647_vm3  ;;  %v847_v15 = vsel %vm801_vm11, %v12657_v23, %v688_v27 }
 0x252   : > { %2077 = vrot.lane.b32.xlu1 %v2044_v57, %s9312_s13  ;;  %1063 = vmatprep.subr.mxu0 %v991_v14  ;;  %vm12658_vm4 = vmmov %vm12651_vm12 }
 0x253   : > { %2075 = vrot.lane.b32.xlu0 %v2043_v9, %s9312_s13  ;;  %v854_v43 = vsel %vm12658_vm4, %v848_v18, %v716_v2  ;;  %v12660_v9 = vld [vmem:[#allocation38_spill] sm:$0xff]  ;;  %vm12661_vm15 = vmmov %vm12653_vm7 }
 0x254   : > { %v11058_v26 = vpop.permute.xlu0 %969  ;;  %v728_v47 = vpop.permute.xlu1 %727 }
 0x255   : > { %v993_v63 = vsel %vm989_vm2, %v968_v54, %v11058_v26  ;;  %v742_v48 = vsel %vm741_vm1, %v728_v47, %v10938_v51 }
 0x256   : > { %1873 = vrot.lane.b32.xlu1 %v12611_v40, %s9315_s18  ;;  %1140 = vmatprep.subr.mxu1 %v993_v63  ;;  %v717_v40 = vsel %vm714_vm9, %v10910_v39, %v10908_v58  ;;  %v12649_v58 = vld [vmem:[#allocation88_spill] sm:$0xff]  ;;  %v860_v63 = vsel %vm12661_vm15, %v854_v43, %v743_v22  ;;  %vm12677_vm15 = vmmov %vm12658_vm4 }
 0x257   : > { %1871 = vrot.lane.b32.xlu0 %v12612_v56, %s9315_s18  ;;  %1141 = vmatpush1.msra.mxu1 %v992_v55  ;;  %v9317_v56 = vmov 0   ;;  %v849_v41 = vsel %vm801_vm11, %v12649_v58, %v690_v17  ;;  %v12662_v17 = vld [vmem:[#allocation36_spill] sm:$0xff] }
 0x258   : > { %v757_v34 = vpop.permute.xlu0 %756  ;;  %v759_v42 = vpop.permute.xlu1 %758  ;;  %8271 = vset.pattern.permute.xlu0 %v9317_v56  ;;  %8272 = vset.pattern.permute.xlu1 %v9317_v56  ;;  %v855_v38 = vsel %vm12651_vm12, %v849_v41, %v717_v40  ;;  %vm12659_vm12 = vmmov %vm12658_vm4  ;;  %v11143_v40 = vld [vmem:[#allocation4] sm:$0xff]  ;;  %v12666_v56 = vld [vmem:[#allocation34_spill] sm:$0xff] }
 0x259   : > { %v861_v20 = vsel %vm12654_vm14, %v855_v38, %v744_v1  ;;  %v770_v54 = vsel %vm768_vm10, %v757_v34, %v759_v42  ;;  %v853_v7 = vsel %vm12659_vm12, %v847_v15, %v715_v45  ;;  %vm12663_vm14 = vmmov %vm12647_vm3  ;;  %v12667_v1 = vld [vmem:[#allocation42_spill] sm:$0xff] }
 0x25a   : > { %1877 = vrot.lane.b32.xlu1 %v12619_v37, %s9315_s18  ;;  %v372_v37 = vld [vmem:[%s12300_s2 + $0x8] sm:$0x3]  ;;  %v859_v55 = vsel %vm12653_vm7, %v853_v7, %v742_v48  ;;  %v866_v52 = vsel %vm12663_vm14, %v860_v63, %v770_v54  ;;  %vm12669_vm12 = vmmov %vm12653_vm7 }
 0x25b   : > { %1875 = vrot.lane.b32.xlu0 %v12597_v8, %s9315_s18  ;;  %v371_v8 = vld [vmem:[%s12300_s2] sm:$0xff]  ;;  %vm12680_vm14 = vmmov %vm12658_vm4 }
 0x25c   : > { %v761_v12 = vpop.permute.xlu0 %760  ;;  %v11110_v11 = vpop.permute.xlu1 %762 }
 0x25d   : > { %v771_v33 = vsel %vm768_vm10, %v759_v42, %v761_v12  ;;  %v772_v39 = vsel %vm768_vm10, %v761_v12, %v11110_v11  ;;  %v12668_v12 = vld [vmem:[#allocation90_spill] sm:$0xff] }
 0x25e   : > { %v868_v30 = vsel %vm12655_vm8, %v862_v21, %v772_v39  ;;  %v867_v61 = vsel %vm12647_vm3, %v861_v20, %v771_v33  ;;  %1015 = vperm.xlu1 %8272, %v372_v37   ;;  %vm12664_vm8 = vmmov %vm12647_vm3  ;;  %vm1018_vm3 = vcmask 228352  }
 0x25f   : > { %1142 = vmatprep.subr.mxu1 %v868_v30  ;;  %1010 = vperm.xlu0 %8271, %v371_v8  }
 0x260   : > { %1143 = vmatpush1.msra.mxu1 %v867_v61  ;;  %v755_v51 = vpop.permute.xlu1 %754  ;;  %v962_v57 = vpop.permute.xlu0 %961 }
 0x261   : > { %v769_v14 = vsel %vm768_vm10, %v755_v51, %v757_v34  ;;  %1144 = vmatprep.subr.mxu1 %v12660_v9  ;;  %v990_v47 = vsel %vm989_vm2, %v962_v57, %v11017_v31  ;;  %v12671_v9 = vld [vmem:[#allocation47_spill] sm:$0xff] }
 0x262   : > { %1064 = vmatpush1.msra.mxu0 %v990_v47  ;;  %1145 = vmatpush1.msra.mxu1 %v12662_v17  ;;  %v865_v42 = vsel %vm12664_vm8, %v859_v55, %v769_v14  ;;  %v12670_v14 = vld [vmem:[#allocation48_spill] sm:$0xff]  ;;  %v12672_v17 = vld [vmem:[#allocation49_spill] sm:$0xff] }
 0x263   : > { %1065 = vmatprep.subr.mxu0 %v866_v52  ;;  %7572 = vmatmul.mubr.msk.f32.vlgmr.msra.gmra.mxu1 %vm1018_vm3, %v11143_v40 }
 0x264   : > { %v686_v34 = vpop.permute.xlu1 %685  ;;  %1066 = vmatpush1.msra.mxu0 %v865_v42  ;;  %v684_v31 = vpop.permute.xlu0 %683  ;;  %1184 = vmatprep.mubr.f32.mxu1 %v12665_v53 }
 0x265   : > { %1067 = vmatprep.subr.mxu0 %v12666_v56  ;;  %v692_v38 = vsel %vm687_vm13, %v10821_v19, %v684_v31  ;;  %v693_v47 = vsel %vm687_vm13, %v684_v31, %v686_v34  ;;  %v12673_v56 = vld [vmem:[#allocation24_spill] sm:$0xff] }
 0x266   : > { %1068 = vmatpush1.msra.mxu0 %v12667_v1  ;;  %v851_v8 = vsel %vm801_vm11, %v12668_v12, %v692_v38  ;;  %v787_v1 = vsel %vm781_vm0, %v12541_v44, %v12673_v56  ;;  %v12675_v31 = vld [vmem:[#allocation28_spill] sm:$0xff]  ;;  %v12678_v12 = vld [vmem:[#allocation33_spill] sm:$0xff] }
 0x267   : > { %7568 = vmatmul.mubr.msk.f32.vlgmr.msra.gmra.mxu0 %vm1018_vm3, %v11143_v40  ;;  %7573 = vmatmul.mubr.msk.f32.gmra.mxu1 %vm1018_vm3, %v11150_v16 }
 0x268   : > { %v988_v3 = vpop.permute.xlu1 %987  ;;  %v986_v58 = vpop.permute.xlu0 %985  ;;  %1107 = vmatprep.mubr.f32.mxu0 %v12665_v53  ;;  %2187 = vmatprep.mubr.f32.mxu1 %v12665_v53 }
 0x269   : > { %v1000_v41 = vsel %vm989_vm2, %v10867_v4, %v986_v58  ;;  %v1001_v28 = vsel %vm989_vm2, %v986_v58, %v988_v3  ;;  %v12674_v3 = vld [vmem:[#allocation53_spill] sm:$0xff] }
 0x26a   : > { %7574 = vmatprep.subr.msk.mxu0 %vm801_vm11, %v1001_v28 }
 0x26b   : > { %7575 = vmatpush1.msk.msra.mxu0 %vm801_vm11, %v1000_v41  ;;  %v793_v41 = vsel %vm361_vm5, %v787_v1, %v12675_v31 }
 0x26c   : > { %v11163_v36 = vpop.permute.xlu1 %1791  ;;  %v1790_v27 = vpop.permute.xlu0 %1789  ;;  %7569 = vmatmul.mubr.msk.f32.gmra.mxu0 %vm1018_vm3, %v11150_v16 }
 0x26d   : > { %1255 = vmatprep.mubr.f32.mxu0 %v12665_v53 }
 0x270   : > { %v11168_v37 = vpop.permute.xlu1 %2083  ;;  %v2082_v2 = vpop.permute.xlu0 %2081 }
 0x271   : > { %v2100_v4 = vsel %vm989_vm2, %v2082_v2, %v11168_v37 }
 0x272   : > { %7578 = vmatprep.subr.msk.mxu1 %vm801_vm11, %v2100_v4 }
 0x274   : > { %v713_v6 = vpop.permute.xlu1 %712  ;;  %v711_v45 = vpop.permute.xlu0 %710 }
 0x275   : > { %v719_v33 = vsel %vm714_vm9, %v10916_v32, %v711_v45  ;;  %v720_v52 = vsel %vm714_vm9, %v711_v45, %v713_v6 }
 0x276   : > { %v857_v39 = vsel %vm12658_vm4, %v851_v8, %v719_v33  ;;  %vm12681_vm4 = vmmov %vm12664_vm8 }
 0x278   : > { %v1816_v21 = vpop.permute.xlu1 %1815  ;;  %v1788_v20 = vpop.permute.xlu0 %1787 }
 0x27c   : > { %v2080_v22 = vpop.permute.xlu1 %2079  ;;  %v11180_v48 = vpop.permute.xlu0 %1817 }
 0x27d   : > { %v2099_v30 = vsel %vm989_vm2, %v2080_v22, %v2082_v2  ;;  %v12676_v2 = vld [vmem:[#allocation31_spill] sm:$0xff]  ;;  %v12679_v22 = vld [vmem:[#allocation37_spill] sm:$0xff] }
 0x27e   : > { %7579 = vmatpush1.msk.msra.mxu1 %vm801_vm11, %v2099_v30  ;;  %v800_v4 = vsel %vm794_vm6, %v793_v41, %v12676_v2 }
 0x27f   : > { %v807_v8 = vsel %vm801_vm11, %v800_v4, %v12678_v12 }
 0x280   : > { %v740_v19 = vpop.permute.xlu1 %739  ;;  %v738_v61 = vpop.permute.xlu0 %737  ;;  %v814_v30 = vsel %vm12680_vm14, %v807_v8, %v12679_v22 }
 0x281   : > { %v746_v29 = vsel %vm741_vm1, %v11015_v60, %v738_v61  ;;  %v834_v60 = vsel %vm781_vm0, %v12671_v9, %v12670_v14  ;;  %v747_v34 = vsel %vm741_vm1, %v738_v61, %v740_v19  ;;  %v12684_v14 = vld [vmem:[#allocation45_spill] sm:$0xff] }
 0x282   : > { %v863_v18 = vsel %vm12669_vm12, %v857_v39, %v746_v29  ;;  %v12682_v29 = vld [vmem:[#allocation41_spill] sm:$0xff]  ;;  %vm12683_vm12 = vmmov %vm12653_vm7 }
 0x284   : > { %v974_v23 = vpop.permute.xlu1 %973  ;;  %v972_v32 = vpop.permute.xlu0 %971 }
 0x285   : > { %v994_v15 = vsel %vm989_vm2, %v11058_v26, %v972_v32  ;;  %v995_v54 = vsel %vm989_vm2, %v972_v32, %v974_v23  ;;  %v840_v26 = vsel %vm361_vm5, %v834_v60, %v12672_v17  ;;  %v1802_v23 = vsel %vm687_vm13, %v1790_v27, %v11163_v36  ;;  %v12686_v17 = vld [vmem:[#allocation40_spill] sm:$0xff] }
 0x286   : > { %1217 = vmatprep.subr.mxu0 %v995_v54  ;;  %v846_v58 = vsel %vm794_vm6, %v840_v26, %v12674_v3  ;;  %v1801_v32 = vsel %vm687_vm13, %v1788_v20, %v1790_v27  ;;  %v1828_v60 = vsel %vm714_vm9, %v1816_v21, %v11180_v48  ;;  %v12687_v27 = vld [vmem:[#allocation30_spill] sm:$0xff]  ;;  %v12688_v26 = vld [vmem:[#allocation35_spill] sm:$0xff] }
 0x287   : > { %1218 = vmatpush1.msra.mxu0 %v994_v15  ;;  %v852_v28 = vsel %vm801_vm11, %v846_v58, %v693_v47  ;;  %v1952_v20 = vsel %vm801_vm11, %v12687_v27, %v1802_v23 }
 0x288   : > { %v1842_v43 = vpop.permute.xlu1 %1841  ;;  %v1814_v7 = vpop.permute.xlu0 %1813  ;;  %v858_v38 = vsel %vm12677_vm15, %v852_v28, %v720_v52  ;;  %vm12685_vm15 = vmmov %vm12681_vm4  ;;  %v1951_v52 = vsel %vm801_vm11, %v12688_v26, %v1801_v32 }
 0x289   : > { %v864_v39 = vsel %vm12653_vm7, %v858_v38, %v747_v34  ;;  %vm12689_vm7 = vmmov %vm12680_vm14 }
 0x28a   : > { %vm12690_vm14 = vmmov %vm12689_vm7 }
 0x28c   : > { %v2068_v51 = vpop.permute.xlu1 %2067  ;;  %v11190_v57 = vpop.permute.xlu0 %1843 }
 0x28d   : > { %v1854_v47 = vsel %vm741_vm1, %v1842_v43, %v11190_v57 }
 0x290   : > { %v765_v63 = vpop.permute.xlu1 %764  ;;  %v11196_v55 = vpop.permute.xlu0 %2069 }
 0x291   : > { %v2094_v42 = vsel %vm989_vm2, %v2068_v51, %v11196_v55  ;;  %v773_v6 = vsel %vm768_vm10, %v11110_v11, %v765_v63  ;;  %v821_v11 = vsel %vm12683_vm12, %v814_v30, %v12682_v29 }
 0x292   : > { %2149 = vmatprep.subr.mxu1 %v2094_v42  ;;  %v869_v61 = vsel %vm12681_vm4, %v863_v18, %v773_v6  ;;  %v828_v9 = vsel %vm12685_vm15, %v821_v11, %v12684_v14  ;;  %v1827_v18 = vsel %vm714_vm9, %v1814_v7, %v1816_v21  ;;  %v1958_v21 = vsel %vm12689_vm7, %v1952_v20, %v1828_v60 }
 0x293   : > { %v1957_v7 = vsel %vm12690_vm14, %v1951_v52, %v1827_v18 }
 0x294   : > { %v1840_v44 = vpop.permute.xlu1 %1839  ;;  %v767_v45 = vpop.permute.xlu0 %766 }
 0x295   : > { %v774_v33 = vsel %vm768_vm10, %v765_v63, %v767_v45  ;;  %v1853_v63 = vsel %vm741_vm1, %v1840_v44, %v1842_v43 }
 0x296   : > { %v870_v19 = vsel %vm12664_vm8, %v864_v39, %v774_v33  ;;  %vm12691_vm8 = vmmov %vm12683_vm12  ;;  %v12695_v39 = vld [vmem:[#allocation25_spill] sm:$0xff] }
 0x297   : > { %1219 = vmatprep.subr.mxu0 %v870_v19  ;;  %v1963_v1 = vsel %vm12691_vm8, %v1957_v7, %v1853_v63  ;;  %vm12692_vm4 = vmmov %vm12691_vm8  ;;  %v1938_v63 = vsel %vm781_vm0, %v10522_v24, %v10550_v35 }
 0x298   : > { %v11230_v15 = vpop.permute.xlu1 %1869  ;;  %v1868_v54 = vpop.permute.xlu0 %1867  ;;  %1220 = vmatpush1.msra.mxu0 %v869_v61  ;;  %v1964_v34 = vsel %vm12692_vm4, %v1958_v21, %v1854_v47  ;;  %vm12693_vm12 = vmmov %vm12685_vm15 }
 0x299   : > { %1221 = vmatprep.subr.mxu0 %v828_v9  ;;  %v1880_v42 = vsel %vm768_vm10, %v1868_v54, %v11230_v15  ;;  %vm12694_vm15 = vmmov %vm12693_vm12 }
 0x29a   : > { %1222 = vmatpush1.msra.mxu0 %v12686_v17  ;;  %v1970_v31 = vsel %vm12693_vm12, %v1964_v34, %v1880_v42  ;;  %vm12696_vm0 = vmmov %vm12689_vm7 }
 0x29b   : > { %7576 = vmatmul.mubr.msk.f32.vlgmr.msra.gmra.mxu0 %vm1018_vm3, %v11143_v40  ;;  %vm12702_vm14 = vmmov %vm12696_vm0 }
 0x29c   : > { %v1866_v56 = vpop.permute.xlu1 %1865  ;;  %v2066_v43 = vpop.permute.xlu0 %2065  ;;  %1261 = vmatprep.mubr.f32.mxu0 %v12665_v53  ;;  %vm12703_vm8 = vmmov %vm12692_vm4 }
 0x29d   : > { %v1879_v3 = vsel %vm768_vm10, %v1866_v56, %v1868_v54  ;;  %v2093_v58 = vsel %vm989_vm2, %v2066_v43, %v2068_v51 }
 0x29e   : > { %2150 = vmatpush1.msra.mxu1 %v2093_v58  ;;  %v1969_v41 = vsel %vm12694_vm15, %v1963_v1, %v1879_v3 }
 0x29f   : > { %2151 = vmatprep.subr.mxu1 %v1970_v31  ;;  %7577 = vmatmul.mubr.msk.f32.gmra.mxu0 %vm1018_vm3, %v11150_v16 }
 0x2a0   : > { %v1796_v28 = vpop.permute.xlu1 %1795  ;;  %v1794_v2 = vpop.permute.xlu0 %1793  ;;  %2152 = vmatpush1.msra.mxu1 %v1969_v41  ;;  %2264 = vmatprep.mubr.f32.mxu0 %v12665_v53 }
 0x2a1   : > { %2153 = vmatprep.subr.mxu1 %v10731_v0  ;;  %v1803_v33 = vsel %vm687_vm13, %v11163_v36, %v1794_v2 }
 0x2a2   : > { %2154 = vmatpush1.msra.mxu1 %v10815_v10  ;;  %v1953_v22 = vsel %vm801_vm11, %v12695_v39, %v1803_v33 }
 0x2a3   : > { %7580 = vmatmul.mubr.msk.f32.vlgmr.msra.gmra.mxu1 %vm1018_vm3, %v11143_v40 }
 0x2a4   : > { %v1800_v51 = vpop.permute.xlu1 %1799  ;;  %2193 = vmatprep.mubr.f32.mxu1 %v12665_v53 }
 0x2a5   : > { %v1798_v4 = vpop.permute.xlu0 %1797 }
 0x2a6   : > { %v1805_v35 = vsel %vm687_vm13, %v1796_v28, %v1798_v4  ;;  %v1806_v7 = vsel %vm687_vm13, %v1798_v4, %v1800_v51 }
 0x2a7   : > { %7581 = vmatmul.mubr.msk.f32.gmra.mxu1 %vm1018_vm3, %v11150_v16 }
 0x2a8   : > { %v2088_v38 = vpop.permute.xlu1 %2087  ;;  %2341 = vmatprep.mubr.f32.mxu1 %v12665_v53 }
 0x2a9   : > { %v2086_v6 = vpop.permute.xlu0 %2085 }
 0x2aa   : > { %v2101_v44 = vsel %vm989_vm2, %v11168_v37, %v2086_v6  ;;  %v2102_v0 = vsel %vm989_vm2, %v2086_v6, %v2088_v38 }
 0x2ab   : > { %7582 = vmatprep.subr.msk.mxu0 %vm801_vm11, %v2102_v0 }
 0x2ac   : > { %7583 = vmatpush1.msk.msra.mxu0 %vm801_vm11, %v2101_v44  ;;  %v2092_v10 = vpop.permute.xlu1 %2091 }
 0x2ad   : > { %v2090_v45 = vpop.permute.xlu0 %2089 }
 0x2ae   : > { %v2103_v12 = vsel %vm989_vm2, %v2088_v38, %v2090_v45  ;;  %v2104_v8 = vsel %vm989_vm2, %v2090_v45, %v2092_v10 }
 0x2af   : > { %7586 = vmatprep.subr.msk.mxu1 %vm801_vm11, %v2104_v8 }
 0x2b0   : > { %7587 = vmatpush1.msk.msra.mxu1 %vm801_vm11, %v2103_v12  ;;  %v1822_v53 = vpop.permute.xlu1 %1821  ;;  %v8273_v12 = vld [vmem:[#allocation2] sm:$0xff] }
 0x2b1   : > { %v1820_v37 = vpop.permute.xlu0 %1819 }
 0x2b2   : > { %v1829_v30 = vsel %vm714_vm9, %v11180_v48, %v1820_v37  ;;  %v1804_v48 = vsel %vm687_vm13, %v1794_v2, %v1796_v28  ;;  %v1830_v17 = vsel %vm714_vm9, %v1820_v37, %v1822_v53  ;;  %v1955_v28 = vsel %vm801_vm11, %v10873_v49, %v1805_v35 }
 0x2b3   : > { %v1959_v19 = vsel %vm12689_vm7, %v1953_v22, %v1829_v30  ;;  %v1954_v24 = vsel %vm801_vm11, %v10884_v5, %v1804_v48  ;;  %v9318_v37 = vmov 1966171168   ;;  %v12707_v48 = vld [vmem:[#allocation19_spill] sm:$0xff] }
 0x2b4   : > { %v1826_v61 = vpop.permute.xlu1 %1825 }
 0x2b5   : > { %v1824_v29 = vpop.permute.xlu0 %1823 }
 0x2b6   : > { %v1831_v56 = vsel %vm714_vm9, %v1822_v53, %v1824_v29 }
 0x2b8   : > { %v1848_v11 = vpop.permute.xlu1 %1847 }
 0x2b9   : > { %v1846_v23 = vpop.permute.xlu0 %1845 }
 0x2ba   : > { %v1855_v26 = vsel %vm741_vm1, %v11190_v57, %v1846_v23  ;;  %v1856_v52 = vsel %vm741_vm1, %v1846_v23, %v1848_v11  ;;  %v1832_v57 = vsel %vm714_vm9, %v1824_v29, %v1826_v61  ;;  %vm12701_vm9 = vmmov %vm12696_vm0 }
 0x2bc   : > { %v1852_v32 = vpop.permute.xlu1 %1851 }
 0x2bd   : > { %v1850_v36 = vpop.permute.xlu0 %1849 }
 0x2be   : > { %v1857_v58 = vsel %vm741_vm1, %v1848_v11, %v1850_v36  ;;  %v1858_v34 = vsel %vm741_vm1, %v1850_v36, %v1852_v32  ;;  %vm12704_vm1 = vmmov %vm12692_vm4 }
 0x2c0   : > { %v2074_v54 = vpop.permute.xlu1 %2073 }
 0x2c1   : > { %v2072_v14 = vpop.permute.xlu0 %2071 }
 0x2c2   : > { %v2095_v9 = vsel %vm989_vm2, %v11196_v55, %v2072_v14  ;;  %v2096_v60 = vsel %vm989_vm2, %v2072_v14, %v2074_v54  ;;  %v1944_v55 = vsel %vm361_vm5, %v1938_v63, %v10597_v13  ;;  %v1960_v13 = vsel %vm12696_vm0, %v1954_v24, %v1830_v17  ;;  %vm12697_vm5 = vmmov %vm12692_vm4 }
 0x2c3   : > { %2226 = vmatprep.subr.mxu0 %v2096_v60  ;;  %v1950_v42 = vsel %vm794_vm6, %v1944_v55, %v10684_v46  ;;  %v1965_v1 = vsel %vm12697_vm5, %v1959_v19, %v1855_v26  ;;  %vm12698_vm6 = vmmov %vm12692_vm4 }
 0x2c4   : > { %2227 = vmatpush1.msra.mxu0 %v2095_v9  ;;  %v2078_v18 = vpop.permute.xlu1 %2077  ;;  %v1966_v3 = vsel %vm12698_vm6, %v1960_v13, %v1856_v52  ;;  %v1956_v2 = vsel %vm801_vm11, %v1950_v42, %v1806_v7 }
 0x2c5   : > { %v2076_v47 = vpop.permute.xlu0 %2075  ;;  %v1962_v4 = vsel %vm12702_vm14, %v1956_v2, %v1832_v57 }
 0x2c6   : > { %v2097_v27 = vsel %vm989_vm2, %v2074_v54, %v2076_v47  ;;  %v2098_v20 = vsel %vm989_vm2, %v2076_v47, %v2078_v18  ;;  %vm12699_vm2 = vmmov %vm12693_vm12  ;;  %v1968_v49 = vsel %vm12704_vm1, %v1962_v4, %v1858_v34 }
 0x2c7   : > { %2303 = vmatprep.subr.mxu1 %v2098_v20  ;;  %vm12700_vm13 = vmmov %vm12699_vm2 }
 0x2c8   : > { %2304 = vmatpush1.msra.mxu1 %v2097_v27  ;;  %v1874_v21 = vpop.permute.xlu1 %1873  ;;  %vm12705_vm11 = vmmov %vm12699_vm2 }
 0x2c9   : > { %v1872_v43 = vpop.permute.xlu0 %1871  ;;  %vm12706_vm4 = vmmov %vm12699_vm2 }
 0x2ca   : > { %v1881_v46 = vsel %vm768_vm10, %v11230_v15, %v1872_v43  ;;  %v1882_v5 = vsel %vm768_vm10, %v1872_v43, %v1874_v21  ;;  %v1961_v15 = vsel %vm12701_vm9, %v1955_v28, %v1831_v56 }
 0x2cb   : > { %v1972_v31 = vsel %vm12699_vm2, %v1966_v3, %v1882_v5  ;;  %v1971_v41 = vsel %vm12700_vm13, %v1965_v1, %v1881_v46  ;;  %v1967_v6 = vsel %vm12703_vm8, %v1961_v15, %v1857_v58 }
 0x2cc   : > { %2228 = vmatprep.subr.mxu0 %v1972_v31  ;;  %v1878_v51 = vpop.permute.xlu1 %1877 }
 0x2cd   : > { %v1876_v38 = vpop.permute.xlu0 %1875  ;;  %2229 = vmatpush1.msra.mxu0 %v1971_v41 }
 0x2ce   : > { %v1883_v44 = vsel %vm768_vm10, %v1874_v21, %v1876_v38  ;;  %v1884_v0 = vsel %vm768_vm10, %v1876_v38, %v1878_v51  ;;  %2230 = vmatprep.subr.mxu0 %v11037_v50 }
 0x2cf   : > { %2231 = vmatpush1.msra.mxu0 %v10756_v59  ;;  %v1974_v10 = vsel %vm12705_vm11, %v1968_v49, %v1884_v0  ;;  %v1973_v45 = vsel %vm12706_vm4, %v1967_v6, %v1883_v44 }
 0x2d0   : > { %7584 = vmatmul.mubr.msk.f32.vlgmr.msra.gmra.mxu0 %vm1018_vm3, %v11143_v40  ;;  %2305 = vmatprep.subr.mxu1 %v1974_v10 }
 0x2d1   : > { %2306 = vmatpush1.msra.mxu1 %v1973_v45  ;;  %2270 = vmatprep.mubr.f32.mxu0 %v8273_v12 }
 0x2d2   : > { %2307 = vmatprep.subr.mxu1 %v10798_v25  ;;  %v1290_v25 = vunpack.c.l.s4 %v9318_v37 }
 0x2d3   : > { %2308 = vmatpush1.msra.mxu1 %v11026_v62 }
 0x2d4   : > { %7585 = vmatmul.mubr.msk.f32.gmra.mxu0 %vm1018_vm3, %v11150_v16  ;;  %7588 = vmatmul.mubr.msk.f32.vlgmr.msra.gmra.mxu1 %vm1018_vm3, %v11143_v40  ;;  %v1291_v61 = vunpack.c.0.s8 %v1290_v25 }
 0x2d5   : > { %2347 = vmatprep.mubr.f32.mxu1 %v8273_v12 }
 0x2d6   : > { %v11354_v47 = vsub.s32 %v1291_v61, %v12707_v48 }
 0x2d8   : > { %7589 = vmatmul.mubr.msk.f32.gmra.mxu1 %vm1018_vm3, %v11150_v16 }
 0x2d9   : > { %v11347_v16 = vpop.permute.xlu1 %1015 }
 0x2da   : > { %v11341_v53 = vpop.permute.xlu0 %1010 }
 0x323   : > { %v1180_v59 = vpop.f32.mrf.mxu1 }
 0x324   : > { %v1181_v30 = vadd.f32 %v1180_v59, %v11341_v53 }
 0x325   : > { %v1182_v8 = vpop.f32.mrf.mxu1 }
 0x326   : > { %v1183_v40 = vadd.f32 %v1182_v8, %v11341_v53  ;;  %v1270_v32 = vmax.f32 %v1181_v30, 0.0  ;;  %v12708_v30 = vlaneseq }
 0x327   : > { %v1103_v50 = vpop.f32.mrf.mxu0  ;;  %v1186_v39 = vpop.f32.mrf.mxu1 }
 0x328   : > { %v1104_v62 = vadd.f32 %v1103_v50, %v11341_v53  ;;  %v1271_v36 = vmax.f32 %v1183_v40, 0.0  ;;  %v1187_v60 = vadd.f32 %v1186_v39, %v11347_v16  ;;  %vm11375_vm10 = vcmp.lt.s32.totalorder %v12708_v30, 757 }
 0x329   : > { %v1105_v33 = vpop.f32.mrf.mxu0  ;;  %v1188_v29 = vpop.f32.mrf.mxu1 }
 0x32a   : > { %v1106_v22 = vadd.f32 %v1105_v33, %v11341_v53  ;;  %v1268_v11 = vmax.f32 %v1104_v62, 0.0  ;;  %v1189_v18 = vadd.f32 %v1188_v29, %v11347_v16  ;;  %v1287_v17 = vcombine.low %v1270_v32, %v1271_v36 }
 0x32b   : > { %v1361_v20 = vcombine.high %v1270_v32, %v1271_v36  ;;  %v1276_v52 = vmax.f32 %v1187_v60, 0.0 }
 0x32c   : > { %v1109_v19 = vpop.f32.mrf.mxu0  ;;  %v1269_v23 = vmax.f32 %v1106_v22, 0.0  ;;  %v1277_v42 = vmax.f32 %v1189_v18, 0.0  ;;  %v1302_v21 = vrot.slane %v1287_v17, %v11354_v47 }
 0x32d   : > { %v1110_v14 = vadd.f32 %v1109_v19, %v11347_v16  ;;  %v1376_v13 = vrot.slane %v1361_v20, %v11354_v47 }
 0x32e   : > { %v1111_v54 = vpop.f32.mrf.mxu0  ;;  %v1286_v63 = vcombine.low %v1268_v11, %v1269_v23  ;;  %v1360_v27 = vcombine.high %v1268_v11, %v1269_v23  ;;  %v1438_v1 = vcombine.low %v1276_v52, %v1277_v42 }
 0x32f   : > { %v1112_v9 = vadd.f32 %v1111_v54, %v11347_v16  ;;  %v1274_v55 = vmax.f32 %v1110_v14, 0.0 }
 0x330   : > { %v1295_v35 = vrot.slane %v1286_v63, %v11354_v47  ;;  %v1369_v7 = vrot.slane %v1360_v27, %v11354_v47  ;;  %v1453_v51 = vrot.slane %v1438_v1, %v11354_v47 }
 0x331   : > { %v1275_v26 = vmax.f32 %v1112_v9, 0.0 }
 0x332   : > { %v1310_v3 = vcombine.low %v1295_v35, %v1302_v21  ;;  %v1384_v34 = vcombine.low %v1369_v7, %v1376_v13  ;;  %v1332_v28 = vcombine.high %v1295_v35, %v1302_v21  ;;  %v1403_v0 = vcombine.high %v1369_v7, %v1376_v13 }
 0x333   : > { %v1437_v43 = vcombine.low %v1274_v55, %v1275_v26 }
 0x334   : > { %v1317_v44 = vrot.slane %v1310_v3, %v11354_v47  ;;  %v1391_v10 = vrot.slane %v1384_v34, %v11354_v47  ;;  %v1340_v50 = vrot.slane %v1332_v28, %v11354_v47  ;;  %v1411_v22 = vrot.slane %v1403_v0, %v11354_v47 }
 0x335   : > { %v1446_v2 = vrot.slane %v1437_v43, %v11354_v47 }
 0x337   : > { %v1461_v8 = vcombine.low %v1446_v2, %v1453_v51  ;;  %v1480_v33 = vcombine.high %v1446_v2, %v1453_v51 }
 0x339   : > { %v1468_v54 = vrot.slane %v1461_v8, %v11354_v47  ;;  %v1488_v18 = vrot.slane %v1480_v33, %v11354_v47 }
 0x35b   : > { %v1257_v24 = vpop.f32.mrf.mxu0 }
 0x35c   : > { %v1258_v56 = vadd.f32 %v1257_v24, %v11341_v53 }
 0x35d   : > { %v1259_v57 = vpop.f32.mrf.mxu0 }
 0x35e   : > { %v1260_v46 = vadd.f32 %v1259_v57, %v11341_v53  ;;  %v1272_v5 = vmax.f32 %v1258_v56, 0.0 }
 0x35f   : > { %v1263_v58 = vpop.f32.mrf.mxu0 }
 0x360   : > { %v1273_v31 = vmax.f32 %v1260_v46, 0.0  ;;  %v1264_v41 = vadd.f32 %v1263_v58, %v11347_v16 }
 0x361   : > { %v1265_v15 = vpop.f32.mrf.mxu0 }
 0x362   : > { %v1288_v4 = vcombine.low %v1272_v5, %v1273_v31  ;;  %v1362_v38 = vcombine.high %v1272_v5, %v1273_v31  ;;  %v1266_v6 = vadd.f32 %v1265_v15, %v11347_v16  ;;  %v1278_v49 = vmax.f32 %v1264_v41, 0.0 }
 0x363   : > { %v2189_v52 = vpop.f32.mrf.mxu1 }
 0x364   : > { %v1309_v45 = vrot.slane %v1288_v4, %v11354_v47  ;;  %v1383_v12 = vrot.slane %v1362_v38, %v11354_v47  ;;  %v1279_v59 = vmax.f32 %v1266_v6, 0.0  ;;  %v2190_v35 = vadd.f32 %v2189_v52, %v11341_v53 }
 0x365   : > { %v2191_v42 = vpop.f32.mrf.mxu1 }
 0x366   : > { %v1324_v37 = vrot.slane %v1309_v45, %v11354_v47  ;;  %v1333_v25 = vcombine.high %v1309_v45, %v1309_v45  ;;  %v1398_v39 = vrot.slane %v1383_v12, %v11354_v47  ;;  %v1404_v62 = vcombine.high %v1383_v12, %v1383_v12 }
 0x367   : > { %v1439_v19 = vcombine.low %v1278_v49, %v1279_v59  ;;  %v2195_v24 = vpop.f32.mrf.mxu1  ;;  %v2192_v21 = vadd.f32 %v2191_v42, %v11341_v53  ;;  %v2354_v57 = vmax.f32 %v2190_v35, 0.0 }
 0x368   : > { %v1325_v61 = vcombine.low %v1317_v44, %v1324_v37  ;;  %v1347_v29 = vrot.slane %v1333_v25, %v11354_v47  ;;  %v1352_v11 = vcombine.high %v1317_v44, %v1324_v37  ;;  %v1399_v23 = vcombine.low %v1391_v10, %v1398_v39 }
 0x369   : > { %v1418_v32 = vrot.slane %v1404_v62, %v11354_v47  ;;  %v1423_v36 = vcombine.high %v1391_v10, %v1398_v39  ;;  %v1460_v14 = vrot.slane %v1439_v19, %v11354_v47  ;;  %v2197_v13 = vpop.f32.mrf.mxu1  ;;  %v2355_v43 = vmax.f32 %v2192_v21, 0.0 }
 0x36a   : > { %1331 = vst.msk [vmem:[#allocation2] ss:$2 sm:$0x3f] %vm11375_vm10, %v1325_v61  ;;  %v1348_v9 = vcombine.low %v1340_v50, %v1347_v29  ;;  %1355 = vst.msk [vmem:[#allocation2 + $0x18] ss:$2 sm:$0x3f] %vm11375_vm10, %v1352_v11  ;;  %v1356_v60 = vcombine.high %v1340_v50, %v1347_v29  ;;  %v2196_v46 = vadd.f32 %v2195_v24, %v11347_v16 }
 0x36b   : > { %1402 = vst.msk [vmem:[#allocation2 + $0x30] ss:$2 sm:$0x3f] %vm11375_vm10, %v1399_v23  ;;  %v1419_v48 = vcombine.low %v1411_v22, %v1418_v32  ;;  %1426 = vst.msk [vmem:[#allocation2 + $0x48] ss:$2 sm:$0x3f] %vm11375_vm10, %v1423_v36  ;;  %v1427_v63 = vcombine.high %v1411_v22, %v1418_v32  ;;  %v1475_v17 = vrot.slane %v1460_v14, %v11354_v47 }
 0x36c   : > { %v1481_v27 = vcombine.high %v1460_v14, %v1460_v14  ;;  %1351 = vst.msk [vmem:[#allocation2 + $0xc] ss:$2 sm:$0x3f] %vm11375_vm10, %v1348_v9  ;;  %1359 = vst.msk [vmem:[#allocation2 + $0x24] ss:$2 sm:$0x3f] %vm11375_vm10, %v1356_v60  ;;  %v2198_v3 = vadd.f32 %v2197_v13, %v11347_v16  ;;  %v2372_v2 = vcombine.low %v2354_v57, %v2355_v43 }
 0x36d   : > { %1422 = vst.msk [vmem:[#allocation2 + $0x3c] ss:$2 sm:$0x3f] %vm11375_vm10, %v1419_v48  ;;  %1430 = vst.msk [vmem:[#allocation2 + $0x54] ss:$2 sm:$0x3f] %vm11375_vm10, %v1427_v63  ;;  %v1476_v20 = vcombine.low %v1468_v54, %v1475_v17  ;;  %v2443_v51 = vcombine.high %v2354_v57, %v2355_v43 }
 0x36e   : > { %v1495_v55 = vrot.slane %v1481_v27, %v11354_v47  ;;  %v2360_v6 = vmax.f32 %v2196_v46, 0.0  ;;  %v2361_v44 = vmax.f32 %v2198_v3, 0.0  ;;  %v2381_v33 = vrot.slane %v2372_v2, %v11354_v47 }
 0x36f   : > { %1479 = vst.msk [vmem:[#allocation2 + $0x60] ss:$2 sm:$0x3f] %vm11375_vm10, %v1476_v20  ;;  %v2452_v62 = vrot.slane %v2443_v51, %v11354_v47 }
 0x370   : > { %v1496_v26 = vcombine.low %v1488_v18, %v1495_v55  ;;  %v2520_v22 = vcombine.low %v2360_v6, %v2361_v44 }
 0x372   : > { %1499 = vst.msk [vmem:[#allocation2 + $0x6c] ss:$2 sm:$0x3f] %vm11375_vm10, %v1496_v26  ;;  %v2529_v60 = vrot.slane %v2520_v22, %v11354_v47 }
 0x390   : > { %v2266_v7 = vpop.f32.mrf.mxu0 }
 0x391   : > { %v2267_v56 = vadd.f32 %v2266_v7, %v11341_v53 }
 0x392   : > { %v2268_v1 = vpop.f32.mrf.mxu0 }
 0x393   : > { %v2356_v5 = vmax.f32 %v2267_v56, 0.0  ;;  %v2269_v58 = vadd.f32 %v2268_v1, %v11341_v53 }
 0x394   : > { %v2272_v34 = vpop.f32.mrf.mxu0  ;;  %v2343_v31 = vpop.f32.mrf.mxu1 }
 0x395   : > { %v2357_v41 = vmax.f32 %v2269_v58, 0.0  ;;  %v2273_v28 = vadd.f32 %v2272_v34, %v11347_v16  ;;  %v2344_v15 = vadd.f32 %v2343_v31, %v11341_v53 }
 0x396   : > { %v2274_v4 = vpop.f32.mrf.mxu0  ;;  %v2345_v38 = vpop.f32.mrf.mxu1 }
 0x397   : > { %v2373_v0 = vcombine.low %v2356_v5, %v2357_v41  ;;  %v2444_v49 = vcombine.high %v2356_v5, %v2357_v41  ;;  %v2362_v10 = vmax.f32 %v2273_v28, 0.0  ;;  %v2275_v45 = vadd.f32 %v2274_v4, %v11347_v16 }
 0x398   : > { %v2346_v12 = vadd.f32 %v2345_v38, %v11341_v53  ;;  %v2349_v59 = vpop.f32.mrf.mxu1  ;;  %v2358_v37 = vmax.f32 %v2344_v15, 0.0 }
 0x399   : > { %v2388_v50 = vrot.slane %v2373_v0, %v11354_v47  ;;  %v2459_v8 = vrot.slane %v2444_v49, %v11354_v47  ;;  %v2363_v25 = vmax.f32 %v2275_v45, 0.0  ;;  %v2350_v30 = vadd.f32 %v2349_v59, %v11347_v16 }
 0x39a   : > { %v2359_v39 = vmax.f32 %v2346_v12, 0.0  ;;  %v2351_v19 = vpop.f32.mrf.mxu1 }
 0x39b   : > { %v2396_v61 = vcombine.low %v2381_v33, %v2388_v50  ;;  %v2521_v29 = vcombine.low %v2362_v10, %v2363_v25  ;;  %v2415_v23 = vcombine.high %v2381_v33, %v2388_v50  ;;  %v2467_v32 = vcombine.low %v2452_v62, %v2459_v8 }
 0x39c   : > { %v2374_v11 = vcombine.low %v2358_v37, %v2359_v39  ;;  %v2445_v53 = vcombine.high %v2358_v37, %v2359_v39  ;;  %v2486_v36 = vcombine.high %v2452_v62, %v2459_v8  ;;  %v2352_v9 = vadd.f32 %v2351_v19, %v11347_v16 }
 0x39d   : > { %v2364_v18 = vmax.f32 %v2350_v30, 0.0  ;;  %v2403_v48 = vrot.slane %v2396_v61, %v11354_v47  ;;  %v2536_v63 = vrot.slane %v2521_v29, %v11354_v47  ;;  %v2474_v20 = vrot.slane %v2467_v32, %v11354_v47 }
 0x39e   : > { %v2395_v54 = vrot.slane %v2374_v11, %v11354_v47  ;;  %v2466_v14 = vrot.slane %v2445_v53, %v11354_v47  ;;  %v2365_v52 = vmax.f32 %v2352_v9, 0.0  ;;  %v2423_v42 = vrot.slane %v2415_v23, %v11354_v47 }
 0x39f   : > { %v2494_v16 = vrot.slane %v2486_v36, %v11354_v47  ;;  %v2544_v57 = vcombine.low %v2529_v60, %v2536_v63  ;;  %v2563_v58 = vcombine.high %v2529_v60, %v2536_v63 }
 0x3a0   : > { %v2410_v17 = vrot.slane %v2395_v54, %v11354_v47  ;;  %v2416_v27 = vcombine.high %v2395_v54, %v2395_v54  ;;  %v2481_v55 = vrot.slane %v2466_v14, %v11354_v47  ;;  %v2487_v26 = vcombine.high %v2466_v14, %v2466_v14 }
 0x3a1   : > { %v2522_v46 = vcombine.low %v2364_v18, %v2365_v52  ;;  %v2551_v31 = vrot.slane %v2544_v57, %v11354_v47  ;;  %v2571_v2 = vrot.slane %v2563_v58, %v11354_v47 }
 0x3a2   : > { %v2411_v24 = vcombine.low %v2403_v48, %v2410_v17  ;;  %v2430_v35 = vrot.slane %v2416_v27, %v11354_v47  ;;  %v2435_v21 = vcombine.high %v2403_v48, %v2410_v17  ;;  %v2482_v7 = vcombine.low %v2474_v20, %v2481_v55 }
 0x3a3   : > { %v2501_v13 = vrot.slane %v2487_v26, %v11354_v47  ;;  %v2506_v56 = vcombine.high %v2474_v20, %v2481_v55  ;;  %v2543_v34 = vrot.slane %v2522_v46, %v11354_v47 }
 0x3a4   : > { %2414 = vst.msk [vmem:[#allocation2 + $0x1] ss:$2 sm:$0x3f] %vm11375_vm10, %v2411_v24  ;;  %v2431_v43 = vcombine.low %v2423_v42, %v2430_v35  ;;  %v2439_v1 = vcombine.high %v2423_v42, %v2430_v35  ;;  %2438 = vst.msk [vmem:[#allocation2 + $0x19] ss:$2 sm:$0x3f] %vm11375_vm10, %v2435_v21 }
 0x3a5   : > { %2485 = vst.msk [vmem:[#allocation2 + $0x31] ss:$2 sm:$0x3f] %vm11375_vm10, %v2482_v7  ;;  %v2502_v5 = vcombine.low %v2494_v16, %v2501_v13  ;;  %2509 = vst.msk [vmem:[#allocation2 + $0x49] ss:$2 sm:$0x3f] %vm11375_vm10, %v2506_v56  ;;  %v2510_v3 = vcombine.high %v2494_v16, %v2501_v13  ;;  %v2558_v41 = vrot.slane %v2543_v34, %v11354_v47 }
 0x3a6   : > { %2434 = vst.msk [vmem:[#allocation2 + $0xd] ss:$2 sm:$0x3f] %vm11375_vm10, %v2431_v43  ;;  %2442 = vst.msk [vmem:[#allocation2 + $0x25] ss:$2 sm:$0x3f] %vm11375_vm10, %v2439_v1  ;;  %v2564_v28 = vcombine.high %v2543_v34, %v2543_v34 }
 0x3a7   : > { %2505 = vst.msk [vmem:[#allocation2 + $0x3d] ss:$2 sm:$0x3f] %vm11375_vm10, %v2502_v5  ;;  %2513 = vst.msk [vmem:[#allocation2 + $0x55] ss:$2 sm:$0x3f] %vm11375_vm10, %v2510_v3  ;;  %v2559_v51 = vcombine.low %v2551_v31, %v2558_v41 }
 0x3a8   : > { %v2578_v15 = vrot.slane %v2564_v28, %v11354_v47 }
 0x3a9   : > { %2562 = vst.msk [vmem:[#allocation2 + $0x61] ss:$2 sm:$0x3f] %vm11375_vm10, %v2559_v51 }
 0x3aa   : > { %v2579_v4 = vcombine.low %v2571_v2, %v2578_v15 }
 0x3ac   : > { %2582 = vst.msk [vmem:[#allocation2 + $0x6d] ss:$2 sm:$0x3f] %vm11375_vm10, %v2579_v4 }
 0x3ad PF: > { %v8274_v38 = vld [vmem:[%s9503_s14 + $0x694] ss:$120 sps:$4 sm:$0xff]   ;;  %v8278_v6 = vld [vmem:[%s9503_s14 + $0x690] ss:$120 sps:$4 sm:$0xff]   ;;  %v8280_v40 = vld [vmem:[%s9503_s14 + $0x5a4] ss:$120 sps:$4 sm:$0xff]   ;;  %v2606_v29 = vlaneseq }
 0x3ae   : > { %v8276_v47 = vld [vmem:[%s9503_s14 + $0x69c] ss:$120 sps:$4 sm:$0xff]   ;;  %5970 = vmatprep.subr.bf16.mxu0 %v8274_v38  ;;  %v8279_v44 = vld [vmem:[%s9503_s14 + $0x698] ss:$120 sps:$4 sm:$0xff]   ;;  %v8282_v0 = vld [vmem:[%s9503_s14 + $0x5ac] ss:$120 sps:$4 sm:$0xff]  }
 0x3af   : > { %6011 = vmatprep.subr.bf16.mxu1 %v8276_v47  ;;  %5971 = vmatpush1.bf16.xpose.msra.mxu0 %v8278_v6  ;;  %v8284_v49 = vld [vmem:[%s9503_s14 + $0x5a0] ss:$120 sps:$4 sm:$0xff]   ;;  %v8286_v45 = vld [vmem:[%s9503_s14 + $0x4b4] ss:$120 sps:$4 sm:$0xff]   ;;  %v8290_v59 = vld [vmem:[%s9503_s14 + $0x4b0] ss:$120 sps:$4 sm:$0xff]  }
 0x3b0   : > { %6012 = vmatpush1.bf16.xpose.msra.mxu1 %v8279_v44  ;;  %5972 = vmatprep.subr.bf16.mxu0 %v8280_v40  ;;  %v8285_v10 = vld [vmem:[%s9503_s14 + $0x5a8] ss:$120 sps:$4 sm:$0xff]   ;;  %v8288_v12 = vld [vmem:[%s9503_s14 + $0x4bc] ss:$120 sps:$4 sm:$0xff]   ;;  %v8291_v50 = vld [vmem:[%s9503_s14 + $0x4b8] ss:$120 sps:$4 sm:$0xff]  }
 0x3b1   : > { %6013 = vmatprep.subr.bf16.mxu1 %v8282_v0  ;;  %v8292_v8 = vld [vmem:[%s9503_s14 + $0x3c4] ss:$120 sps:$4 sm:$0xff]   ;;  %v8296_v37 = vld [vmem:[%s9503_s14 + $0x3c0] ss:$120 sps:$4 sm:$0xff]   ;;  %v8298_v39 = vld [vmem:[%s9503_s14 + $0x2d4] ss:$120 sps:$4 sm:$0xff]  }
 0x3b2   : > { %v8294_v33 = vld [vmem:[%s9503_s14 + $0x3cc] ss:$120 sps:$4 sm:$0xff]   ;;  %v8297_v25 = vld [vmem:[%s9503_s14 + $0x3c8] ss:$120 sps:$4 sm:$0xff]   ;;  %v8300_v62 = vld [vmem:[%s9503_s14 + $0x2dc] ss:$120 sps:$4 sm:$0xff]  }
 0x3b3   : > { %v8302_v22 = vld [vmem:[%s9503_s14 + $0x2d0] ss:$120 sps:$4 sm:$0xff]   ;;  %v9319_v19 = vmov 1983009808   ;;  %v8304_v11 = vld [vmem:[%s9503_s14 + $0x1e4] ss:$120 sps:$4 sm:$0xff]  }
 0x3b4   : > { %v8303_v30 = vld [vmem:[%s9503_s14 + $0x2d8] ss:$120 sps:$4 sm:$0xff]   ;;  %v2604_v61 = vunpack.c.l.s4 %v9319_v19  ;;  %v8306_v53 = vld [vmem:[%s9503_s14 + $0x1ec] ss:$120 sps:$4 sm:$0xff]   ;;  %s8142_s16 = smul.u32 60, %s9382_s28  ;;  %v11482_v32 = vshrl.u32 %v2606_v29, 7 }
 0x3b5   : > { %v8308_v36 = vld [vmem:[%s9503_s14 + $0x1e0] ss:$120 sps:$4 sm:$0xff]   ;;  %v8310_v9 = vld [vmem:[%s9503_s14 + $0xf4] ss:$120 sps:$4 sm:$0xff]   ;;  %v8314_v20 = vld [vmem:[%s9503_s14 + $0xf0] ss:$120 sps:$4 sm:$0xff]  }
 0x3b6   : > { %v2605_v23 = vunpack.c.0.s8 %v2604_v61  ;;  %v8309_v54 = vld [vmem:[%s9503_s14 + $0x1e8] ss:$120 sps:$4 sm:$0xff]   ;;  %v8312_v60 = vld [vmem:[%s9503_s14 + $0xfc] ss:$120 sps:$4 sm:$0xff]   ;;  %s11491_s19 = scalar_lea.vmem [#allocation2], %s8142_s16  ;;  %vm7206_vm3 = vcmask 1041408  }
 0x3b7   : > { %5973 = vmatpush1.bf16.xpose.msra.mxu0 %v8284_v49  ;;  %v2586_v18 = vld [vmem:[%s11491_s19] sm:$0xff]  ;;  %v8316_v42 = vld [vmem:[%s9503_s14 + $0x4] ss:$120 sps:$4 sm:$0xff]   ;;  %vm7207_vm12 = vcmask 1043458   ;;  %vm7209_vm7 = vcmask 193540   ;;  %p8132_p3 = scmp.ne.s32.totalorder %s9382_s28, 1 }
 0x3b8   : > { %6014 = vmatpush1.bf16.xpose.msra.mxu1 %v8285_v10  ;;  %5974 = vmatprep.subr.bf16.mxu0 %v8286_v45  ;;  %v11487_v14 = vsub.s32 %v2605_v23, %v11482_v32  ;;  %v2602_v63 = vcombine.high %v2586_v18, %v2586_v18  ;;  %v8315_v52 = vld [vmem:[%s9503_s14 + $0xf8] ss:$120 sps:$4 sm:$0xff]   ;;  %v8318_v16 = vld [vmem:[%s9503_s14 + $0xc] ss:$120 sps:$4 sm:$0xff]   ;;  %v8321_v21 = vld [vmem:[%s9503_s14 + $0x8] ss:$120 sps:$4 sm:$0xff]  }
 0x3b9   : > { %6015 = vmatprep.subr.bf16.mxu1 %v8288_v12  ;;  %v8320_v35 = vld [vmem:[%s9503_s14] ss:$120 sps:$4 sm:$0xff]   ;;  %v8322_v7 = vld [vmem:[%s9503_s14 + $0xe14] ss:$120 sps:$4 sm:$0xff]   ;;  %v8326_v56 = vld [vmem:[%s9503_s14 + $0xe10] ss:$120 sps:$4 sm:$0xff]  }
 0x3ba   : > { %v11495_v48 = vrot.slane %v2586_v18, %v11487_v14  ;;  %v11500_v27 = vrot.slane %v2602_v63, %v11487_v14  ;;  %v8324_v13 = vld [vmem:[%s9503_s14 + $0xe1c] ss:$120 sps:$4 sm:$0xff]   ;;  %v8327_v57 = vld [vmem:[%s9503_s14 + $0xe18] ss:$120 sps:$4 sm:$0xff]   ;;  %v8330_v1 = vld [vmem:[%s9503_s14 + $0xd2c] ss:$120 sps:$4 sm:$0xff]  }
 0x3bb   : > { %v8328_v43 = vld [vmem:[%s9503_s14 + $0xd24] ss:$120 sps:$4 sm:$0xff]   ;;  %v8332_v46 = vld [vmem:[%s9503_s14 + $0xd20] ss:$120 sps:$4 sm:$0xff]   ;;  %v8334_v3 = vld [vmem:[%s9503_s14 + $0xc34] ss:$120 sps:$4 sm:$0xff]  }
 0x3bc   : > { %v2617_v17 = vcombine.high %v11495_v48, %v11495_v48  ;;  %v2618_v26 = vcombine.high %v11500_v27, %v11500_v27  ;;  %v8333_v5 = vld [vmem:[%s9503_s14 + $0xd28] ss:$120 sps:$4 sm:$0xff]   ;;  %v8336_v58 = vld [vmem:[%s9503_s14 + $0xc3c] ss:$120 sps:$4 sm:$0xff]   ;;  %v8339_v31 = vld [vmem:[%s9503_s14 + $0xc38] ss:$120 sps:$4 sm:$0xff]  }
 0x3bd   : > { %v8338_v34 = vld [vmem:[%s9503_s14 + $0xc30] ss:$120 sps:$4 sm:$0xff]   ;;  %v8340_v41 = vld [vmem:[%s9503_s14 + $0xb44] ss:$120 sps:$4 sm:$0xff]   ;;  %v8344_v2 = vld [vmem:[%s9503_s14 + $0xb40] ss:$120 sps:$4 sm:$0xff]  }
 0x3be   : > { %v11503_v55 = vpack.c.bf16 %v2617_v17, %v2617_v17  ;;  %v11511_v24 = vpack.c.bf16 %v2618_v26, %v2618_v26  ;;  %v8342_v28 = vld [vmem:[%s9503_s14 + $0xb4c] ss:$120 sps:$4 sm:$0xff]   ;;  %v8345_v51 = vld [vmem:[%s9503_s14 + $0xb48] ss:$120 sps:$4 sm:$0xff]   ;;  %v8348_v4 = vld [vmem:[%s9503_s14 + $0xa5c] ss:$120 sps:$4 sm:$0xff]  }
 0x3bf   : > { %5975 = vmatpush1.bf16.xpose.msra.mxu0 %v8290_v59  ;;  %v8346_v15 = vld [vmem:[%s9503_s14 + $0xa54] ss:$120 sps:$4 sm:$0xff]   ;;  %v8350_v38 = vld [vmem:[%s9503_s14 + $0xa50] ss:$120 sps:$4 sm:$0xff]   ;;  %v8352_v6 = vld [vmem:[%s9503_s14 + $0x964] ss:$120 sps:$4 sm:$0xff]  }
 0x3c0   : > { %6016 = vmatpush1.bf16.xpose.msra.mxu1 %v8291_v50  ;;  %5976 = vmatprep.subr.bf16.mxu0 %v8292_v8  ;;  %v8351_v47 = vld [vmem:[%s9503_s14 + $0xa58] ss:$120 sps:$4 sm:$0xff]   ;;  %v8354_v44 = vld [vmem:[%s9503_s14 + $0x96c] ss:$120 sps:$4 sm:$0xff]   ;;  %v8357_v0 = vld [vmem:[%s9503_s14 + $0x968] ss:$120 sps:$4 sm:$0xff]  }
 0x3c1   : > { %6017 = vmatprep.subr.bf16.mxu1 %v8294_v33  ;;  %6002 = vmatprep.mubr.bf16.mxu0 %v11503_v55  ;;  %v8356_v40 = vld [vmem:[%s9503_s14 + $0x960] ss:$120 sps:$4 sm:$0xff]   ;;  %v8358_v49 = vld [vmem:[%s9503_s14 + $0x874] ss:$120 sps:$4 sm:$0xff]   ;;  %v8362_v45 = vld [vmem:[%s9503_s14 + $0x870] ss:$120 sps:$4 sm:$0xff]  }
 0x3c2   : > { %6043 = vmatprep.mubr.bf16.mxu1 %v11511_v24  ;;  %v8360_v10 = vld [vmem:[%s9503_s14 + $0x87c] ss:$120 sps:$4 sm:$0xff]   ;;  %v8363_v12 = vld [vmem:[%s9503_s14 + $0x878] ss:$120 sps:$4 sm:$0xff]   ;;  %v8366_v50 = vld [vmem:[%s9503_s14 + $0x78c] ss:$120 sps:$4 sm:$0xff]  }
 0x3c3   : > { %v8364_v59 = vld [vmem:[%s9503_s14 + $0x784] ss:$120 sps:$4 sm:$0xff]   ;;  %v8368_v8 = vld [vmem:[%s9503_s14 + $0x780] ss:$120 sps:$4 sm:$0xff]   ;;  %v8377_v18 = vld [vmem:[%s9503_s14 + $0x5b0] ss:$120 sps:$4 sm:$0xff]  }
 0x3c4   : > { %v8369_v33 = vld [vmem:[%s9503_s14 + $0x788] ss:$120 sps:$4 sm:$0xff]   ;;  %v8385_v63 = vld [vmem:[%s9503_s14 + $0x4c4] ss:$120 sps:$4 sm:$0xff]   ;;  %v8391_v26 = vld [vmem:[%s9503_s14 + $0x3d4] ss:$120 sps:$4 sm:$0xff]  }
 0x3c5   : > { %v8371_v19 = vld [vmem:[%s9503_s14 + $0x6a0] ss:$120 sps:$4 sm:$0xff]   ;;  %v8388_v17 = vld [vmem:[%s9503_s14 + $0x4cc] ss:$120 sps:$4 sm:$0xff]   ;;  %vm7208_vm15 = vmor %vm7207_vm12, %vm7206_vm3 }
 0x3c6   : > { %v8374_v61 = vld [vmem:[%s9503_s14 + $0x6a8] ss:$120 sps:$4 sm:$0xff]   ;;  %vm7210_vm0 = vmor %vm7209_vm7, %vm7208_vm15 }
 0x3c7   : > { %5977 = vmatpush1.bf16.xpose.msra.mxu0 %v8296_v37  ;;  %v8373_v37 = vld [vmem:[%s9503_s14 + $0x6a4] ss:$120 sps:$4 sm:$0xff]  }
 0x3c8   : > { %6018 = vmatpush1.bf16.xpose.msra.mxu1 %v8297_v25  ;;  %5978 = vmatprep.subr.bf16.mxu0 %v8298_v39  ;;  %v8376_v25 = vld [vmem:[%s9503_s14 + $0x6ac] ss:$120 sps:$4 sm:$0xff]   ;;  %v2587_v39 = vld [vmem:[%s11491_s19 + $0x8] sm:$0xff] }
 0x3c9   : > { %6019 = vmatprep.subr.bf16.mxu1 %v8300_v62  ;;  %v2619_v62 = vcombine.high %v2587_v39, %v2587_v39 }
 0x3cf   : > { %5979 = vmatpush1.bf16.xpose.msra.mxu0 %v8302_v22  ;;  %v11552_v22 = vrot.slane %v2587_v39, %v11487_v14  ;;  %v8451_v39 = vld [vmem:[%s9503_s14 + $0x974] ss:$120 sps:$4 sm:$0xff]  }
 0x3d0   : > { %6020 = vmatpush1.bf16.xpose.msra.mxu1 %v8303_v30  ;;  %5980 = vmatprep.subr.bf16.mxu0 %v8304_v11  ;;  %v11555_v30 = vrot.slane %v2619_v62, %v11487_v14  ;;  %v11563_v11 = vpack.c.bf16 %v11495_v48, %v11495_v48  ;;  %v8380_v48 = vld [vmem:[%s9503_s14 + $0x5b8] ss:$120 sps:$4 sm:$0xff]   ;;  %v8454_v62 = vld [vmem:[%s9503_s14 + $0x97c] ss:$120 sps:$4 sm:$0xff]  }
 0x3d1   : > { %6021 = vmatprep.subr.bf16.mxu1 %v8306_v53  ;;  %v2634_v29 = vcombine.high %v11552_v22, %v11552_v22  ;;  %v11567_v53 = vpack.c.bf16 %v11500_v27, %v11500_v27  ;;  %v8383_v27 = vld [vmem:[%s9503_s14 + $0x4c0] ss:$120 sps:$4 sm:$0xff]  }
 0x3d2   : > { %v2635_v23 = vcombine.high %v11555_v30, %v11555_v30 }
 0x3d7   : > { %5981 = vmatpush1.bf16.xpose.msra.mxu0 %v8308_v36  ;;  %v8379_v36 = vld [vmem:[%s9503_s14 + $0x5b4] ss:$120 sps:$4 sm:$0xff]  }
 0x3d8   : > { %6022 = vmatpush1.bf16.xpose.msra.mxu1 %v8309_v54  ;;  %5982 = vmatprep.subr.bf16.mxu0 %v8310_v9  ;;  %v8382_v54 = vld [vmem:[%s9503_s14 + $0x5bc] ss:$120 sps:$4 sm:$0xff]   ;;  %v11573_v9 = vpack.c.bf16 %v2634_v29, %v2634_v29 }
 0x3d9   : > { %6023 = vmatprep.subr.bf16.mxu1 %v8312_v60  ;;  %v11575_v60 = vpack.c.bf16 %v2635_v23, %v2635_v23  ;;  %v8457_v29 = vld [vmem:[%s9503_s14 + $0x884] ss:$120 sps:$4 sm:$0xff]  }
 0x3da   : > { %v8460_v23 = vld [vmem:[%s9503_s14 + $0x88c] ss:$120 sps:$4 sm:$0xff]  }
 0x3df   : > { %5983 = vmatpush1.bf16.xpose.msra.mxu0 %v8314_v20  ;;  %v8386_v20 = vld [vmem:[%s9503_s14 + $0x4c8] ss:$120 sps:$4 sm:$0xff]  }
 0x3e0   : > { %6024 = vmatpush1.bf16.xpose.msra.mxu1 %v8315_v52  ;;  %5984 = vmatprep.subr.bf16.mxu0 %v8316_v42  ;;  %v8394_v52 = vld [vmem:[%s9503_s14 + $0x3dc] ss:$120 sps:$4 sm:$0xff]   ;;  %v8389_v42 = vld [vmem:[%s9503_s14 + $0x3d0] ss:$120 sps:$4 sm:$0xff]  }
 0x3e1   : > { %6025 = vmatprep.subr.bf16.mxu1 %v8318_v16  ;;  %v8392_v16 = vld [vmem:[%s9503_s14 + $0x3d8] ss:$120 sps:$4 sm:$0xff]  }
 0x3e7   : > { %5985 = vmatpush1.bf16.xpose.msra.mxu0 %v8320_v35  ;;  %v8397_v35 = vld [vmem:[%s9503_s14 + $0x2e4] ss:$120 sps:$4 sm:$0xff]  }
 0x3e8   : > { %6026 = vmatpush1.bf16.xpose.msra.mxu1 %v8321_v21  ;;  %5986 = vmatprep.subr.bf16.mxu0 %v8322_v7  ;;  %v8400_v21 = vld [vmem:[%s9503_s14 + $0x2ec] ss:$120 sps:$4 sm:$0xff]   ;;  %v8395_v7 = vld [vmem:[%s9503_s14 + $0x2e0] ss:$120 sps:$4 sm:$0xff]  }
 0x3e9   : > { %6027 = vmatprep.subr.bf16.mxu1 %v8324_v13  ;;  %v8398_v13 = vld [vmem:[%s9503_s14 + $0x2e8] ss:$120 sps:$4 sm:$0xff]  }
 0x3ef   : > { %5987 = vmatpush2.bf16.xpose.msra.mxu0 %v8326_v56  ;;  %v8403_v56 = vld [vmem:[%s9503_s14 + $0x1f4] ss:$120 sps:$4 sm:$0xff]  }
 0x3f0   : > { %6028 = vmatpush2.bf16.xpose.msra.mxu1 %v8327_v57  ;;  %5988 = vmatprep.subr.bf16.mxu0 %v8328_v43  ;;  %v8406_v57 = vld [vmem:[%s9503_s14 + $0x1fc] ss:$120 sps:$4 sm:$0xff]   ;;  %v8401_v43 = vld [vmem:[%s9503_s14 + $0x1f0] ss:$120 sps:$4 sm:$0xff]  }
 0x3f1   : > { %6029 = vmatprep.subr.bf16.mxu1 %v8330_v1  ;;  %v8404_v1 = vld [vmem:[%s9503_s14 + $0x1f8] ss:$120 sps:$4 sm:$0xff]  }
 0x3f7   : > { %5989 = vmatpush2.bf16.xpose.msra.mxu0 %v8332_v46  ;;  %v8409_v46 = vld [vmem:[%s9503_s14 + $0x104] ss:$120 sps:$4 sm:$0xff]  }
 0x3f8   : > { %6030 = vmatpush2.bf16.xpose.msra.mxu1 %v8333_v5  ;;  %5990 = vmatprep.subr.bf16.mxu0 %v8334_v3  ;;  %v8412_v5 = vld [vmem:[%s9503_s14 + $0x10c] ss:$120 sps:$4 sm:$0xff]   ;;  %v8407_v3 = vld [vmem:[%s9503_s14 + $0x100] ss:$120 sps:$4 sm:$0xff]  }
 0x3f9   : > { %6031 = vmatprep.subr.bf16.mxu1 %v8336_v58  ;;  %v8410_v58 = vld [vmem:[%s9503_s14 + $0x108] ss:$120 sps:$4 sm:$0xff]  }
 0x3ff   : > { %5991 = vmatpush2.bf16.xpose.msra.mxu0 %v8338_v34  ;;  %v8415_v34 = vld [vmem:[%s9503_s14 + $0x14] ss:$120 sps:$4 sm:$0xff]  }
 0x400   : > { %6032 = vmatpush2.bf16.xpose.msra.mxu1 %v8339_v31  ;;  %5992 = vmatprep.subr.bf16.mxu0 %v8340_v41  ;;  %v8418_v31 = vld [vmem:[%s9503_s14 + $0x1c] ss:$120 sps:$4 sm:$0xff]   ;;  %v8413_v41 = vld [vmem:[%s9503_s14 + $0x10] ss:$120 sps:$4 sm:$0xff]  }
 0x401   : > { %6033 = vmatprep.subr.bf16.mxu1 %v8342_v28  ;;  %v8416_v28 = vld [vmem:[%s9503_s14 + $0x18] ss:$120 sps:$4 sm:$0xff]  }
 0x407   : > { %5993 = vmatpush2.bf16.xpose.msra.mxu0 %v8344_v2  ;;  %v8421_v2 = vld [vmem:[%s9503_s14 + $0xe24] ss:$120 sps:$4 sm:$0xff]  }
 0x408   : > { %6034 = vmatpush2.bf16.xpose.msra.mxu1 %v8345_v51  ;;  %5994 = vmatprep.subr.bf16.mxu0 %v8346_v15  ;;  %v8424_v51 = vld [vmem:[%s9503_s14 + $0xe2c] ss:$120 sps:$4 sm:$0xff]   ;;  %v8419_v15 = vld [vmem:[%s9503_s14 + $0xe20] ss:$120 sps:$4 sm:$0xff]  }
 0x409   : > { %6035 = vmatprep.subr.bf16.mxu1 %v8348_v4  ;;  %v8422_v4 = vld [vmem:[%s9503_s14 + $0xe28] ss:$120 sps:$4 sm:$0xff]  }
 0x40f   : > { %5995 = vmatpush2.bf16.xpose.msra.mxu0 %v8350_v38  ;;  %v8427_v38 = vld [vmem:[%s9503_s14 + $0xd34] ss:$120 sps:$4 sm:$0xff]  }
 0x410   : > { %6036 = vmatpush2.bf16.xpose.msra.mxu1 %v8351_v47  ;;  %5996 = vmatprep.subr.bf16.mxu0 %v8352_v6  ;;  %v8430_v47 = vld [vmem:[%s9503_s14 + $0xd3c] ss:$120 sps:$4 sm:$0xff]   ;;  %v8425_v6 = vld [vmem:[%s9503_s14 + $0xd30] ss:$120 sps:$4 sm:$0xff]  }
 0x411   : > { %6037 = vmatprep.subr.bf16.mxu1 %v8354_v44  ;;  %v8428_v44 = vld [vmem:[%s9503_s14 + $0xd38] ss:$120 sps:$4 sm:$0xff]  }
 0x417   : > { %5997 = vmatpush2.bf16.xpose.msra.mxu0 %v8356_v40  ;;  %v8433_v40 = vld [vmem:[%s9503_s14 + $0xc44] ss:$120 sps:$4 sm:$0xff]  }
 0x418   : > { %6038 = vmatpush2.bf16.xpose.msra.mxu1 %v8357_v0  ;;  %5998 = vmatprep.subr.bf16.mxu0 %v8358_v49  ;;  %v8436_v0 = vld [vmem:[%s9503_s14 + $0xc4c] ss:$120 sps:$4 sm:$0xff]   ;;  %v8431_v49 = vld [vmem:[%s9503_s14 + $0xc40] ss:$120 sps:$4 sm:$0xff]  }
 0x419   : > { %6039 = vmatprep.subr.bf16.mxu1 %v8360_v10  ;;  %v8434_v10 = vld [vmem:[%s9503_s14 + $0xc48] ss:$120 sps:$4 sm:$0xff]  }
 0x41f   : > { %5999 = vmatpush2.bf16.xpose.msra.mxu0 %v8362_v45  ;;  %v8439_v45 = vld [vmem:[%s9503_s14 + $0xb54] ss:$120 sps:$4 sm:$0xff]  }
 0x420   : > { %6040 = vmatpush2.bf16.xpose.msra.mxu1 %v8363_v12  ;;  %6000 = vmatprep.subr.bf16.mxu0 %v8364_v59  ;;  %v8442_v12 = vld [vmem:[%s9503_s14 + $0xb5c] ss:$120 sps:$4 sm:$0xff]   ;;  %v8437_v59 = vld [vmem:[%s9503_s14 + $0xb50] ss:$120 sps:$4 sm:$0xff]  }
 0x421   : > { %6041 = vmatprep.subr.bf16.mxu1 %v8366_v50  ;;  %v8440_v50 = vld [vmem:[%s9503_s14 + $0xb58] ss:$120 sps:$4 sm:$0xff]  }
 0x427   : > { %6001 = vmatpush2.bf16.xpose.msra.mxu0 %v8368_v8  ;;  %v8445_v8 = vld [vmem:[%s9503_s14 + $0xa64] ss:$120 sps:$4 sm:$0xff]  }
 0x428   : > { %6042 = vmatpush2.bf16.xpose.msra.mxu1 %v8369_v33  ;;  %6052 = vmatprep.subr.bf16.mxu0 %v8373_v37  ;;  %v8448_v33 = vld [vmem:[%s9503_s14 + $0xa6c] ss:$120 sps:$4 sm:$0xff]   ;;  %v8443_v37 = vld [vmem:[%s9503_s14 + $0xa60] ss:$120 sps:$4 sm:$0xff]  }
 0x429   : > { %6093 = vmatprep.subr.bf16.mxu1 %v8376_v25  ;;  %v8446_v25 = vld [vmem:[%s9503_s14 + $0xa68] ss:$120 sps:$4 sm:$0xff]  }
 0x42e   : > { %6003 = vmatmul.mubr.bf16.vlgmr.msra.gmra.mxu0 %v11563_v11 }
 0x42f   : > { %6044 = vmatmul.mubr.bf16.vlgmr.msra.gmra.mxu1 %v11567_v53  ;;  %6053 = vmatpush1.bf16.xpose.msra.mxu0 %v8371_v19  ;;  %v8449_v19 = vld [vmem:[%s9503_s14 + $0x970] ss:$120 sps:$4 sm:$0xff]  }
 0x430   : > { %6094 = vmatpush1.bf16.xpose.msra.mxu1 %v8374_v61  ;;  %6054 = vmatprep.subr.bf16.mxu0 %v8379_v36  ;;  %v8452_v61 = vld [vmem:[%s9503_s14 + $0x978] ss:$120 sps:$4 sm:$0xff]  }
 0x431   : > { %6095 = vmatprep.subr.bf16.mxu1 %v8382_v54  ;;  %6084 = vmatprep.mubr.bf16.mxu0 %v11573_v9  ;;  %v8455_v36 = vld [vmem:[%s9503_s14 + $0x880] ss:$120 sps:$4 sm:$0xff]  }
 0x432   : > { %6125 = vmatprep.mubr.bf16.mxu1 %v11575_v60  ;;  %v8458_v54 = vld [vmem:[%s9503_s14 + $0x888] ss:$120 sps:$4 sm:$0xff]  }
 0x437   : > { %6055 = vmatpush1.bf16.xpose.msra.mxu0 %v8377_v18  ;;  %v8463_v18 = vld [vmem:[%s9503_s14 + $0x794] ss:$120 sps:$4 sm:$0xff]  }
 0x438   : > { %6096 = vmatpush1.bf16.xpose.msra.mxu1 %v8380_v48  ;;  %6056 = vmatprep.subr.bf16.mxu0 %v8385_v63  ;;  %v8466_v48 = vld [vmem:[%s9503_s14 + $0x79c] ss:$120 sps:$4 sm:$0xff]   ;;  %v8461_v63 = vld [vmem:[%s9503_s14 + $0x790] ss:$120 sps:$4 sm:$0xff]  }
 0x439   : > { %6097 = vmatprep.subr.bf16.mxu1 %v8388_v17  ;;  %v8464_v17 = vld [vmem:[%s9503_s14 + $0x798] ss:$120 sps:$4 sm:$0xff]  }
 0x43f   : > { %6057 = vmatpush1.bf16.xpose.msra.mxu0 %v8383_v27  ;;  %v8470_v27 = vld [vmem:[%s9503_s14 + $0x6b4] ss:$120 sps:$4 sm:$0xff]  }
 0x440   : > { %6098 = vmatpush1.bf16.xpose.msra.mxu1 %v8386_v20  ;;  %6058 = vmatprep.subr.bf16.mxu0 %v8391_v26  ;;  %v8473_v20 = vld [vmem:[%s9503_s14 + $0x6bc] ss:$120 sps:$4 sm:$0xff]  }
 0x441   : > { %6099 = vmatprep.subr.bf16.mxu1 %v8394_v52  ;;  %v2588_v26 = vld [vmem:[%s11491_s19 + $0x10] sm:$0xff] }
 0x442   : > { %v2636_v52 = vcombine.high %v2588_v26, %v2588_v26 }
 0x447   : > { %6059 = vmatpush1.bf16.xpose.msra.mxu0 %v8389_v42  ;;  %v11643_v42 = vrot.slane %v2588_v26, %v11487_v14 }
 0x448   : > { %6100 = vmatpush1.bf16.xpose.msra.mxu1 %v8392_v16  ;;  %6060 = vmatprep.subr.bf16.mxu0 %v8397_v35  ;;  %v11646_v16 = vrot.slane %v2636_v52, %v11487_v14 }
 0x449   : > { %6101 = vmatprep.subr.bf16.mxu1 %v8400_v21  ;;  %v2651_v35 = vcombine.high %v11643_v42, %v11643_v42  ;;  %v11652_v21 = vpack.c.bf16 %v11552_v22, %v11552_v22  ;;  %v8474_v22 = vld [vmem:[%s9503_s14 + $0x5c0] ss:$120 sps:$4 sm:$0xff]  }
 0x44f   : > { %6061 = vmatpush1.bf16.xpose.msra.mxu0 %v8395_v7  ;;  %v11656_v7 = vpack.c.bf16 %v11555_v30, %v11555_v30  ;;  %v8477_v30 = vld [vmem:[%s9503_s14 + $0x5c8] ss:$120 sps:$4 sm:$0xff]  }
 0x450   : > { %6102 = vmatpush1.bf16.xpose.msra.mxu1 %v8398_v13  ;;  %6062 = vmatprep.subr.bf16.mxu0 %v8403_v56  ;;  %v2652_v13 = vcombine.high %v11646_v16, %v11646_v16  ;;  %v8468_v56 = vld [vmem:[%s9503_s14 + $0x6b0] ss:$120 sps:$4 sm:$0xff]  }
 0x451   : > { %6103 = vmatprep.subr.bf16.mxu1 %v8406_v57  ;;  %v8471_v57 = vld [vmem:[%s9503_s14 + $0x6b8] ss:$120 sps:$4 sm:$0xff]  }
 0x457   : > { %6063 = vmatpush1.bf16.xpose.msra.mxu0 %v8401_v43  ;;  %v8476_v43 = vld [vmem:[%s9503_s14 + $0x5c4] ss:$120 sps:$4 sm:$0xff]  }
 0x458   : > { %6104 = vmatpush1.bf16.xpose.msra.mxu1 %v8404_v1  ;;  %6064 = vmatprep.subr.bf16.mxu0 %v8409_v46  ;;  %v8479_v1 = vld [vmem:[%s9503_s14 + $0x5cc] ss:$120 sps:$4 sm:$0xff]   ;;  %v11664_v46 = vpack.c.bf16 %v2651_v35, %v2651_v35 }
 0x459   : > { %6105 = vmatprep.subr.bf16.mxu1 %v8412_v5  ;;  %v11666_v5 = vpack.c.bf16 %v2652_v13, %v2652_v13  ;;  %v8530_v35 = vld [vmem:[%s9503_s14 + $0xc54] ss:$120 sps:$4 sm:$0xff]  }
 0x45a   : > { %v8533_v13 = vld [vmem:[%s9503_s14 + $0xc5c] ss:$120 sps:$4 sm:$0xff]  }
 0x45f   : > { %6065 = vmatpush1.bf16.xpose.msra.mxu0 %v8407_v3  ;;  %v8482_v3 = vld [vmem:[%s9503_s14 + $0x4d4] ss:$120 sps:$4 sm:$0xff]  }
 0x460   : > { %6106 = vmatpush1.bf16.xpose.msra.mxu1 %v8410_v58  ;;  %6066 = vmatprep.subr.bf16.mxu0 %v8415_v34  ;;  %v8485_v58 = vld [vmem:[%s9503_s14 + $0x4dc] ss:$120 sps:$4 sm:$0xff]   ;;  %v8480_v34 = vld [vmem:[%s9503_s14 + $0x4d0] ss:$120 sps:$4 sm:$0xff]  }
 0x461   : > { %6107 = vmatprep.subr.bf16.mxu1 %v8418_v31  ;;  %v8483_v31 = vld [vmem:[%s9503_s14 + $0x4d8] ss:$120 sps:$4 sm:$0xff]  }
 0x467   : > { %6067 = vmatpush1.bf16.xpose.msra.mxu0 %v8413_v41  ;;  %v8488_v41 = vld [vmem:[%s9503_s14 + $0x3e4] ss:$120 sps:$4 sm:$0xff]  }
 0x468   : > { %6108 = vmatpush1.bf16.xpose.msra.mxu1 %v8416_v28  ;;  %6068 = vmatprep.subr.bf16.mxu0 %v8421_v2  ;;  %v8491_v28 = vld [vmem:[%s9503_s14 + $0x3ec] ss:$120 sps:$4 sm:$0xff]   ;;  %v8486_v2 = vld [vmem:[%s9503_s14 + $0x3e0] ss:$120 sps:$4 sm:$0xff]  }
 0x469   : > { %6109 = vmatprep.subr.bf16.mxu1 %v8424_v51  ;;  %v8489_v51 = vld [vmem:[%s9503_s14 + $0x3e8] ss:$120 sps:$4 sm:$0xff]  }
 0x46f   : > { %6069 = vmatpush2.bf16.xpose.msra.mxu0 %v8419_v15  ;;  %v8494_v15 = vld [vmem:[%s9503_s14 + $0x2f4] ss:$120 sps:$4 sm:$0xff]  }
 0x470   : > { %6110 = vmatpush2.bf16.xpose.msra.mxu1 %v8422_v4  ;;  %6070 = vmatprep.subr.bf16.mxu0 %v8427_v38  ;;  %v8497_v4 = vld [vmem:[%s9503_s14 + $0x2fc] ss:$120 sps:$4 sm:$0xff]   ;;  %v8492_v38 = vld [vmem:[%s9503_s14 + $0x2f0] ss:$120 sps:$4 sm:$0xff]  }
 0x471   : > { %6111 = vmatprep.subr.bf16.mxu1 %v8430_v47  ;;  %v8495_v47 = vld [vmem:[%s9503_s14 + $0x2f8] ss:$120 sps:$4 sm:$0xff]  }
 0x477   : > { %6071 = vmatpush2.bf16.xpose.msra.mxu0 %v8425_v6  ;;  %v8500_v6 = vld [vmem:[%s9503_s14 + $0x204] ss:$120 sps:$4 sm:$0xff]  }
 0x478   : > { %6112 = vmatpush2.bf16.xpose.msra.mxu1 %v8428_v44  ;;  %6072 = vmatprep.subr.bf16.mxu0 %v8433_v40  ;;  %v8503_v44 = vld [vmem:[%s9503_s14 + $0x20c] ss:$120 sps:$4 sm:$0xff]   ;;  %v8498_v40 = vld [vmem:[%s9503_s14 + $0x200] ss:$120 sps:$4 sm:$0xff]  }
 0x479   : > { %6113 = vmatprep.subr.bf16.mxu1 %v8436_v0  ;;  %v8501_v0 = vld [vmem:[%s9503_s14 + $0x208] ss:$120 sps:$4 sm:$0xff]  }
 0x47f   : > { %6073 = vmatpush2.bf16.xpose.msra.mxu0 %v8431_v49  ;;  %v8506_v49 = vld [vmem:[%s9503_s14 + $0x114] ss:$120 sps:$4 sm:$0xff]  }
 0x480   : > { %6114 = vmatpush2.bf16.xpose.msra.mxu1 %v8434_v10  ;;  %6074 = vmatprep.subr.bf16.mxu0 %v8439_v45  ;;  %v8509_v10 = vld [vmem:[%s9503_s14 + $0x11c] ss:$120 sps:$4 sm:$0xff]   ;;  %v8504_v45 = vld [vmem:[%s9503_s14 + $0x110] ss:$120 sps:$4 sm:$0xff]  }
 0x481   : > { %6115 = vmatprep.subr.bf16.mxu1 %v8442_v12  ;;  %v8507_v12 = vld [vmem:[%s9503_s14 + $0x118] ss:$120 sps:$4 sm:$0xff]  }
 0x487   : > { %6075 = vmatpush2.bf16.xpose.msra.mxu0 %v8437_v59  ;;  %v8512_v59 = vld [vmem:[%s9503_s14 + $0x24] ss:$120 sps:$4 sm:$0xff]  }
 0x488   : > { %6116 = vmatpush2.bf16.xpose.msra.mxu1 %v8440_v50  ;;  %6076 = vmatprep.subr.bf16.mxu0 %v8445_v8  ;;  %v8515_v50 = vld [vmem:[%s9503_s14 + $0x2c] ss:$120 sps:$4 sm:$0xff]   ;;  %v8510_v8 = vld [vmem:[%s9503_s14 + $0x20] ss:$120 sps:$4 sm:$0xff]  }
 0x489   : > { %6117 = vmatprep.subr.bf16.mxu1 %v8448_v33  ;;  %v8513_v33 = vld [vmem:[%s9503_s14 + $0x28] ss:$120 sps:$4 sm:$0xff]  }
 0x48f   : > { %6077 = vmatpush2.bf16.xpose.msra.mxu0 %v8443_v37  ;;  %v8518_v37 = vld [vmem:[%s9503_s14 + $0xe34] ss:$120 sps:$4 sm:$0xff]  }
 0x490   : > { %6118 = vmatpush2.bf16.xpose.msra.mxu1 %v8446_v25  ;;  %6078 = vmatprep.subr.bf16.mxu0 %v8451_v39  ;;  %v8521_v25 = vld [vmem:[%s9503_s14 + $0xe3c] ss:$120 sps:$4 sm:$0xff]   ;;  %v8516_v39 = vld [vmem:[%s9503_s14 + $0xe30] ss:$120 sps:$4 sm:$0xff]  }
 0x491   : > { %6119 = vmatprep.subr.bf16.mxu1 %v8454_v62  ;;  %v8519_v62 = vld [vmem:[%s9503_s14 + $0xe38] ss:$120 sps:$4 sm:$0xff]  }
 0x497   : > { %6079 = vmatpush2.bf16.xpose.msra.mxu0 %v8449_v19  ;;  %v8524_v19 = vld [vmem:[%s9503_s14 + $0xd44] ss:$120 sps:$4 sm:$0xff]  }
 0x498   : > { %6120 = vmatpush2.bf16.xpose.msra.mxu1 %v8452_v61  ;;  %6080 = vmatprep.subr.bf16.mxu0 %v8457_v29  ;;  %v8527_v61 = vld [vmem:[%s9503_s14 + $0xd4c] ss:$120 sps:$4 sm:$0xff]  }
 0x499   : > { %6121 = vmatprep.subr.bf16.mxu1 %v8460_v23 }
 0x49f   : > { %6081 = vmatpush2.bf16.xpose.msra.mxu0 %v8455_v36 }
 0x4a0   : > { %6122 = vmatpush2.bf16.xpose.msra.mxu1 %v8458_v54  ;;  %6082 = vmatprep.subr.bf16.mxu0 %v8463_v18 }
 0x4a1   : > { %6123 = vmatprep.subr.bf16.mxu1 %v8466_v48 }
 0x4a7   : > { %6083 = vmatpush2.bf16.xpose.msra.mxu0 %v8461_v63 }
 0x4a8   : > { %6124 = vmatpush2.bf16.xpose.msra.mxu1 %v8464_v17  ;;  %6134 = vmatprep.subr.bf16.mxu0 %v8470_v27  ;;  %v8522_v27 = vld [vmem:[%s9503_s14 + $0xd40] ss:$120 sps:$4 sm:$0xff]  }
 0x4a9   : > { %6175 = vmatprep.subr.bf16.mxu1 %v8473_v20  ;;  %v8525_v20 = vld [vmem:[%s9503_s14 + $0xd48] ss:$120 sps:$4 sm:$0xff]  }
 0x4ae   : > { %6085 = vmatmul.mubr.bf16.vlgmr.msra.gmra.mxu0 %v11652_v21 }
 0x4af   : > { %6126 = vmatmul.mubr.bf16.vlgmr.msra.gmra.mxu1 %v11656_v7  ;;  %6135 = vmatpush1.bf16.xpose.msra.mxu0 %v8468_v56  ;;  %v8528_v56 = vld [vmem:[%s9503_s14 + $0xc50] ss:$120 sps:$4 sm:$0xff]  }
 0x4b0   : > { %6176 = vmatpush1.bf16.xpose.msra.mxu1 %v8471_v57  ;;  %6136 = vmatprep.subr.bf16.mxu0 %v8476_v43  ;;  %v8531_v57 = vld [vmem:[%s9503_s14 + $0xc58] ss:$120 sps:$4 sm:$0xff]   ;;  %v8536_v43 = vld [vmem:[%s9503_s14 + $0xb64] ss:$120 sps:$4 sm:$0xff]  }
 0x4b1   : > { %6177 = vmatprep.subr.bf16.mxu1 %v8479_v1  ;;  %6166 = vmatprep.mubr.bf16.mxu0 %v11664_v46  ;;  %v8539_v1 = vld [vmem:[%s9503_s14 + $0xb6c] ss:$120 sps:$4 sm:$0xff]  }
 0x4b2   : > { %6207 = vmatprep.mubr.bf16.mxu1 %v11666_v5 }
 0x4b7   : > { %6137 = vmatpush1.bf16.xpose.msra.mxu0 %v8474_v22  ;;  %v8534_v22 = vld [vmem:[%s9503_s14 + $0xb60] ss:$120 sps:$4 sm:$0xff]  }
 0x4b8   : > { %6178 = vmatpush1.bf16.xpose.msra.mxu1 %v8477_v30  ;;  %6138 = vmatprep.subr.bf16.mxu0 %v8482_v3  ;;  %v8537_v30 = vld [vmem:[%s9503_s14 + $0xb68] ss:$120 sps:$4 sm:$0xff]   ;;  %v8542_v3 = vld [vmem:[%s9503_s14 + $0xa74] ss:$120 sps:$4 sm:$0xff]  }
 0x4b9   : > { %6179 = vmatprep.subr.bf16.mxu1 %v8485_v58  ;;  %v8545_v58 = vld [vmem:[%s9503_s14 + $0xa7c] ss:$120 sps:$4 sm:$0xff]  }
 0x4bf   : > { %6139 = vmatpush1.bf16.xpose.msra.mxu0 %v8480_v34  ;;  %v8540_v34 = vld [vmem:[%s9503_s14 + $0xa70] ss:$120 sps:$4 sm:$0xff]  }
 0x4c0   : > { %6180 = vmatpush1.bf16.xpose.msra.mxu1 %v8483_v31  ;;  %6140 = vmatprep.subr.bf16.mxu0 %v8488_v41  ;;  %v8543_v31 = vld [vmem:[%s9503_s14 + $0xa78] ss:$120 sps:$4 sm:$0xff]   ;;  %v8548_v41 = vld [vmem:[%s9503_s14 + $0x984] ss:$120 sps:$4 sm:$0xff]  }
 0x4c1   : > { %6181 = vmatprep.subr.bf16.mxu1 %v8491_v28  ;;  %v8551_v28 = vld [vmem:[%s9503_s14 + $0x98c] ss:$120 sps:$4 sm:$0xff]  }
 0x4c7   : > { %6141 = vmatpush1.bf16.xpose.msra.mxu0 %v8486_v2  ;;  %v8546_v2 = vld [vmem:[%s9503_s14 + $0x980] ss:$120 sps:$4 sm:$0xff]  }
 0x4c8   : > { %6182 = vmatpush1.bf16.xpose.msra.mxu1 %v8489_v51  ;;  %6142 = vmatprep.subr.bf16.mxu0 %v8494_v15  ;;  %v8549_v51 = vld [vmem:[%s9503_s14 + $0x988] ss:$120 sps:$4 sm:$0xff]   ;;  %v8554_v15 = vld [vmem:[%s9503_s14 + $0x894] ss:$120 sps:$4 sm:$0xff]  }
 0x4c9   : > { %6183 = vmatprep.subr.bf16.mxu1 %v8497_v4  ;;  %v8557_v4 = vld [vmem:[%s9503_s14 + $0x89c] ss:$120 sps:$4 sm:$0xff]  }
 0x4cf   : > { %6143 = vmatpush1.bf16.xpose.msra.mxu0 %v8492_v38  ;;  %v8552_v38 = vld [vmem:[%s9503_s14 + $0x890] ss:$120 sps:$4 sm:$0xff]  }
 0x4d0   : > { %6184 = vmatpush1.bf16.xpose.msra.mxu1 %v8495_v47  ;;  %6144 = vmatprep.subr.bf16.mxu0 %v8500_v6  ;;  %v8555_v47 = vld [vmem:[%s9503_s14 + $0x898] ss:$120 sps:$4 sm:$0xff]   ;;  %v8560_v6 = vld [vmem:[%s9503_s14 + $0x7a4] ss:$120 sps:$4 sm:$0xff]  }
 0x4d1   : > { %6185 = vmatprep.subr.bf16.mxu1 %v8503_v44  ;;  %v8563_v44 = vld [vmem:[%s9503_s14 + $0x7ac] ss:$120 sps:$4 sm:$0xff]  }
 0x4d7   : > { %6145 = vmatpush1.bf16.xpose.msra.mxu0 %v8498_v40  ;;  %v8558_v40 = vld [vmem:[%s9503_s14 + $0x7a0] ss:$120 sps:$4 sm:$0xff]  }
 0x4d8   : > { %6186 = vmatpush1.bf16.xpose.msra.mxu1 %v8501_v0  ;;  %6146 = vmatprep.subr.bf16.mxu0 %v8506_v49  ;;  %v8561_v0 = vld [vmem:[%s9503_s14 + $0x7a8] ss:$120 sps:$4 sm:$0xff]   ;;  %v8567_v49 = vld [vmem:[%s9503_s14 + $0x6c4] ss:$120 sps:$4 sm:$0xff]  }
 0x4d9   : > { %6187 = vmatprep.subr.bf16.mxu1 %v8509_v10  ;;  %v8570_v10 = vld [vmem:[%s9503_s14 + $0x6cc] ss:$120 sps:$4 sm:$0xff]  }
 0x4df   : > { %6147 = vmatpush1.bf16.xpose.msra.mxu0 %v8504_v45  ;;  %v2589_v45 = vld [vmem:[%s11491_s19 + $0x18] sm:$0xff] }
 0x4e0   : > { %6188 = vmatpush1.bf16.xpose.msra.mxu1 %v8507_v12  ;;  %6148 = vmatprep.subr.bf16.mxu0 %v8512_v59  ;;  %v2653_v12 = vcombine.high %v2589_v45, %v2589_v45  ;;  %v11738_v59 = vrot.slane %v2589_v45, %v11487_v14 }
 0x4e1   : > { %6189 = vmatprep.subr.bf16.mxu1 %v8515_v50 }
 0x4e2   : > { %v11741_v50 = vrot.slane %v2653_v12, %v11487_v14 }
 0x4e7   : > { %6149 = vmatpush1.bf16.xpose.msra.mxu0 %v8510_v8  ;;  %v2668_v8 = vcombine.high %v11738_v59, %v11738_v59 }
 0x4e8   : > { %6190 = vmatpush1.bf16.xpose.msra.mxu1 %v8513_v33  ;;  %6150 = vmatprep.subr.bf16.mxu0 %v8518_v37  ;;  %v11747_v33 = vpack.c.bf16 %v11643_v42, %v11643_v42  ;;  %v11751_v37 = vpack.c.bf16 %v11646_v16, %v11646_v16  ;;  %v8571_v42 = vld [vmem:[%s9503_s14 + $0x5d0] ss:$120 sps:$4 sm:$0xff]  }
 0x4e9   : > { %6191 = vmatprep.subr.bf16.mxu1 %v8521_v25  ;;  %v2669_v25 = vcombine.high %v11741_v50, %v11741_v50  ;;  %v8574_v16 = vld [vmem:[%s9503_s14 + $0x5d8] ss:$120 sps:$4 sm:$0xff]  }
 0x4ee   : > { %v6004_v29 = vpop.f32.mrf.mxu0 }
 0x4ef   : > { %v6045_v23 = vpop.f32.mrf.mxu1  ;;  %6151 = vmatpush2.bf16.xpose.msra.mxu0 %v8516_v39  ;;  %v8565_v39 = vld [vmem:[%s9503_s14 + $0x6c0] ss:$120 sps:$4 sm:$0xff]  }
 0x4f0   : > { %v11704_v36 = vadd.f32 %v6045_v23, %v6004_v29  ;;  %6192 = vmatpush2.bf16.xpose.msra.mxu1 %v8519_v62  ;;  %v6006_v54 = vpop.f32.mrf.mxu0  ;;  %6152 = vmatprep.subr.bf16.mxu0 %v8524_v19  ;;  %v8568_v62 = vld [vmem:[%s9503_s14 + $0x6c8] ss:$120 sps:$4 sm:$0xff]   ;;  %v8573_v19 = vld [vmem:[%s9503_s14 + $0x5d4] ss:$120 sps:$4 sm:$0xff]   ;;  %v11759_v29 = vpack.c.bf16 %v2668_v8, %v2668_v8  ;;  %v11761_v23 = vpack.c.bf16 %v2669_v25, %v2669_v25 }
 0x4f1   : > { %v6047_v18 = vpop.f32.mrf.mxu1  ;;  %6193 = vmatprep.subr.bf16.mxu1 %v8527_v61  ;;  %v8576_v61 = vld [vmem:[%s9503_s14 + $0x5dc] ss:$120 sps:$4 sm:$0xff]  }
 0x4f2   : > { %v11706_v48 = vadd.f32 %v6047_v18, %v6006_v54  ;;  %v6008_v63 = vpop.f32.mrf.mxu0  ;;  %v8579_v54 = vld [vmem:[%s9503_s14 + $0x4e4] ss:$120 sps:$4 sm:$0xff]  }
 0x4f3   : > { %v6049_v17 = vpop.f32.mrf.mxu1  ;;  %v8582_v18 = vld [vmem:[%s9503_s14 + $0x4ec] ss:$120 sps:$4 sm:$0xff]   ;;  %v8577_v63 = vld [vmem:[%s9503_s14 + $0x4e0] ss:$120 sps:$4 sm:$0xff]  }
 0x4f4   : > { %v6009_v26 = vpop.f32.mrf.mxu0  ;;  %v8580_v17 = vld [vmem:[%s9503_s14 + $0x4e8] ss:$120 sps:$4 sm:$0xff]  }
 0x4f5   : > { %v6050_v52 = vpop.f32.mrf.mxu1  ;;  %v8583_v26 = vld [vmem:[%s9503_s14 + $0x3f0] ss:$120 sps:$4 sm:$0xff]  }
 0x4f6   : > { %v8586_v52 = vld [vmem:[%s9503_s14 + $0x3f8] ss:$120 sps:$4 sm:$0xff]  }
 0x4f7   : > { %6153 = vmatpush2.bf16.xpose.msra.mxu0 %v8522_v27  ;;  %v8585_v27 = vld [vmem:[%s9503_s14 + $0x3f4] ss:$120 sps:$4 sm:$0xff]  }
 0x4f8   : > { %6194 = vmatpush2.bf16.xpose.msra.mxu1 %v8525_v20  ;;  %6154 = vmatprep.subr.bf16.mxu0 %v8530_v35  ;;  %v8588_v20 = vld [vmem:[%s9503_s14 + $0x3fc] ss:$120 sps:$4 sm:$0xff]  }
 0x4f9   : > { %6195 = vmatprep.subr.bf16.mxu1 %v8533_v13  ;;  %v8591_v35 = vld [vmem:[%s9503_s14 + $0x304] ss:$120 sps:$4 sm:$0xff]  }
 0x4fa   : > { %v8594_v13 = vld [vmem:[%s9503_s14 + $0x30c] ss:$120 sps:$4 sm:$0xff]  }
 0x4ff   : > { %6155 = vmatpush2.bf16.xpose.msra.mxu0 %v8528_v56  ;;  %v8589_v56 = vld [vmem:[%s9503_s14 + $0x300] ss:$120 sps:$4 sm:$0xff]  }
 0x500   : > { %6196 = vmatpush2.bf16.xpose.msra.mxu1 %v8531_v57  ;;  %6156 = vmatprep.subr.bf16.mxu0 %v8536_v43  ;;  %v8592_v57 = vld [vmem:[%s9503_s14 + $0x308] ss:$120 sps:$4 sm:$0xff]   ;;  %v8597_v43 = vld [vmem:[%s9503_s14 + $0x214] ss:$120 sps:$4 sm:$0xff]  }
 0x501   : > { %6197 = vmatprep.subr.bf16.mxu1 %v8539_v1  ;;  %v8600_v1 = vld [vmem:[%s9503_s14 + $0x21c] ss:$120 sps:$4 sm:$0xff]  }
 0x507   : > { %6157 = vmatpush2.bf16.xpose.msra.mxu0 %v8534_v22  ;;  %v8595_v22 = vld [vmem:[%s9503_s14 + $0x210] ss:$120 sps:$4 sm:$0xff]  }
 0x508   : > { %6198 = vmatpush2.bf16.xpose.msra.mxu1 %v8537_v30  ;;  %6158 = vmatprep.subr.bf16.mxu0 %v8542_v3  ;;  %v8598_v30 = vld [vmem:[%s9503_s14 + $0x218] ss:$120 sps:$4 sm:$0xff]   ;;  %v8603_v3 = vld [vmem:[%s9503_s14 + $0x124] ss:$120 sps:$4 sm:$0xff]  }
 0x509   : > { %6199 = vmatprep.subr.bf16.mxu1 %v8545_v58  ;;  %v8606_v58 = vld [vmem:[%s9503_s14 + $0x12c] ss:$120 sps:$4 sm:$0xff]  }
 0x50f   : > { %6159 = vmatpush2.bf16.xpose.msra.mxu0 %v8540_v34  ;;  %v8601_v34 = vld [vmem:[%s9503_s14 + $0x120] ss:$120 sps:$4 sm:$0xff]  }
 0x510   : > { %6200 = vmatpush2.bf16.xpose.msra.mxu1 %v8543_v31  ;;  %6160 = vmatprep.subr.bf16.mxu0 %v8548_v41  ;;  %v8604_v31 = vld [vmem:[%s9503_s14 + $0x128] ss:$120 sps:$4 sm:$0xff]   ;;  %v8609_v41 = vld [vmem:[%s9503_s14 + $0x34] ss:$120 sps:$4 sm:$0xff]  }
 0x511   : > { %6201 = vmatprep.subr.bf16.mxu1 %v8551_v28  ;;  %v8612_v28 = vld [vmem:[%s9503_s14 + $0x3c] ss:$120 sps:$4 sm:$0xff]  }
 0x517   : > { %6161 = vmatpush2.bf16.xpose.msra.mxu0 %v8546_v2  ;;  %v8607_v2 = vld [vmem:[%s9503_s14 + $0x30] ss:$120 sps:$4 sm:$0xff]  }
 0x518   : > { %6202 = vmatpush2.bf16.xpose.msra.mxu1 %v8549_v51  ;;  %6162 = vmatprep.subr.bf16.mxu0 %v8554_v15  ;;  %v8610_v51 = vld [vmem:[%s9503_s14 + $0x38] ss:$120 sps:$4 sm:$0xff]   ;;  %v8615_v15 = vld [vmem:[%s9503_s14 + $0xe44] ss:$120 sps:$4 sm:$0xff]  }
 0x519   : > { %6203 = vmatprep.subr.bf16.mxu1 %v8557_v4  ;;  %v8618_v4 = vld [vmem:[%s9503_s14 + $0xe4c] ss:$120 sps:$4 sm:$0xff]  }
 0x51f   : > { %6163 = vmatpush2.bf16.xpose.msra.mxu0 %v8552_v38  ;;  %v8613_v38 = vld [vmem:[%s9503_s14 + $0xe40] ss:$120 sps:$4 sm:$0xff]  }
 0x520   : > { %6204 = vmatpush2.bf16.xpose.msra.mxu1 %v8555_v47  ;;  %6164 = vmatprep.subr.bf16.mxu0 %v8560_v6  ;;  %v8616_v47 = vld [vmem:[%s9503_s14 + $0xe48] ss:$120 sps:$4 sm:$0xff]   ;;  %v8621_v6 = vld [vmem:[%s9503_s14 + $0xd54] ss:$120 sps:$4 sm:$0xff]  }
 0x521   : > { %6205 = vmatprep.subr.bf16.mxu1 %v8563_v44  ;;  %v8624_v44 = vld [vmem:[%s9503_s14 + $0xd5c] ss:$120 sps:$4 sm:$0xff]  }
 0x527   : > { %6165 = vmatpush2.bf16.xpose.msra.mxu0 %v8558_v40 }
 0x528   : > { %6206 = vmatpush2.bf16.xpose.msra.mxu1 %v8561_v0  ;;  %6216 = vmatprep.subr.bf16.mxu0 %v8567_v49 }
 0x529   : > { %6257 = vmatprep.subr.bf16.mxu1 %v8570_v10 }
 0x52e   : > { %6167 = vmatmul.mubr.bf16.vlgmr.msra.gmra.mxu0 %v11747_v33 }
 0x52f   : > { %6208 = vmatmul.mubr.bf16.vlgmr.msra.gmra.mxu1 %v11751_v37  ;;  %6217 = vmatpush1.bf16.xpose.msra.mxu0 %v8565_v39 }
 0x530   : > { %6258 = vmatpush1.bf16.xpose.msra.mxu1 %v8568_v62  ;;  %6218 = vmatprep.subr.bf16.mxu0 %v8573_v19  ;;  %v8622_v19 = vld [vmem:[%s9503_s14 + $0xd58] ss:$120 sps:$4 sm:$0xff]  }
 0x531   : > { %6259 = vmatprep.subr.bf16.mxu1 %v8576_v61  ;;  %6248 = vmatprep.mubr.bf16.mxu0 %v11759_v29 }
 0x532   : > { %6289 = vmatprep.mubr.bf16.mxu1 %v11761_v23 }
 0x537   : > { %6219 = vmatpush1.bf16.xpose.msra.mxu0 %v8571_v42 }
 0x538   : > { %6260 = vmatpush1.bf16.xpose.msra.mxu1 %v8574_v16  ;;  %6220 = vmatprep.subr.bf16.mxu0 %v8579_v54  ;;  %v8627_v16 = vld [vmem:[%s9503_s14 + $0xc64] ss:$120 sps:$4 sm:$0xff]  }
 0x539   : > { %6261 = vmatprep.subr.bf16.mxu1 %v8582_v18  ;;  %v8630_v54 = vld [vmem:[%s9503_s14 + $0xc6c] ss:$120 sps:$4 sm:$0xff]   ;;  %v8628_v18 = vld [vmem:[%s9503_s14 + $0xc68] ss:$120 sps:$4 sm:$0xff]  }
 0x53f   : > { %6221 = vmatpush1.bf16.xpose.msra.mxu0 %v8577_v63  ;;  %v8633_v63 = vld [vmem:[%s9503_s14 + $0xb74] ss:$120 sps:$4 sm:$0xff]  }
 0x540   : > { %6262 = vmatpush1.bf16.xpose.msra.mxu1 %v8580_v17  ;;  %6222 = vmatprep.subr.bf16.mxu0 %v8585_v27  ;;  %v8636_v17 = vld [vmem:[%s9503_s14 + $0xb7c] ss:$120 sps:$4 sm:$0xff]   ;;  %v8631_v27 = vld [vmem:[%s9503_s14 + $0xb70] ss:$120 sps:$4 sm:$0xff]  }
 0x541   : > { %6263 = vmatprep.subr.bf16.mxu1 %v8588_v20  ;;  %v8634_v20 = vld [vmem:[%s9503_s14 + $0xb78] ss:$120 sps:$4 sm:$0xff]  }
 0x547   : > { %6223 = vmatpush1.bf16.xpose.msra.mxu0 %v8583_v26  ;;  %v8639_v26 = vld [vmem:[%s9503_s14 + $0xa84] ss:$120 sps:$4 sm:$0xff]  }
 0x548   : > { %6264 = vmatpush1.bf16.xpose.msra.mxu1 %v8586_v52  ;;  %6224 = vmatprep.subr.bf16.mxu0 %v8591_v35  ;;  %v8642_v52 = vld [vmem:[%s9503_s14 + $0xa8c] ss:$120 sps:$4 sm:$0xff]   ;;  %v8637_v35 = vld [vmem:[%s9503_s14 + $0xa80] ss:$120 sps:$4 sm:$0xff]  }
 0x549   : > { %6265 = vmatprep.subr.bf16.mxu1 %v8594_v13  ;;  %v8640_v13 = vld [vmem:[%s9503_s14 + $0xa88] ss:$120 sps:$4 sm:$0xff]  }
 0x54f   : > { %6225 = vmatpush1.bf16.xpose.msra.mxu0 %v8589_v56  ;;  %v8645_v56 = vld [vmem:[%s9503_s14 + $0x994] ss:$120 sps:$4 sm:$0xff]  }
 0x550   : > { %6266 = vmatpush1.bf16.xpose.msra.mxu1 %v8592_v57  ;;  %6226 = vmatprep.subr.bf16.mxu0 %v8597_v43  ;;  %v8648_v57 = vld [vmem:[%s9503_s14 + $0x99c] ss:$120 sps:$4 sm:$0xff]   ;;  %v8643_v43 = vld [vmem:[%s9503_s14 + $0x990] ss:$120 sps:$4 sm:$0xff]  }
 0x551   : > { %6267 = vmatprep.subr.bf16.mxu1 %v8600_v1  ;;  %v8646_v1 = vld [vmem:[%s9503_s14 + $0x998] ss:$120 sps:$4 sm:$0xff]  }
 0x557   : > { %6227 = vmatpush1.bf16.xpose.msra.mxu0 %v8595_v22  ;;  %v8651_v22 = vld [vmem:[%s9503_s14 + $0x8a4] ss:$120 sps:$4 sm:$0xff]  }
 0x558   : > { %6268 = vmatpush1.bf16.xpose.msra.mxu1 %v8598_v30  ;;  %6228 = vmatprep.subr.bf16.mxu0 %v8603_v3  ;;  %v8654_v30 = vld [vmem:[%s9503_s14 + $0x8ac] ss:$120 sps:$4 sm:$0xff]   ;;  %v8649_v3 = vld [vmem:[%s9503_s14 + $0x8a0] ss:$120 sps:$4 sm:$0xff]  }
 0x559   : > { %6269 = vmatprep.subr.bf16.mxu1 %v8606_v58  ;;  %v8652_v58 = vld [vmem:[%s9503_s14 + $0x8a8] ss:$120 sps:$4 sm:$0xff]  }
 0x55f   : > { %6229 = vmatpush1.bf16.xpose.msra.mxu0 %v8601_v34  ;;  %v8657_v34 = vld [vmem:[%s9503_s14 + $0x7b4] ss:$120 sps:$4 sm:$0xff]  }
 0x560   : > { %6270 = vmatpush1.bf16.xpose.msra.mxu1 %v8604_v31  ;;  %6230 = vmatprep.subr.bf16.mxu0 %v8609_v41  ;;  %v8660_v31 = vld [vmem:[%s9503_s14 + $0x7bc] ss:$120 sps:$4 sm:$0xff]   ;;  %v8655_v41 = vld [vmem:[%s9503_s14 + $0x7b0] ss:$120 sps:$4 sm:$0xff]  }
 0x561   : > { %6271 = vmatprep.subr.bf16.mxu1 %v8612_v28  ;;  %v8658_v28 = vld [vmem:[%s9503_s14 + $0x7b8] ss:$120 sps:$4 sm:$0xff]  }
 0x567   : > { %6231 = vmatpush1.bf16.xpose.msra.mxu0 %v8607_v2  ;;  %v8664_v2 = vld [vmem:[%s9503_s14 + $0x6d4] ss:$120 sps:$4 sm:$0xff]  }
 0x568   : > { %6272 = vmatpush1.bf16.xpose.msra.mxu1 %v8610_v51  ;;  %6232 = vmatprep.subr.bf16.mxu0 %v8615_v15  ;;  %v8667_v51 = vld [vmem:[%s9503_s14 + $0x6dc] ss:$120 sps:$4 sm:$0xff]  }
 0x569   : > { %6273 = vmatprep.subr.bf16.mxu1 %v8618_v4  ;;  %v2590_v15 = vld [vmem:[%s11491_s19 + $0x20] sm:$0xff] }
 0x56a   : > { %v2670_v4 = vcombine.high %v2590_v15, %v2590_v15 }
 0x56e   : > { %v6086_v40 = vpop.f32.mrf.mxu0 }
 0x56f   : > { %v6127_v0 = vpop.f32.mrf.mxu1  ;;  %v6087_v49 = vadd.f32 %v6086_v40, %v11704_v36  ;;  %6233 = vmatpush2.bf16.xpose.msra.mxu0 %v8613_v38  ;;  %v8619_v36 = vld [vmem:[%s9503_s14 + $0xd50] ss:$120 sps:$4 sm:$0xff]   ;;  %v11835_v38 = vrot.slane %v2590_v15, %v11487_v14  ;;  %v11848_v40 = vpack.c.bf16 %v11741_v50, %v11741_v50 }
 0x570   : > { %6274 = vmatpush2.bf16.xpose.msra.mxu1 %v8616_v47  ;;  %v6088_v10 = vpop.f32.mrf.mxu0  ;;  %6234 = vmatprep.subr.bf16.mxu0 %v8621_v6  ;;  %v11838_v47 = vrot.slane %v2670_v4, %v11487_v14  ;;  %v8671_v50 = vld [vmem:[%s9503_s14 + $0x5e8] ss:$120 sps:$4 sm:$0xff]  }
 0x571   : > { %v6129_v45 = vpop.f32.mrf.mxu1  ;;  %6275 = vmatprep.subr.bf16.mxu1 %v8624_v44  ;;  %v6089_v12 = vadd.f32 %v6088_v10, %v11706_v48  ;;  %v11801_v8 = vadd.f32 %v6127_v0, %v6087_v49  ;;  %v8625_v48 = vld [vmem:[%s9503_s14 + $0xc60] ss:$120 sps:$4 sm:$0xff]   ;;  %v2685_v6 = vcombine.high %v11835_v38, %v11835_v38  ;;  %v11844_v44 = vpack.c.bf16 %v11738_v59, %v11738_v59  ;;  %v8662_v49 = vld [vmem:[%s9503_s14 + $0x6d0] ss:$120 sps:$4 sm:$0xff]  }
 0x572   : > { %v6090_v25 = vpop.f32.mrf.mxu0  ;;  %v2686_v0 = vcombine.high %v11838_v47, %v11838_v47  ;;  %v8665_v10 = vld [vmem:[%s9503_s14 + $0x6d8] ss:$120 sps:$4 sm:$0xff]  }
 0x573   : > { %v6131_v39 = vpop.f32.mrf.mxu1  ;;  %v11803_v62 = vadd.f32 %v6129_v45, %v6089_v12  ;;  %v8670_v45 = vld [vmem:[%s9503_s14 + $0x5e4] ss:$120 sps:$4 sm:$0xff]   ;;  %v11856_v25 = vpack.c.bf16 %v2685_v6, %v2685_v6  ;;  %v8668_v59 = vld [vmem:[%s9503_s14 + $0x5e0] ss:$120 sps:$4 sm:$0xff]  }
 0x574   : > { %v6091_v61 = vpop.f32.mrf.mxu0  ;;  %v8673_v12 = vld [vmem:[%s9503_s14 + $0x5ec] ss:$120 sps:$4 sm:$0xff]   ;;  %v11858_v39 = vpack.c.bf16 %v2686_v0, %v2686_v0 }
 0x575   : > { %v6132_v42 = vpop.f32.mrf.mxu1  ;;  %v8674_v61 = vld [vmem:[%s9503_s14 + $0x4f0] ss:$120 sps:$4 sm:$0xff]  }
 0x576   : > { %v8677_v42 = vld [vmem:[%s9503_s14 + $0x4f8] ss:$120 sps:$4 sm:$0xff]  }
 0x577   : > { %6235 = vmatpush2.bf16.xpose.msra.mxu0 %v8619_v36  ;;  %v8676_v36 = vld [vmem:[%s9503_s14 + $0x4f4] ss:$120 sps:$4 sm:$0xff]  }
 0x578   : > { %6276 = vmatpush2.bf16.xpose.msra.mxu1 %v8622_v19  ;;  %6236 = vmatprep.subr.bf16.mxu0 %v8627_v16  ;;  %v8679_v19 = vld [vmem:[%s9503_s14 + $0x4fc] ss:$120 sps:$4 sm:$0xff]  }
 0x579   : > { %6277 = vmatprep.subr.bf16.mxu1 %v8630_v54  ;;  %v8682_v16 = vld [vmem:[%s9503_s14 + $0x404] ss:$120 sps:$4 sm:$0xff]  }
 0x57a   : > { %v8685_v54 = vld [vmem:[%s9503_s14 + $0x40c] ss:$120 sps:$4 sm:$0xff]  }
 0x57f   : > { %6237 = vmatpush2.bf16.xpose.msra.mxu0 %v8625_v48  ;;  %v8680_v48 = vld [vmem:[%s9503_s14 + $0x400] ss:$120 sps:$4 sm:$0xff]  }
 0x580   : > { %6278 = vmatpush2.bf16.xpose.msra.mxu1 %v8628_v18  ;;  %6238 = vmatprep.subr.bf16.mxu0 %v8633_v63  ;;  %v8683_v18 = vld [vmem:[%s9503_s14 + $0x408] ss:$120 sps:$4 sm:$0xff]   ;;  %v8688_v63 = vld [vmem:[%s9503_s14 + $0x314] ss:$120 sps:$4 sm:$0xff]  }
 0x581   : > { %6279 = vmatprep.subr.bf16.mxu1 %v8636_v17  ;;  %v8691_v17 = vld [vmem:[%s9503_s14 + $0x31c] ss:$120 sps:$4 sm:$0xff]  }
 0x587   : > { %6239 = vmatpush2.bf16.xpose.msra.mxu0 %v8631_v27  ;;  %v8686_v27 = vld [vmem:[%s9503_s14 + $0x310] ss:$120 sps:$4 sm:$0xff]  }
 0x588   : > { %6280 = vmatpush2.bf16.xpose.msra.mxu1 %v8634_v20  ;;  %6240 = vmatprep.subr.bf16.mxu0 %v8639_v26  ;;  %v8689_v20 = vld [vmem:[%s9503_s14 + $0x318] ss:$120 sps:$4 sm:$0xff]   ;;  %v8694_v26 = vld [vmem:[%s9503_s14 + $0x224] ss:$120 sps:$4 sm:$0xff]  }
 0x589   : > { %6281 = vmatprep.subr.bf16.mxu1 %v8642_v52  ;;  %v8697_v52 = vld [vmem:[%s9503_s14 + $0x22c] ss:$120 sps:$4 sm:$0xff]  }
 0x58f   : > { %6241 = vmatpush2.bf16.xpose.msra.mxu0 %v8637_v35  ;;  %v8692_v35 = vld [vmem:[%s9503_s14 + $0x220] ss:$120 sps:$4 sm:$0xff]  }
 0x590   : > { %6282 = vmatpush2.bf16.xpose.msra.mxu1 %v8640_v13  ;;  %6242 = vmatprep.subr.bf16.mxu0 %v8645_v56  ;;  %v8695_v13 = vld [vmem:[%s9503_s14 + $0x228] ss:$120 sps:$4 sm:$0xff]   ;;  %v8700_v56 = vld [vmem:[%s9503_s14 + $0x134] ss:$120 sps:$4 sm:$0xff]  }
 0x591   : > { %6283 = vmatprep.subr.bf16.mxu1 %v8648_v57  ;;  %v8703_v57 = vld [vmem:[%s9503_s14 + $0x13c] ss:$120 sps:$4 sm:$0xff]  }
 0x597   : > { %6243 = vmatpush2.bf16.xpose.msra.mxu0 %v8643_v43  ;;  %v8698_v43 = vld [vmem:[%s9503_s14 + $0x130] ss:$120 sps:$4 sm:$0xff]  }
 0x598   : > { %6284 = vmatpush2.bf16.xpose.msra.mxu1 %v8646_v1  ;;  %6244 = vmatprep.subr.bf16.mxu0 %v8651_v22  ;;  %v8701_v1 = vld [vmem:[%s9503_s14 + $0x138] ss:$120 sps:$4 sm:$0xff]   ;;  %v8706_v22 = vld [vmem:[%s9503_s14 + $0x44] ss:$120 sps:$4 sm:$0xff]  }
 0x599   : > { %6285 = vmatprep.subr.bf16.mxu1 %v8654_v30  ;;  %v8709_v30 = vld [vmem:[%s9503_s14 + $0x4c] ss:$120 sps:$4 sm:$0xff]  }
 0x59f   : > { %6245 = vmatpush2.bf16.xpose.msra.mxu0 %v8649_v3  ;;  %v8704_v3 = vld [vmem:[%s9503_s14 + $0x40] ss:$120 sps:$4 sm:$0xff]  }
 0x5a0   : > { %6286 = vmatpush2.bf16.xpose.msra.mxu1 %v8652_v58  ;;  %6246 = vmatprep.subr.bf16.mxu0 %v8657_v34  ;;  %v8707_v58 = vld [vmem:[%s9503_s14 + $0x48] ss:$120 sps:$4 sm:$0xff]   ;;  %v8712_v34 = vld [vmem:[%s9503_s14 + $0xe54] ss:$120 sps:$4 sm:$0xff]  }
 0x5a1   : > { %6287 = vmatprep.subr.bf16.mxu1 %v8660_v31  ;;  %v8715_v31 = vld [vmem:[%s9503_s14 + $0xe5c] ss:$120 sps:$4 sm:$0xff]  }
 0x5a7   : > { %6247 = vmatpush2.bf16.xpose.msra.mxu0 %v8655_v41  ;;  %v8710_v41 = vld [vmem:[%s9503_s14 + $0xe50] ss:$120 sps:$4 sm:$0xff]  }
 0x5a8   : > { %6288 = vmatpush2.bf16.xpose.msra.mxu1 %v8658_v28  ;;  %6298 = vmatprep.subr.bf16.mxu0 %v8664_v2  ;;  %v8713_v28 = vld [vmem:[%s9503_s14 + $0xe58] ss:$120 sps:$4 sm:$0xff]   ;;  %v8718_v2 = vld [vmem:[%s9503_s14 + $0xd64] ss:$120 sps:$4 sm:$0xff]  }
 0x5a9   : > { %6339 = vmatprep.subr.bf16.mxu1 %v8667_v51  ;;  %v8721_v51 = vld [vmem:[%s9503_s14 + $0xd6c] ss:$120 sps:$4 sm:$0xff]  }
 0x5ae   : > { %6249 = vmatmul.mubr.bf16.vlgmr.msra.gmra.mxu0 %v11844_v44 }
 0x5af   : > { %6290 = vmatmul.mubr.bf16.vlgmr.msra.gmra.mxu1 %v11848_v40  ;;  %6299 = vmatpush1.bf16.xpose.msra.mxu0 %v8662_v49 }
 0x5b0   : > { %6340 = vmatpush1.bf16.xpose.msra.mxu1 %v8665_v10  ;;  %6300 = vmatprep.subr.bf16.mxu0 %v8670_v45 }
 0x5b1   : > { %6341 = vmatprep.subr.bf16.mxu1 %v8673_v12  ;;  %6330 = vmatprep.mubr.bf16.mxu0 %v11856_v25 }
 0x5b2   : > { %6371 = vmatprep.mubr.bf16.mxu1 %v11858_v39 }
 0x5b7   : > { %6301 = vmatpush1.bf16.xpose.msra.mxu0 %v8668_v59 }
 0x5b8   : > { %6342 = vmatpush1.bf16.xpose.msra.mxu1 %v8671_v50  ;;  %6302 = vmatprep.subr.bf16.mxu0 %v8676_v36  ;;  %v8719_v36 = vld [vmem:[%s9503_s14 + $0xd68] ss:$120 sps:$4 sm:$0xff]  }
 0x5b9   : > { %6343 = vmatprep.subr.bf16.mxu1 %v8679_v19 }
 0x5bf   : > { %6303 = vmatpush1.bf16.xpose.msra.mxu0 %v8674_v61 }
 0x5c0   : > { %6344 = vmatpush1.bf16.xpose.msra.mxu1 %v8677_v42  ;;  %6304 = vmatprep.subr.bf16.mxu0 %v8682_v16  ;;  %v8724_v42 = vld [vmem:[%s9503_s14 + $0xc74] ss:$120 sps:$4 sm:$0xff]  }
 0x5c1   : > { %6345 = vmatprep.subr.bf16.mxu1 %v8685_v54  ;;  %v8727_v16 = vld [vmem:[%s9503_s14 + $0xc7c] ss:$120 sps:$4 sm:$0xff]   ;;  %v8725_v54 = vld [vmem:[%s9503_s14 + $0xc78] ss:$120 sps:$4 sm:$0xff]  }
 0x5c7   : > { %6305 = vmatpush1.bf16.xpose.msra.mxu0 %v8680_v48  ;;  %v8730_v48 = vld [vmem:[%s9503_s14 + $0xb84] ss:$120 sps:$4 sm:$0xff]  }
 0x5c8   : > { %6346 = vmatpush1.bf16.xpose.msra.mxu1 %v8683_v18  ;;  %6306 = vmatprep.subr.bf16.mxu0 %v8688_v63  ;;  %v8733_v18 = vld [vmem:[%s9503_s14 + $0xb8c] ss:$120 sps:$4 sm:$0xff]   ;;  %v8728_v63 = vld [vmem:[%s9503_s14 + $0xb80] ss:$120 sps:$4 sm:$0xff]  }
 0x5c9   : > { %6347 = vmatprep.subr.bf16.mxu1 %v8691_v17  ;;  %v8731_v17 = vld [vmem:[%s9503_s14 + $0xb88] ss:$120 sps:$4 sm:$0xff]  }
 0x5cf   : > { %6307 = vmatpush1.bf16.xpose.msra.mxu0 %v8686_v27  ;;  %v8736_v27 = vld [vmem:[%s9503_s14 + $0xa94] ss:$120 sps:$4 sm:$0xff]  }
 0x5d0   : > { %6348 = vmatpush1.bf16.xpose.msra.mxu1 %v8689_v20  ;;  %6308 = vmatprep.subr.bf16.mxu0 %v8694_v26  ;;  %v8739_v20 = vld [vmem:[%s9503_s14 + $0xa9c] ss:$120 sps:$4 sm:$0xff]   ;;  %v8734_v26 = vld [vmem:[%s9503_s14 + $0xa90] ss:$120 sps:$4 sm:$0xff]  }
 0x5d1   : > { %6349 = vmatprep.subr.bf16.mxu1 %v8697_v52  ;;  %v8737_v52 = vld [vmem:[%s9503_s14 + $0xa98] ss:$120 sps:$4 sm:$0xff]  }
 0x5d7   : > { %6309 = vmatpush1.bf16.xpose.msra.mxu0 %v8692_v35  ;;  %v8742_v35 = vld [vmem:[%s9503_s14 + $0x9a4] ss:$120 sps:$4 sm:$0xff]  }
 0x5d8   : > { %6350 = vmatpush1.bf16.xpose.msra.mxu1 %v8695_v13  ;;  %6310 = vmatprep.subr.bf16.mxu0 %v8700_v56  ;;  %v8745_v13 = vld [vmem:[%s9503_s14 + $0x9ac] ss:$120 sps:$4 sm:$0xff]   ;;  %v8740_v56 = vld [vmem:[%s9503_s14 + $0x9a0] ss:$120 sps:$4 sm:$0xff]  }
 0x5d9   : > { %6351 = vmatprep.subr.bf16.mxu1 %v8703_v57  ;;  %v8743_v57 = vld [vmem:[%s9503_s14 + $0x9a8] ss:$120 sps:$4 sm:$0xff]  }
 0x5df   : > { %6311 = vmatpush1.bf16.xpose.msra.mxu0 %v8698_v43  ;;  %v8748_v43 = vld [vmem:[%s9503_s14 + $0x8b4] ss:$120 sps:$4 sm:$0xff]  }
 0x5e0   : > { %6352 = vmatpush1.bf16.xpose.msra.mxu1 %v8701_v1  ;;  %6312 = vmatprep.subr.bf16.mxu0 %v8706_v22  ;;  %v8751_v1 = vld [vmem:[%s9503_s14 + $0x8bc] ss:$120 sps:$4 sm:$0xff]   ;;  %v8746_v22 = vld [vmem:[%s9503_s14 + $0x8b0] ss:$120 sps:$4 sm:$0xff]  }
 0x5e1   : > { %6353 = vmatprep.subr.bf16.mxu1 %v8709_v30  ;;  %v8749_v30 = vld [vmem:[%s9503_s14 + $0x8b8] ss:$120 sps:$4 sm:$0xff]  }
 0x5e7   : > { %6313 = vmatpush1.bf16.xpose.msra.mxu0 %v8704_v3  ;;  %v8754_v3 = vld [vmem:[%s9503_s14 + $0x7c4] ss:$120 sps:$4 sm:$0xff]  }
 0x5e8   : > { %6354 = vmatpush1.bf16.xpose.msra.mxu1 %v8707_v58  ;;  %6314 = vmatprep.subr.bf16.mxu0 %v8712_v34  ;;  %v8757_v58 = vld [vmem:[%s9503_s14 + $0x7cc] ss:$120 sps:$4 sm:$0xff]   ;;  %v8752_v34 = vld [vmem:[%s9503_s14 + $0x7c0] ss:$120 sps:$4 sm:$0xff]  }
 0x5e9   : > { %6355 = vmatprep.subr.bf16.mxu1 %v8715_v31  ;;  %v8755_v31 = vld [vmem:[%s9503_s14 + $0x7c8] ss:$120 sps:$4 sm:$0xff]  }
 0x5ee   : > { %v6168_v15 = vpop.f32.mrf.mxu0 }
 0x5ef   : > { %v6209_v4 = vpop.f32.mrf.mxu1  ;;  %v6169_v6 = vadd.f32 %v6168_v15, %v11801_v8  ;;  %6315 = vmatpush2.bf16.xpose.msra.mxu0 %v8710_v41  ;;  %v8716_v8 = vld [vmem:[%s9503_s14 + $0xd60] ss:$120 sps:$4 sm:$0xff]   ;;  %v8761_v41 = vld [vmem:[%s9503_s14 + $0x6e4] ss:$120 sps:$4 sm:$0xff]  }
 0x5f0   : > { %6356 = vmatpush2.bf16.xpose.msra.mxu1 %v8713_v28  ;;  %v6170_v0 = vpop.f32.mrf.mxu0  ;;  %6316 = vmatprep.subr.bf16.mxu0 %v8718_v2  ;;  %v8764_v28 = vld [vmem:[%s9503_s14 + $0x6ec] ss:$120 sps:$4 sm:$0xff]   ;;  %v2591_v2 = vld [vmem:[%s11491_s19 + $0x28] sm:$0xff] }
 0x5f1   : > { %v6211_v49 = vpop.f32.mrf.mxu1  ;;  %6357 = vmatprep.subr.bf16.mxu1 %v8721_v51  ;;  %v6171_v10 = vadd.f32 %v6170_v0, %v11803_v62  ;;  %v11898_v45 = vadd.f32 %v6209_v4, %v6169_v6  ;;  %v8722_v62 = vld [vmem:[%s9503_s14 + $0xc70] ss:$120 sps:$4 sm:$0xff]   ;;  %v2687_v51 = vcombine.high %v2591_v2, %v2591_v2  ;;  %v11932_v15 = vrot.slane %v2591_v2, %v11487_v14  ;;  %v8807_v2 = vld [vmem:[%s9503_s14 + $0xe60] ss:$120 sps:$4 sm:$0xff]  }
 0x5f2   : > { %v6172_v12 = vpop.f32.mrf.mxu0  ;;  %v11941_v0 = vpack.c.bf16 %v11835_v38, %v11835_v38  ;;  %v8765_v38 = vld [vmem:[%s9503_s14 + $0x5f0] ss:$120 sps:$4 sm:$0xff]  }
 0x5f3   : > { %v6213_v59 = vpop.f32.mrf.mxu1  ;;  %v11900_v50 = vadd.f32 %v6211_v49, %v6171_v10  ;;  %v11935_v4 = vrot.slane %v2687_v51, %v11487_v14  ;;  %v2702_v6 = vcombine.high %v11932_v15, %v11932_v15  ;;  %v11945_v49 = vpack.c.bf16 %v11838_v47, %v11838_v47  ;;  %v8759_v12 = vld [vmem:[%s9503_s14 + $0x6e0] ss:$120 sps:$4 sm:$0xff]  }
 0x5f4   : > { %v6173_v19 = vpop.f32.mrf.mxu0  ;;  %v8762_v59 = vld [vmem:[%s9503_s14 + $0x6e8] ss:$120 sps:$4 sm:$0xff]   ;;  %v8768_v47 = vld [vmem:[%s9503_s14 + $0x5f8] ss:$120 sps:$4 sm:$0xff]  }
 0x5f5   : > { %v6214_v61 = vpop.f32.mrf.mxu1  ;;  %v2703_v10 = vcombine.high %v11935_v4, %v11935_v4  ;;  %v11953_v19 = vpack.c.bf16 %v2702_v6, %v2702_v6  ;;  %v8810_v51 = vld [vmem:[%s9503_s14 + $0xe68] ss:$120 sps:$4 sm:$0xff]   ;;  %v8815_v6 = vld [vmem:[%s9503_s14 + $0xd74] ss:$120 sps:$4 sm:$0xff]  }
 0x5f7   : > { %6317 = vmatpush2.bf16.xpose.msra.mxu0 %v8716_v8  ;;  %v8767_v8 = vld [vmem:[%s9503_s14 + $0x5f4] ss:$120 sps:$4 sm:$0xff]   ;;  %v11955_v61 = vpack.c.bf16 %v2703_v10, %v2703_v10 }
 0x5f8   : > { %6358 = vmatpush2.bf16.xpose.msra.mxu1 %v8719_v36  ;;  %6318 = vmatprep.subr.bf16.mxu0 %v8724_v42  ;;  %v8770_v36 = vld [vmem:[%s9503_s14 + $0x5fc] ss:$120 sps:$4 sm:$0xff]  }
 0x5f9   : > { %6359 = vmatprep.subr.bf16.mxu1 %v8727_v16  ;;  %v8773_v42 = vld [vmem:[%s9503_s14 + $0x504] ss:$120 sps:$4 sm:$0xff]  }
 0x5fa   : > { %v8776_v16 = vld [vmem:[%s9503_s14 + $0x50c] ss:$120 sps:$4 sm:$0xff]   ;;  %v8818_v10 = vld [vmem:[%s9503_s14 + $0xd7c] ss:$120 sps:$4 sm:$0xff]  }
 0x5ff   : > { %6319 = vmatpush2.bf16.xpose.msra.mxu0 %v8722_v62  ;;  %v8771_v62 = vld [vmem:[%s9503_s14 + $0x500] ss:$120 sps:$4 sm:$0xff]  }
 0x600   : > { %6360 = vmatpush2.bf16.xpose.msra.mxu1 %v8725_v54  ;;  %6320 = vmatprep.subr.bf16.mxu0 %v8730_v48  ;;  %v8774_v54 = vld [vmem:[%s9503_s14 + $0x508] ss:$120 sps:$4 sm:$0xff]   ;;  %v8779_v48 = vld [vmem:[%s9503_s14 + $0x414] ss:$120 sps:$4 sm:$0xff]  }
 0x601   : > { %6361 = vmatprep.subr.bf16.mxu1 %v8733_v18  ;;  %v8782_v18 = vld [vmem:[%s9503_s14 + $0x41c] ss:$120 sps:$4 sm:$0xff]  }
 0x607   : > { %6321 = vmatpush2.bf16.xpose.msra.mxu0 %v8728_v63  ;;  %v8777_v63 = vld [vmem:[%s9503_s14 + $0x410] ss:$120 sps:$4 sm:$0xff]  }
 0x608   : > { %6362 = vmatpush2.bf16.xpose.msra.mxu1 %v8731_v17  ;;  %6322 = vmatprep.subr.bf16.mxu0 %v8736_v27  ;;  %v8780_v17 = vld [vmem:[%s9503_s14 + $0x418] ss:$120 sps:$4 sm:$0xff]   ;;  %v8785_v27 = vld [vmem:[%s9503_s14 + $0x324] ss:$120 sps:$4 sm:$0xff]  }
 0x609   : > { %6363 = vmatprep.subr.bf16.mxu1 %v8739_v20  ;;  %v8788_v20 = vld [vmem:[%s9503_s14 + $0x32c] ss:$120 sps:$4 sm:$0xff]  }
 0x60f   : > { %6323 = vmatpush2.bf16.xpose.msra.mxu0 %v8734_v26  ;;  %v8783_v26 = vld [vmem:[%s9503_s14 + $0x320] ss:$120 sps:$4 sm:$0xff]  }
 0x610   : > { %6364 = vmatpush2.bf16.xpose.msra.mxu1 %v8737_v52  ;;  %6324 = vmatprep.subr.bf16.mxu0 %v8742_v35  ;;  %v8786_v52 = vld [vmem:[%s9503_s14 + $0x328] ss:$120 sps:$4 sm:$0xff]   ;;  %v8791_v35 = vld [vmem:[%s9503_s14 + $0x234] ss:$120 sps:$4 sm:$0xff]  }
 0x611   : > { %6365 = vmatprep.subr.bf16.mxu1 %v8745_v13  ;;  %v8794_v13 = vld [vmem:[%s9503_s14 + $0x23c] ss:$120 sps:$4 sm:$0xff]  }
 0x617   : > { %6325 = vmatpush2.bf16.xpose.msra.mxu0 %v8740_v56  ;;  %v8789_v56 = vld [vmem:[%s9503_s14 + $0x230] ss:$120 sps:$4 sm:$0xff]  }
 0x618   : > { %6366 = vmatpush2.bf16.xpose.msra.mxu1 %v8743_v57  ;;  %6326 = vmatprep.subr.bf16.mxu0 %v8748_v43  ;;  %v8792_v57 = vld [vmem:[%s9503_s14 + $0x238] ss:$120 sps:$4 sm:$0xff]   ;;  %v8797_v43 = vld [vmem:[%s9503_s14 + $0x144] ss:$120 sps:$4 sm:$0xff]  }
 0x619   : > { %6367 = vmatprep.subr.bf16.mxu1 %v8751_v1  ;;  %v8800_v1 = vld [vmem:[%s9503_s14 + $0x14c] ss:$120 sps:$4 sm:$0xff]  }
 0x61f   : > { %6327 = vmatpush2.bf16.xpose.msra.mxu0 %v8746_v22  ;;  %v8795_v22 = vld [vmem:[%s9503_s14 + $0x140] ss:$120 sps:$4 sm:$0xff]  }
 0x620   : > { %6368 = vmatpush2.bf16.xpose.msra.mxu1 %v8749_v30  ;;  %6328 = vmatprep.subr.bf16.mxu0 %v8754_v3  ;;  %v8798_v30 = vld [vmem:[%s9503_s14 + $0x148] ss:$120 sps:$4 sm:$0xff]   ;;  %v8803_v3 = vld [vmem:[%s9503_s14 + $0x54] ss:$120 sps:$4 sm:$0xff]  }
 0x621   : > { %6369 = vmatprep.subr.bf16.mxu1 %v8757_v58  ;;  %v8806_v58 = vld [vmem:[%s9503_s14 + $0x5c] ss:$120 sps:$4 sm:$0xff]  }
 0x627   : > { %6329 = vmatpush2.bf16.xpose.msra.mxu0 %v8752_v34  ;;  %v8801_v34 = vld [vmem:[%s9503_s14 + $0x50] ss:$120 sps:$4 sm:$0xff]  }
 0x628   : > { %6370 = vmatpush2.bf16.xpose.msra.mxu1 %v8755_v31  ;;  %6380 = vmatprep.subr.bf16.mxu0 %v8761_v41  ;;  %v8804_v31 = vld [vmem:[%s9503_s14 + $0x58] ss:$120 sps:$4 sm:$0xff]   ;;  %v8809_v41 = vld [vmem:[%s9503_s14 + $0xe64] ss:$120 sps:$4 sm:$0xff]  }
 0x629   : > { %6421 = vmatprep.subr.bf16.mxu1 %v8764_v28  ;;  %v8812_v28 = vld [vmem:[%s9503_s14 + $0xe6c] ss:$120 sps:$4 sm:$0xff]  }
 0x62e   : > { %6331 = vmatmul.mubr.bf16.vlgmr.msra.gmra.mxu0 %v11941_v0 }
 0x62f   : > { %6372 = vmatmul.mubr.bf16.vlgmr.msra.gmra.mxu1 %v11945_v49  ;;  %6381 = vmatpush1.bf16.xpose.msra.mxu0 %v8759_v12 }
 0x630   : > { %6422 = vmatpush1.bf16.xpose.msra.mxu1 %v8762_v59  ;;  %6382 = vmatprep.subr.bf16.mxu0 %v8767_v8 }
 0x631   : > { %6423 = vmatprep.subr.bf16.mxu1 %v8770_v36  ;;  %6412 = vmatprep.mubr.bf16.mxu0 %v11953_v19 }
 0x632   : > { %6453 = vmatprep.mubr.bf16.mxu1 %v11955_v61 }
 0x637   : > { %6383 = vmatpush1.bf16.xpose.msra.mxu0 %v8765_v38 }
 0x638   : > { %6424 = vmatpush1.bf16.xpose.msra.mxu1 %v8768_v47  ;;  %6384 = vmatprep.subr.bf16.mxu0 %v8773_v42 }
 0x639   : > { %6425 = vmatprep.subr.bf16.mxu1 %v8776_v16 }
 0x63f   : > { %6385 = vmatpush1.bf16.xpose.msra.mxu0 %v8771_v62 }
 0x640   : > { %6426 = vmatpush1.bf16.xpose.msra.mxu1 %v8774_v54  ;;  %6386 = vmatprep.subr.bf16.mxu0 %v8779_v48  ;;  %v8816_v48 = vld [vmem:[%s9503_s14 + $0xd78] ss:$120 sps:$4 sm:$0xff]  }
 0x641   : > { %6427 = vmatprep.subr.bf16.mxu1 %v8782_v18 }
 0x647   : > { %6387 = vmatpush1.bf16.xpose.msra.mxu0 %v8777_v63 }
 0x648   : > { %6428 = vmatpush1.bf16.xpose.msra.mxu1 %v8780_v17  ;;  %6388 = vmatprep.subr.bf16.mxu0 %v8785_v27  ;;  %v8821_v17 = vld [vmem:[%s9503_s14 + $0xc84] ss:$120 sps:$4 sm:$0xff]  }
 0x649   : > { %6429 = vmatprep.subr.bf16.mxu1 %v8788_v20  ;;  %v8824_v27 = vld [vmem:[%s9503_s14 + $0xc8c] ss:$120 sps:$4 sm:$0xff]   ;;  %v8822_v20 = vld [vmem:[%s9503_s14 + $0xc88] ss:$120 sps:$4 sm:$0xff]  }
 0x64f   : > { %6389 = vmatpush1.bf16.xpose.msra.mxu0 %v8783_v26  ;;  %v8827_v26 = vld [vmem:[%s9503_s14 + $0xb94] ss:$120 sps:$4 sm:$0xff]  }
 0x650   : > { %6430 = vmatpush1.bf16.xpose.msra.mxu1 %v8786_v52  ;;  %6390 = vmatprep.subr.bf16.mxu0 %v8791_v35  ;;  %v8830_v52 = vld [vmem:[%s9503_s14 + $0xb9c] ss:$120 sps:$4 sm:$0xff]   ;;  %v8825_v35 = vld [vmem:[%s9503_s14 + $0xb90] ss:$120 sps:$4 sm:$0xff]  }
 0x651   : > { %6431 = vmatprep.subr.bf16.mxu1 %v8794_v13  ;;  %v8828_v13 = vld [vmem:[%s9503_s14 + $0xb98] ss:$120 sps:$4 sm:$0xff]  }
 0x657   : > { %6391 = vmatpush1.bf16.xpose.msra.mxu0 %v8789_v56  ;;  %v8833_v56 = vld [vmem:[%s9503_s14 + $0xaa4] ss:$120 sps:$4 sm:$0xff]  }
 0x658   : > { %6432 = vmatpush1.bf16.xpose.msra.mxu1 %v8792_v57  ;;  %6392 = vmatprep.subr.bf16.mxu0 %v8797_v43  ;;  %v8836_v57 = vld [vmem:[%s9503_s14 + $0xaac] ss:$120 sps:$4 sm:$0xff]   ;;  %v8831_v43 = vld [vmem:[%s9503_s14 + $0xaa0] ss:$120 sps:$4 sm:$0xff]  }
 0x659   : > { %6433 = vmatprep.subr.bf16.mxu1 %v8800_v1  ;;  %v8834_v1 = vld [vmem:[%s9503_s14 + $0xaa8] ss:$120 sps:$4 sm:$0xff]  }
 0x65f   : > { %6393 = vmatpush1.bf16.xpose.msra.mxu0 %v8795_v22  ;;  %v8839_v22 = vld [vmem:[%s9503_s14 + $0x9b4] ss:$120 sps:$4 sm:$0xff]  }
 0x660   : > { %6434 = vmatpush1.bf16.xpose.msra.mxu1 %v8798_v30  ;;  %6394 = vmatprep.subr.bf16.mxu0 %v8803_v3  ;;  %v8842_v30 = vld [vmem:[%s9503_s14 + $0x9bc] ss:$120 sps:$4 sm:$0xff]   ;;  %v8837_v3 = vld [vmem:[%s9503_s14 + $0x9b0] ss:$120 sps:$4 sm:$0xff]  }
 0x661   : > { %6435 = vmatprep.subr.bf16.mxu1 %v8806_v58  ;;  %v8840_v58 = vld [vmem:[%s9503_s14 + $0x9b8] ss:$120 sps:$4 sm:$0xff]  }
 0x667   : > { %6395 = vmatpush1.bf16.xpose.msra.mxu0 %v8801_v34  ;;  %v8845_v34 = vld [vmem:[%s9503_s14 + $0x8c4] ss:$120 sps:$4 sm:$0xff]  }
 0x668   : > { %6436 = vmatpush1.bf16.xpose.msra.mxu1 %v8804_v31  ;;  %6396 = vmatprep.subr.bf16.mxu0 %v8809_v41  ;;  %v8848_v31 = vld [vmem:[%s9503_s14 + $0x8cc] ss:$120 sps:$4 sm:$0xff]   ;;  %v8843_v41 = vld [vmem:[%s9503_s14 + $0x8c0] ss:$120 sps:$4 sm:$0xff]  }
 0x669   : > { %6437 = vmatprep.subr.bf16.mxu1 %v8812_v28  ;;  %v8846_v28 = vld [vmem:[%s9503_s14 + $0x8c8] ss:$120 sps:$4 sm:$0xff]  }
 0x66e   : > { %v6250_v12 = vpop.f32.mrf.mxu0 }
 0x66f   : > { %v6291_v59 = vpop.f32.mrf.mxu1  ;;  %v6251_v8 = vadd.f32 %v6250_v12, %v11898_v45  ;;  %6397 = vmatpush2.bf16.xpose.msra.mxu0 %v8807_v2  ;;  %v8813_v45 = vld [vmem:[%s9503_s14 + $0xd70] ss:$120 sps:$4 sm:$0xff]   ;;  %v8851_v2 = vld [vmem:[%s9503_s14 + $0x7d4] ss:$120 sps:$4 sm:$0xff]  }
 0x670   : > { %6438 = vmatpush2.bf16.xpose.msra.mxu1 %v8810_v51  ;;  %v6252_v36 = vpop.f32.mrf.mxu0  ;;  %6398 = vmatprep.subr.bf16.mxu0 %v8815_v6  ;;  %v8854_v51 = vld [vmem:[%s9503_s14 + $0x7dc] ss:$120 sps:$4 sm:$0xff]   ;;  %v8849_v6 = vld [vmem:[%s9503_s14 + $0x7d0] ss:$120 sps:$4 sm:$0xff]  }
 0x671   : > { %v6293_v38 = vpop.f32.mrf.mxu1  ;;  %6439 = vmatprep.subr.bf16.mxu1 %v8818_v10  ;;  %v6253_v47 = vadd.f32 %v6252_v36, %v11900_v50  ;;  %v11995_v42 = vadd.f32 %v6291_v59, %v6251_v8  ;;  %v8819_v50 = vld [vmem:[%s9503_s14 + $0xc80] ss:$120 sps:$4 sm:$0xff]   ;;  %v8858_v12 = vld [vmem:[%s9503_s14 + $0x6f4] ss:$120 sps:$4 sm:$0xff]  }
 0x672   : > { %v6254_v16 = vpop.f32.mrf.mxu0  ;;  %v8852_v10 = vld [vmem:[%s9503_s14 + $0x7d8] ss:$120 sps:$4 sm:$0xff]   ;;  %v8861_v59 = vld [vmem:[%s9503_s14 + $0x6fc] ss:$120 sps:$4 sm:$0xff]  }
 0x673   : > { %v6295_v62 = vpop.f32.mrf.mxu1  ;;  %v11997_v54 = vadd.f32 %v6293_v38, %v6253_v47  ;;  %v2592_v8 = vld [vmem:[%s11491_s19 + $0x30] sm:$0xff] }
 0x674   : > { %v6255_v18 = vpop.f32.mrf.mxu0  ;;  %v2704_v36 = vcombine.high %v2592_v8, %v2592_v8  ;;  %v12029_v38 = vrot.slane %v2592_v8, %v11487_v14  ;;  %v12038_v62 = vpack.c.bf16 %v11932_v15, %v11932_v15  ;;  %v8862_v15 = vld [vmem:[%s9503_s14 + $0x600] ss:$120 sps:$4 sm:$0xff]  }
 0x675   : > { %v6296_v63 = vpop.f32.mrf.mxu1  ;;  %v8856_v18 = vld [vmem:[%s9503_s14 + $0x6f0] ss:$120 sps:$4 sm:$0xff]   ;;  %v8898_v8 = vld [vmem:[%s9503_s14 + $0x60] ss:$120 sps:$4 sm:$0xff]  }
 0x676   : > { %v12032_v47 = vrot.slane %v2704_v36, %v11487_v14  ;;  %v2719_v16 = vcombine.high %v12029_v38, %v12029_v38  ;;  %v8859_v63 = vld [vmem:[%s9503_s14 + $0x6f8] ss:$120 sps:$4 sm:$0xff]   ;;  %v8901_v36 = vld [vmem:[%s9503_s14 + $0x68] ss:$120 sps:$4 sm:$0xff]  }
 0x677   : > { %6399 = vmatpush2.bf16.xpose.msra.mxu0 %v8813_v45  ;;  %v12042_v45 = vpack.c.bf16 %v11935_v4, %v11935_v4  ;;  %v8865_v4 = vld [vmem:[%s9503_s14 + $0x608] ss:$120 sps:$4 sm:$0xff]  }
 0x678   : > { %6440 = vmatpush2.bf16.xpose.msra.mxu1 %v8816_v48  ;;  %6400 = vmatprep.subr.bf16.mxu0 %v8821_v17  ;;  %v2720_v48 = vcombine.high %v12032_v47, %v12032_v47  ;;  %v8864_v17 = vld [vmem:[%s9503_s14 + $0x604] ss:$120 sps:$4 sm:$0xff]  }
 0x679   : > { %6441 = vmatprep.subr.bf16.mxu1 %v8824_v27  ;;  %v8867_v27 = vld [vmem:[%s9503_s14 + $0x60c] ss:$120 sps:$4 sm:$0xff]  }
 0x67f   : > { %6401 = vmatpush2.bf16.xpose.msra.mxu0 %v8819_v50  ;;  %v12050_v50 = vpack.c.bf16 %v2719_v16, %v2719_v16  ;;  %v8906_v16 = vld [vmem:[%s9503_s14 + $0xe74] ss:$120 sps:$4 sm:$0xff]  }
 0x680   : > { %6442 = vmatpush2.bf16.xpose.msra.mxu1 %v8822_v20  ;;  %6402 = vmatprep.subr.bf16.mxu0 %v8827_v26  ;;  %v12052_v20 = vpack.c.bf16 %v2720_v48, %v2720_v48  ;;  %v8870_v26 = vld [vmem:[%s9503_s14 + $0x514] ss:$120 sps:$4 sm:$0xff]  }
 0x681   : > { %6443 = vmatprep.subr.bf16.mxu1 %v8830_v52  ;;  %v8873_v52 = vld [vmem:[%s9503_s14 + $0x51c] ss:$120 sps:$4 sm:$0xff]  }
 0x682   : > { %v8909_v48 = vld [vmem:[%s9503_s14 + $0xe7c] ss:$120 sps:$4 sm:$0xff]  }
 0x687   : > { %6403 = vmatpush2.bf16.xpose.msra.mxu0 %v8825_v35  ;;  %v8868_v35 = vld [vmem:[%s9503_s14 + $0x510] ss:$120 sps:$4 sm:$0xff]  }
 0x688   : > { %6444 = vmatpush2.bf16.xpose.msra.mxu1 %v8828_v13  ;;  %6404 = vmatprep.subr.bf16.mxu0 %v8833_v56  ;;  %v8871_v13 = vld [vmem:[%s9503_s14 + $0x518] ss:$120 sps:$4 sm:$0xff]   ;;  %v8876_v56 = vld [vmem:[%s9503_s14 + $0x424] ss:$120 sps:$4 sm:$0xff]  }
 0x689   : > { %6445 = vmatprep.subr.bf16.mxu1 %v8836_v57  ;;  %v8879_v57 = vld [vmem:[%s9503_s14 + $0x42c] ss:$120 sps:$4 sm:$0xff]  }
 0x68f   : > { %6405 = vmatpush2.bf16.xpose.msra.mxu0 %v8831_v43  ;;  %v8874_v43 = vld [vmem:[%s9503_s14 + $0x420] ss:$120 sps:$4 sm:$0xff]  }
 0x690   : > { %6446 = vmatpush2.bf16.xpose.msra.mxu1 %v8834_v1  ;;  %6406 = vmatprep.subr.bf16.mxu0 %v8839_v22  ;;  %v8877_v1 = vld [vmem:[%s9503_s14 + $0x428] ss:$120 sps:$4 sm:$0xff]   ;;  %v8882_v22 = vld [vmem:[%s9503_s14 + $0x334] ss:$120 sps:$4 sm:$0xff]  }
 0x691   : > { %6447 = vmatprep.subr.bf16.mxu1 %v8842_v30  ;;  %v8885_v30 = vld [vmem:[%s9503_s14 + $0x33c] ss:$120 sps:$4 sm:$0xff]  }
 0x697   : > { %6407 = vmatpush2.bf16.xpose.msra.mxu0 %v8837_v3  ;;  %v8880_v3 = vld [vmem:[%s9503_s14 + $0x330] ss:$120 sps:$4 sm:$0xff]  }
 0x698   : > { %6448 = vmatpush2.bf16.xpose.msra.mxu1 %v8840_v58  ;;  %6408 = vmatprep.subr.bf16.mxu0 %v8845_v34  ;;  %v8883_v58 = vld [vmem:[%s9503_s14 + $0x338] ss:$120 sps:$4 sm:$0xff]   ;;  %v8888_v34 = vld [vmem:[%s9503_s14 + $0x244] ss:$120 sps:$4 sm:$0xff]  }
 0x699   : > { %6449 = vmatprep.subr.bf16.mxu1 %v8848_v31  ;;  %v8891_v31 = vld [vmem:[%s9503_s14 + $0x24c] ss:$120 sps:$4 sm:$0xff]  }
 0x69f   : > { %6409 = vmatpush2.bf16.xpose.msra.mxu0 %v8843_v41  ;;  %v8886_v41 = vld [vmem:[%s9503_s14 + $0x240] ss:$120 sps:$4 sm:$0xff]  }
 0x6a0   : > { %6450 = vmatpush2.bf16.xpose.msra.mxu1 %v8846_v28  ;;  %6410 = vmatprep.subr.bf16.mxu0 %v8851_v2  ;;  %v8889_v28 = vld [vmem:[%s9503_s14 + $0x248] ss:$120 sps:$4 sm:$0xff]   ;;  %v8894_v2 = vld [vmem:[%s9503_s14 + $0x154] ss:$120 sps:$4 sm:$0xff]  }
 0x6a1   : > { %6451 = vmatprep.subr.bf16.mxu1 %v8854_v51  ;;  %v8897_v51 = vld [vmem:[%s9503_s14 + $0x15c] ss:$120 sps:$4 sm:$0xff]  }
 0x6a7   : > { %6411 = vmatpush2.bf16.xpose.msra.mxu0 %v8849_v6  ;;  %v8892_v6 = vld [vmem:[%s9503_s14 + $0x150] ss:$120 sps:$4 sm:$0xff]  }
 0x6a8   : > { %6452 = vmatpush2.bf16.xpose.msra.mxu1 %v8852_v10  ;;  %6462 = vmatprep.subr.bf16.mxu0 %v8858_v12  ;;  %v8895_v10 = vld [vmem:[%s9503_s14 + $0x158] ss:$120 sps:$4 sm:$0xff]   ;;  %v8900_v12 = vld [vmem:[%s9503_s14 + $0x64] ss:$120 sps:$4 sm:$0xff]  }
 0x6a9   : > { %6503 = vmatprep.subr.bf16.mxu1 %v8861_v59  ;;  %v8903_v59 = vld [vmem:[%s9503_s14 + $0x6c] ss:$120 sps:$4 sm:$0xff]  }
 0x6ae   : > { %6413 = vmatmul.mubr.bf16.vlgmr.msra.gmra.mxu0 %v12038_v62 }
 0x6af   : > { %6454 = vmatmul.mubr.bf16.vlgmr.msra.gmra.mxu1 %v12042_v45  ;;  %6463 = vmatpush1.bf16.xpose.msra.mxu0 %v8856_v18  ;;  %v8904_v18 = vld [vmem:[%s9503_s14 + $0xe70] ss:$120 sps:$4 sm:$0xff]  }
 0x6b0   : > { %6504 = vmatpush1.bf16.xpose.msra.mxu1 %v8859_v63  ;;  %6464 = vmatprep.subr.bf16.mxu0 %v8864_v17  ;;  %v8907_v63 = vld [vmem:[%s9503_s14 + $0xe78] ss:$120 sps:$4 sm:$0xff]   ;;  %v8912_v17 = vld [vmem:[%s9503_s14 + $0xd84] ss:$120 sps:$4 sm:$0xff]  }
 0x6b1   : > { %6505 = vmatprep.subr.bf16.mxu1 %v8867_v27  ;;  %6494 = vmatprep.mubr.bf16.mxu0 %v12050_v50  ;;  %v8915_v27 = vld [vmem:[%s9503_s14 + $0xd8c] ss:$120 sps:$4 sm:$0xff]  }
 0x6b2   : > { %6535 = vmatprep.mubr.bf16.mxu1 %v12052_v20 }
 0x6b7   : > { %6465 = vmatpush1.bf16.xpose.msra.mxu0 %v8862_v15 }
 0x6b8   : > { %6506 = vmatpush1.bf16.xpose.msra.mxu1 %v8865_v4  ;;  %6466 = vmatprep.subr.bf16.mxu0 %v8870_v26 }
 0x6b9   : > { %6507 = vmatprep.subr.bf16.mxu1 %v8873_v52 }
 0x6bf   : > { %6467 = vmatpush1.bf16.xpose.msra.mxu0 %v8868_v35 }
 0x6c0   : > { %6508 = vmatpush1.bf16.xpose.msra.mxu1 %v8871_v13  ;;  %6468 = vmatprep.subr.bf16.mxu0 %v8876_v56 }
 0x6c1   : > { %6509 = vmatprep.subr.bf16.mxu1 %v8879_v57 }
 0x6c7   : > { %6469 = vmatpush1.bf16.xpose.msra.mxu0 %v8874_v43 }
 0x6c8   : > { %6510 = vmatpush1.bf16.xpose.msra.mxu1 %v8877_v1  ;;  %6470 = vmatprep.subr.bf16.mxu0 %v8882_v22  ;;  %v8913_v22 = vld [vmem:[%s9503_s14 + $0xd88] ss:$120 sps:$4 sm:$0xff]  }
 0x6c9   : > { %6511 = vmatprep.subr.bf16.mxu1 %v8885_v30 }
 0x6cf   : > { %6471 = vmatpush1.bf16.xpose.msra.mxu0 %v8880_v3 }
 0x6d0   : > { %6512 = vmatpush1.bf16.xpose.msra.mxu1 %v8883_v58  ;;  %6472 = vmatprep.subr.bf16.mxu0 %v8888_v34  ;;  %v8918_v58 = vld [vmem:[%s9503_s14 + $0xc94] ss:$120 sps:$4 sm:$0xff]  }
 0x6d1   : > { %6513 = vmatprep.subr.bf16.mxu1 %v8891_v31  ;;  %v8921_v34 = vld [vmem:[%s9503_s14 + $0xc9c] ss:$120 sps:$4 sm:$0xff]   ;;  %v8919_v31 = vld [vmem:[%s9503_s14 + $0xc98] ss:$120 sps:$4 sm:$0xff]  }
 0x6d7   : > { %6473 = vmatpush1.bf16.xpose.msra.mxu0 %v8886_v41  ;;  %v8924_v41 = vld [vmem:[%s9503_s14 + $0xba4] ss:$120 sps:$4 sm:$0xff]  }
 0x6d8   : > { %6514 = vmatpush1.bf16.xpose.msra.mxu1 %v8889_v28  ;;  %6474 = vmatprep.subr.bf16.mxu0 %v8894_v2  ;;  %v8927_v28 = vld [vmem:[%s9503_s14 + $0xbac] ss:$120 sps:$4 sm:$0xff]   ;;  %v8922_v2 = vld [vmem:[%s9503_s14 + $0xba0] ss:$120 sps:$4 sm:$0xff]  }
 0x6d9   : > { %6515 = vmatprep.subr.bf16.mxu1 %v8897_v51  ;;  %v8925_v51 = vld [vmem:[%s9503_s14 + $0xba8] ss:$120 sps:$4 sm:$0xff]  }
 0x6df   : > { %6475 = vmatpush1.bf16.xpose.msra.mxu0 %v8892_v6  ;;  %v8930_v6 = vld [vmem:[%s9503_s14 + $0xab4] ss:$120 sps:$4 sm:$0xff]  }
 0x6e0   : > { %6516 = vmatpush1.bf16.xpose.msra.mxu1 %v8895_v10  ;;  %6476 = vmatprep.subr.bf16.mxu0 %v8900_v12  ;;  %v8933_v10 = vld [vmem:[%s9503_s14 + $0xabc] ss:$120 sps:$4 sm:$0xff]   ;;  %v8928_v12 = vld [vmem:[%s9503_s14 + $0xab0] ss:$120 sps:$4 sm:$0xff]  }
 0x6e1   : > { %6517 = vmatprep.subr.bf16.mxu1 %v8903_v59  ;;  %v8931_v59 = vld [vmem:[%s9503_s14 + $0xab8] ss:$120 sps:$4 sm:$0xff]  }
 0x6e7   : > { %6477 = vmatpush1.bf16.xpose.msra.mxu0 %v8898_v8  ;;  %v8936_v8 = vld [vmem:[%s9503_s14 + $0x9c4] ss:$120 sps:$4 sm:$0xff]  }
 0x6e8   : > { %6518 = vmatpush1.bf16.xpose.msra.mxu1 %v8901_v36  ;;  %6478 = vmatprep.subr.bf16.mxu0 %v8906_v16  ;;  %v8939_v36 = vld [vmem:[%s9503_s14 + $0x9cc] ss:$120 sps:$4 sm:$0xff]   ;;  %v8934_v16 = vld [vmem:[%s9503_s14 + $0x9c0] ss:$120 sps:$4 sm:$0xff]  }
 0x6e9   : > { %6519 = vmatprep.subr.bf16.mxu1 %v8909_v48  ;;  %v8937_v48 = vld [vmem:[%s9503_s14 + $0x9c8] ss:$120 sps:$4 sm:$0xff]  }
 0x6ee   : > { %v6332_v15 = vpop.f32.mrf.mxu0 }
 0x6ef   : > { %v6373_v4 = vpop.f32.mrf.mxu1  ;;  %v6333_v26 = vadd.f32 %v6332_v15, %v11995_v42  ;;  %6479 = vmatpush2.bf16.xpose.msra.mxu0 %v8904_v18  ;;  %v8910_v42 = vld [vmem:[%s9503_s14 + $0xd80] ss:$120 sps:$4 sm:$0xff]   ;;  %v8942_v18 = vld [vmem:[%s9503_s14 + $0x8d4] ss:$120 sps:$4 sm:$0xff]   ;;  %v8948_v15 = vld [vmem:[%s9503_s14 + $0x7e4] ss:$120 sps:$4 sm:$0xff]  }
 0x6f0   : > { %6520 = vmatpush2.bf16.xpose.msra.mxu1 %v8907_v63  ;;  %v6334_v52 = vpop.f32.mrf.mxu0  ;;  %6480 = vmatprep.subr.bf16.mxu0 %v8912_v17  ;;  %v8945_v63 = vld [vmem:[%s9503_s14 + $0x8dc] ss:$120 sps:$4 sm:$0xff]   ;;  %v8940_v17 = vld [vmem:[%s9503_s14 + $0x8d0] ss:$120 sps:$4 sm:$0xff]  }
 0x6f1   : > { %v6375_v35 = vpop.f32.mrf.mxu1  ;;  %6521 = vmatprep.subr.bf16.mxu1 %v8915_v27  ;;  %v6335_v13 = vadd.f32 %v6334_v52, %v11997_v54  ;;  %v12092_v56 = vadd.f32 %v6373_v4, %v6333_v26  ;;  %v8916_v54 = vld [vmem:[%s9503_s14 + $0xc90] ss:$120 sps:$4 sm:$0xff]   ;;  %v8951_v4 = vld [vmem:[%s9503_s14 + $0x7ec] ss:$120 sps:$4 sm:$0xff]   ;;  %v8946_v52 = vld [vmem:[%s9503_s14 + $0x7e0] ss:$120 sps:$4 sm:$0xff]  }
 0x6f2   : > { %v6336_v57 = vpop.f32.mrf.mxu0  ;;  %v8943_v27 = vld [vmem:[%s9503_s14 + $0x8d8] ss:$120 sps:$4 sm:$0xff]  }
 0x6f3   : > { %v6377_v43 = vpop.f32.mrf.mxu1  ;;  %v12094_v1 = vadd.f32 %v6375_v35, %v6335_v13  ;;  %v3300_v26 = vld [vmem:[%s9503_s14 + $0xff0] sm:$0xff]  ;;  %v8949_v35 = vld [vmem:[%s9503_s14 + $0x7e8] ss:$120 sps:$4 sm:$0xff]   ;;  %v8955_v13 = vld [vmem:[%s9503_s14 + $0x704] ss:$120 sps:$4 sm:$0xff]  }
 0x6f4   : > { %v6337_v30 = vpop.f32.mrf.mxu0  ;;  %v8103_v57 = vcombine.high %v3300_v26, %v3300_v26  ;;  %v12125_v43 = vld.sshfl [vmem:[%s11491_s19 + $0x38] sm:$0x33 pattern:$0x76325410] }
 0x6f5   : > { %v6378_v3 = vpop.f32.mrf.mxu1  ;;  %v12135_v30 = vpack.c.bf16 %v12032_v47, %v12032_v47  ;;  %v8958_v47 = vld [vmem:[%s9503_s14 + $0x610] ss:$120 sps:$4 sm:$0xff]  }
 0x6f6   : > { %v8953_v3 = vld [vmem:[%s9503_s14 + $0x700] ss:$120 sps:$4 sm:$0xff]  }
 0x6f7   : > { %6481 = vmatpush2.bf16.xpose.msra.mxu0 %v8910_v42  ;;  %v2728_v42 = vcombine.high %v12125_v43, %v12125_v43 }
 0x6f8   : > { %6522 = vmatpush2.bf16.xpose.msra.mxu1 %v8913_v22  ;;  %6482 = vmatprep.subr.bf16.mxu0 %v8918_v58  ;;  %v12131_v22 = vpack.c.bf16 %v12029_v38, %v12029_v38  ;;  %v8102_v58 = vcombine.low %v3300_v26, %v3300_v26  ;;  %v3301_v38 = vld [vmem:[%s9503_s14 + $0xff8] sm:$0xff] }
 0x6f9   : > { %6523 = vmatprep.subr.bf16.mxu1 %v8921_v34  ;;  %v8960_v34 = vld [vmem:[%s9503_s14 + $0x614] ss:$120 sps:$4 sm:$0xff]  }
 0x6ff   : > { %6483 = vmatpush2.bf16.xpose.msra.mxu0 %v8916_v54  ;;  %v8963_v54 = vld [vmem:[%s9503_s14 + $0xf04] ss:$120 sps:$4 sm:$0xff]  }
 0x700   : > { %6524 = vmatpush2.bf16.xpose.msra.mxu1 %v8919_v31  ;;  %6484 = vmatprep.subr.bf16.mxu0 %v8924_v41  ;;  %v12140_v31 = vpack.c.bf16 %v2728_v42, %v2728_v42  ;;  %v8961_v41 = vld [vmem:[%s9503_s14 + $0xf00] ss:$120 sps:$4 sm:$0xff]   ;;  %v8999_v42 = vld [vmem:[%s9503_s14 + $0xe84] ss:$120 sps:$4 sm:$0xff]  }
 0x701   : > { %6525 = vmatprep.subr.bf16.mxu1 %v8927_v28  ;;  %v8966_v28 = vld [vmem:[%s9503_s14 + $0x524] ss:$120 sps:$4 sm:$0xff]  }
 0x707   : > { %6485 = vmatpush2.bf16.xpose.msra.mxu0 %v8922_v2  ;;  %v8105_v2 = vcombine.high %v3301_v38, %v3301_v38 }
 0x708   : > { %6526 = vmatpush2.bf16.xpose.msra.mxu1 %v8925_v51  ;;  %6486 = vmatprep.subr.bf16.mxu0 %v8930_v6  ;;  %v8964_v51 = vld [vmem:[%s9503_s14 + $0x520] ss:$120 sps:$4 sm:$0xff]   ;;  %v8104_v6 = vcombine.low %v3301_v38, %v3301_v38 }
 0x709   : > { %6527 = vmatprep.subr.bf16.mxu1 %v8933_v10  ;;  %v8971_v10 = vld [vmem:[%s9503_s14 + $0x434] ss:$120 sps:$4 sm:$0xff]  }
 0x70f   : > { %6487 = vmatpush2.bf16.xpose.msra.mxu0 %v8928_v12  ;;  %v8974_v12 = vld [vmem:[%s9503_s14 + $0xf0c] ss:$120 sps:$4 sm:$0xff]  }
 0x710   : > { %6528 = vmatpush2.bf16.xpose.msra.mxu1 %v8931_v59  ;;  %6488 = vmatprep.subr.bf16.mxu0 %v8936_v8  ;;  %v8969_v59 = vld [vmem:[%s9503_s14 + $0x430] ss:$120 sps:$4 sm:$0xff]  }
 0x711   : > { %6529 = vmatprep.subr.bf16.mxu1 %v8939_v36  ;;  %v8972_v8 = vld [vmem:[%s9503_s14 + $0xf08] ss:$120 sps:$4 sm:$0xff]   ;;  %v8977_v36 = vld [vmem:[%s9503_s14 + $0x344] ss:$120 sps:$4 sm:$0xff]  }
 0x717   : > { %6489 = vmatpush2.bf16.xpose.msra.mxu0 %v8934_v16 }
 0x718   : > { %6530 = vmatpush2.bf16.xpose.msra.mxu1 %v8937_v48  ;;  %6490 = vmatprep.subr.bf16.mxu0 %v8942_v18  ;;  %v8982_v18 = vld [vmem:[%s9503_s14 + $0x254] ss:$120 sps:$4 sm:$0xff]  }
 0x719   : > { %6531 = vmatprep.subr.bf16.mxu1 %v8945_v63  ;;  %v8985_v63 = vld [vmem:[%s9503_s14 + $0xf14] ss:$120 sps:$4 sm:$0xff]  }
 0x71f   : > { %6491 = vmatpush2.bf16.xpose.msra.mxu0 %v8940_v17  ;;  %v8980_v17 = vld [vmem:[%s9503_s14 + $0x250] ss:$120 sps:$4 sm:$0xff]  }
 0x720   : > { %6532 = vmatpush2.bf16.xpose.msra.mxu1 %v8943_v27  ;;  %6492 = vmatprep.subr.bf16.mxu0 %v8948_v15  ;;  %v8983_v27 = vld [vmem:[%s9503_s14 + $0xf10] ss:$120 sps:$4 sm:$0xff]   ;;  %v8988_v15 = vld [vmem:[%s9503_s14 + $0x164] ss:$120 sps:$4 sm:$0xff]  }
 0x721   : > { %6533 = vmatprep.subr.bf16.mxu1 %v8951_v4 }
 0x727   : > { %6493 = vmatpush2.bf16.xpose.msra.mxu0 %v8946_v52  ;;  %v8993_v52 = vld [vmem:[%s9503_s14 + $0x74] ss:$120 sps:$4 sm:$0xff]  }
 0x728   : > { %6534 = vmatpush2.bf16.xpose.msra.mxu1 %v8949_v35  ;;  %6544 = vmatprep.subr.bf16.mxu0 %v8955_v13  ;;  %v8996_v35 = vld [vmem:[%s9503_s14 + $0xf1c] ss:$120 sps:$4 sm:$0xff]   ;;  %v8991_v13 = vld [vmem:[%s9503_s14 + $0x70] ss:$120 sps:$4 sm:$0xff]  }
 0x729   : > { %6597 = vmatprep.subr.bf16.mxu1 %v8103_v57  ;;  %v8994_v57 = vld [vmem:[%s9503_s14 + $0xf18] ss:$120 sps:$4 sm:$0xff]  }
 0x72e   : > { %6495 = vmatmul.mubr.bf16.vlgmr.msra.gmra.mxu0 %v12131_v22 }
 0x72f   : > { %6536 = vmatmul.mubr.bf16.vlgmr.msra.gmra.mxu1 %v12135_v30  ;;  %6545 = vmatpush1.bf16.xpose.msra.mxu0 %v8953_v3 }
 0x730   : > { %6598 = vmatpush1.bf16.xpose.msra.mxu1 %v8102_v58  ;;  %6546 = vmatprep.subr.bf16.mxu0 %v8960_v34  ;;  %v8997_v58 = vld [vmem:[%s9503_s14 + $0xe80] ss:$120 sps:$4 sm:$0xff]  }
 0x731   : > { %6599 = vmatprep.subr.bf16.mxu1 %v8963_v54  ;;  %6617 = vmatprep.mubr.bf16.mxu1 %v11503_v55  ;;  %v3302_v55 = vld [vmem:[%s9503_s14 + $0x1000] sm:$0xff] }
 0x732   : > { %6576 = vmatprep.mubr.bf16.mxu0 %v12140_v31  ;;  %v8107_v16 = vcombine.high %v3302_v55, %v3302_v55  ;;  %v8106_v48 = vcombine.low %v3302_v55, %v3302_v55  ;;  %v9007_v54 = vld [vmem:[%s9503_s14 + $0xf24] ss:$120 sps:$4 sm:$0xff]   ;;  %v9005_v55 = vld [vmem:[%s9503_s14 + $0xf20] ss:$120 sps:$4 sm:$0xff]  }
 0x737   : > { %6547 = vmatpush1.bf16.xpose.msra.mxu0 %v8958_v47 }
 0x738   : > { %6600 = vmatpush1.bf16.xpose.msra.mxu1 %v8961_v41  ;;  %6548 = vmatprep.subr.bf16.mxu0 %v8966_v28 }
 0x739   : > { %6637 = vmatprep.subr.bf16.mxu1 %v8105_v2 }
 0x73f   : > { %6618 = vmatmul.mubr.bf16.vlgmr.msra.gmra.mxu1 %v11563_v11  ;;  %6549 = vmatpush1.bf16.xpose.msra.mxu0 %v8964_v51  ;;  %v8975_v11 = vld [vmem:[%s9503_s14 + $0x340] ss:$120 sps:$4 sm:$0xff]  }
 0x740   : > { %6638 = vmatpush1.bf16.xpose.msra.mxu1 %v8104_v6  ;;  %6550 = vmatprep.subr.bf16.mxu0 %v8971_v10 }
 0x741   : > { %6639 = vmatprep.subr.bf16.mxu1 %v8974_v12  ;;  %6657 = vmatprep.mubr.bf16.mxu1 %v11511_v24  ;;  %v3303_v24 = vld [vmem:[%s9503_s14 + $0x1008] sm:$0xff] }
 0x742   : > { %v8109_v4 = vcombine.high %v3303_v24, %v3303_v24  ;;  %v8108_v26 = vcombine.low %v3303_v24, %v3303_v24  ;;  %v9002_v12 = vld [vmem:[%s9503_s14 + $0xd90] ss:$120 sps:$4 sm:$0xff]  }
 0x743   : > { %v9016_v24 = vld [vmem:[%s9503_s14 + $0xf28] ss:$120 sps:$4 sm:$0xff]  }
 0x747   : > { %6551 = vmatpush1.bf16.xpose.msra.mxu0 %v8969_v59 }
 0x748   : > { %6640 = vmatpush1.bf16.xpose.msra.mxu1 %v8972_v8  ;;  %6552 = vmatprep.subr.bf16.mxu0 %v8977_v36  ;;  %v9010_v36 = vld [vmem:[%s9503_s14 + $0xca4] ss:$120 sps:$4 sm:$0xff]  }
 0x749   : > { %6677 = vmatprep.subr.bf16.mxu1 %v8107_v16 }
 0x74f   : > { %6658 = vmatmul.mubr.bf16.vlgmr.msra.gmra.mxu1 %v11567_v53  ;;  %6553 = vmatpush1.bf16.xpose.msra.mxu0 %v8975_v11  ;;  %v8986_v53 = vld [vmem:[%s9503_s14 + $0x160] ss:$120 sps:$4 sm:$0xff]   ;;  %v9015_v11 = vld [vmem:[%s9503_s14 + $0xbb4] ss:$120 sps:$4 sm:$0xff]  }
 0x750   : > { %6678 = vmatpush1.bf16.xpose.msra.mxu1 %v8106_v48  ;;  %6554 = vmatprep.subr.bf16.mxu0 %v8982_v18  ;;  %v9018_v48 = vld [vmem:[%s9503_s14 + $0xf2c] ss:$120 sps:$4 sm:$0xff]  }
 0x751   : > { %6679 = vmatprep.subr.bf16.mxu1 %v8985_v63  ;;  %6697 = vmatprep.mubr.bf16.mxu1 %v11573_v9  ;;  %v3304_v9 = vld [vmem:[%s9503_s14 + $0x1010] sm:$0xff]  ;;  %v3306_v18 = vld [vmem:[%s9503_s14 + $0x1020] sm:$0xff] }
 0x752   : > { %v8111_v3 = vcombine.high %v3304_v9, %v3304_v9  ;;  %v8110_v34 = vcombine.low %v3304_v9, %v3304_v9  ;;  %v9013_v63 = vld [vmem:[%s9503_s14 + $0xbb0] ss:$120 sps:$4 sm:$0xff]  }
 0x757   : > { %6555 = vmatpush1.bf16.xpose.msra.mxu0 %v8980_v17  ;;  %v9021_v17 = vld [vmem:[%s9503_s14 + $0xac4] ss:$120 sps:$4 sm:$0xff]  }
 0x758   : > { %6680 = vmatpush1.bf16.xpose.msra.mxu1 %v8983_v27  ;;  %6556 = vmatprep.subr.bf16.mxu0 %v8988_v15  ;;  %v8115_v27 = vcombine.high %v3306_v18, %v3306_v18  ;;  %v8114_v15 = vcombine.low %v3306_v18, %v3306_v18  ;;  %v9075_v18 = vld [vmem:[%s9503_s14 + $0xf74] ss:$120 sps:$4 sm:$0xff]  }
 0x759   : > { %6717 = vmatprep.subr.bf16.mxu1 %v8109_v4  ;;  %v9026_v4 = vld [vmem:[%s9503_s14 + $0x9d4] ss:$120 sps:$4 sm:$0xff]  }
 0x75f   : > { %6698 = vmatmul.mubr.bf16.vlgmr.msra.gmra.mxu1 %v11652_v21  ;;  %6557 = vmatpush1.bf16.xpose.msra.mxu0 %v8986_v53  ;;  %v9004_v21 = vld [vmem:[%s9503_s14 + $0xd94] ss:$120 sps:$4 sm:$0xff]  }
 0x760   : > { %6718 = vmatpush1.bf16.xpose.msra.mxu1 %v8108_v26  ;;  %6558 = vmatprep.subr.bf16.mxu0 %v8993_v52  ;;  %v9029_v53 = vld [vmem:[%s9503_s14 + $0xf34] ss:$120 sps:$4 sm:$0xff]   ;;  %v9024_v26 = vld [vmem:[%s9503_s14 + $0x9d0] ss:$120 sps:$4 sm:$0xff]  }
 0x761   : > { %6719 = vmatprep.subr.bf16.mxu1 %v8996_v35  ;;  %6737 = vmatprep.mubr.bf16.mxu1 %v11575_v60  ;;  %v9027_v52 = vld [vmem:[%s9503_s14 + $0xf30] ss:$120 sps:$4 sm:$0xff]   ;;  %v9032_v35 = vld [vmem:[%s9503_s14 + $0x8e4] ss:$120 sps:$4 sm:$0xff]  }
 0x767   : > { %6559 = vmatpush1.bf16.xpose.msra.mxu0 %v8991_v13 }
 0x768   : > { %6720 = vmatpush1.bf16.xpose.msra.mxu1 %v8994_v57  ;;  %6560 = vmatprep.subr.bf16.mxu0 %v8999_v42  ;;  %v9037_v57 = vld [vmem:[%s9503_s14 + $0x7f4] ss:$120 sps:$4 sm:$0xff]  }
 0x769   : > { %6757 = vmatprep.subr.bf16.mxu1 %v8111_v3  ;;  %v9040_v42 = vld [vmem:[%s9503_s14 + $0xf3c] ss:$120 sps:$4 sm:$0xff]  }
 0x76a   : > { %v3309_v3 = vld [vmem:[%s9503_s14 + $0x1038] sm:$0xff] }
 0x76e   : > { %v6414_v38 = vpop.f32.mrf.mxu0 }
 0x76f   : > { %6738 = vmatmul.mubr.bf16.vlgmr.msra.gmra.mxu1 %v11656_v7  ;;  %v6455_v47 = vpop.f32.mrf.mxu1  ;;  %v6415_v60 = vadd.f32 %v6414_v38, %v12092_v56  ;;  %6561 = vmatpush2.bf16.xpose.msra.mxu0 %v8997_v58  ;;  %v3305_v7 = vld [vmem:[%s9503_s14 + $0x1018] sm:$0xff]  ;;  %v9035_v58 = vld [vmem:[%s9503_s14 + $0x7f0] ss:$120 sps:$4 sm:$0xff]  }
 0x770   : > { %6758 = vmatpush1.bf16.xpose.msra.mxu1 %v8110_v34  ;;  %v6416_v41 = vpop.f32.mrf.mxu0  ;;  %6562 = vmatprep.subr.bf16.mxu0 %v9004_v21  ;;  %v8113_v16 = vcombine.high %v3305_v7, %v3305_v7  ;;  %v9038_v34 = vld [vmem:[%s9503_s14 + $0xf38] ss:$120 sps:$4 sm:$0xff]  }
 0x771   : > { %v6457_v28 = vpop.f32.mrf.mxu1  ;;  %6759 = vmatprep.subr.bf16.mxu1 %v9007_v54  ;;  %v6417_v2 = vadd.f32 %v6416_v41, %v12094_v1  ;;  %v12183_v51 = vadd.f32 %v6455_v47, %v6415_v60  ;;  %6777 = vmatprep.mubr.bf16.mxu1 %v11664_v46  ;;  %v9008_v46 = vld [vmem:[%s9503_s14 + $0xca0] ss:$120 sps:$4 sm:$0xff]   ;;  %v8112_v1 = vcombine.low %v3305_v7, %v3305_v7  ;;  %v9047_v47 = vld [vmem:[%s9503_s14 + $0xf44] ss:$120 sps:$4 sm:$0xff]  }
 0x772   : > { %v6418_v6 = vpop.f32.mrf.mxu0  ;;  %v8121_v54 = vcombine.high %v3309_v3, %v3309_v3  ;;  %v9050_v60 = vld [vmem:[%s9503_s14 + $0xf4c] ss:$120 sps:$4 sm:$0xff]  }
 0x773   : > { %v6459_v10 = vpop.f32.mrf.mxu1  ;;  %v12187_v56 = vadd.f32 %v6457_v28, %v6417_v2  ;;  %v3310_v41 = vld [vmem:[%s9503_s14 + $0x1040] sm:$0xff] }
 0x774   : > { %v6419_v59 = vpop.f32.mrf.mxu0  ;;  %v9045_v28 = vld [vmem:[%s9503_s14 + $0xf40] ss:$120 sps:$4 sm:$0xff]   ;;  %v8123_v7 = vcombine.high %v3310_v41, %v3310_v41 }
 0x775   : > { %v6460_v8 = vpop.f32.mrf.mxu1  ;;  %v9048_v2 = vld [vmem:[%s9503_s14 + $0xf48] ss:$120 sps:$4 sm:$0xff]  }
 0x776   : > { %v9055_v59 = vld [vmem:[%s9503_s14 + $0xf50] ss:$120 sps:$4 sm:$0xff]  }
 0x777   : > { %6563 = vmatpush2.bf16.xpose.msra.mxu0 %v9002_v12  ;;  %v9057_v12 = vld [vmem:[%s9503_s14 + $0xf54] ss:$120 sps:$4 sm:$0xff]   ;;  %v9058_v8 = vld [vmem:[%s9503_s14 + $0xf58] ss:$120 sps:$4 sm:$0xff]  }
 0x778   : > { %6760 = vmatpush1.bf16.xpose.msra.mxu1 %v9005_v55  ;;  %6564 = vmatprep.subr.bf16.mxu0 %v9010_v36  ;;  %v3313_v55 = vld [vmem:[%s9503_s14 + $0x1058] sm:$0xff] }
 0x779   : > { %6797 = vmatprep.subr.bf16.mxu1 %v8113_v16  ;;  %v8129_v16 = vcombine.high %v3313_v55, %v3313_v55 }
 0x77f   : > { %6778 = vmatmul.mubr.bf16.vlgmr.msra.gmra.mxu1 %v11747_v33  ;;  %6565 = vmatpush2.bf16.xpose.msra.mxu0 %v9008_v46  ;;  %v9019_v33 = vld [vmem:[%s9503_s14 + $0xac0] ss:$120 sps:$4 sm:$0xff]   ;;  %v9067_v46 = vld [vmem:[%s9503_s14 + $0xf64] ss:$120 sps:$4 sm:$0xff]  }
 0x780   : > { %6798 = vmatpush1.bf16.xpose.msra.mxu1 %v8112_v1  ;;  %6566 = vmatprep.subr.bf16.mxu0 %v9015_v11  ;;  %v9070_v1 = vld [vmem:[%s9503_s14 + $0xf6c] ss:$120 sps:$4 sm:$0xff]   ;;  %v9068_v11 = vld [vmem:[%s9503_s14 + $0xf68] ss:$120 sps:$4 sm:$0xff]  }
 0x781   : > { %6799 = vmatprep.subr.bf16.mxu1 %v9018_v48  ;;  %6817 = vmatprep.mubr.bf16.mxu1 %v11666_v5  ;;  %v3307_v5 = vld [vmem:[%s9503_s14 + $0x1028] sm:$0xff] }
 0x782   : > { %v8117_v9 = vcombine.high %v3307_v5, %v3307_v5  ;;  %v8116_v13 = vcombine.low %v3307_v5, %v3307_v5 }
 0x787   : > { %6567 = vmatpush2.bf16.xpose.msra.mxu0 %v9013_v63 }
 0x788   : > { %6800 = vmatpush1.bf16.xpose.msra.mxu1 %v9016_v24  ;;  %6568 = vmatprep.subr.bf16.mxu0 %v9021_v17 }
 0x789   : > { %6837 = vmatprep.subr.bf16.mxu1 %v8115_v27 }
 0x78f   : > { %6818 = vmatmul.mubr.bf16.vlgmr.msra.gmra.mxu1 %v11751_v37  ;;  %6569 = vmatpush2.bf16.xpose.msra.mxu0 %v9019_v33  ;;  %v9030_v37 = vld [vmem:[%s9503_s14 + $0x8e0] ss:$120 sps:$4 sm:$0xff]  }
 0x790   : > { %6838 = vmatpush1.bf16.xpose.msra.mxu1 %v8114_v15  ;;  %6570 = vmatprep.subr.bf16.mxu0 %v9026_v4 }
 0x791   : > { %6839 = vmatprep.subr.bf16.mxu1 %v9029_v53  ;;  %6857 = vmatprep.mubr.bf16.mxu1 %v11759_v29  ;;  %v3308_v29 = vld [vmem:[%s9503_s14 + $0x1030] sm:$0xff] }
 0x792   : > { %v8119_v21 = vcombine.high %v3308_v29, %v3308_v29  ;;  %v8118_v38 = vcombine.low %v3308_v29, %v3308_v29 }
 0x797   : > { %6571 = vmatpush2.bf16.xpose.msra.mxu0 %v9024_v26 }
 0x798   : > { %6840 = vmatpush1.bf16.xpose.msra.mxu1 %v9027_v52  ;;  %6572 = vmatprep.subr.bf16.mxu0 %v9032_v35 }
 0x799   : > { %6877 = vmatprep.subr.bf16.mxu1 %v8117_v9 }
 0x79f   : > { %6858 = vmatmul.mubr.bf16.vlgmr.msra.gmra.mxu1 %v11844_v44  ;;  %6573 = vmatpush2.bf16.xpose.msra.mxu0 %v9030_v37  ;;  %v12221_v44 = vpack.c.bf16 %v12125_v43, %v12125_v43  ;;  %v3311_v43 = vld [vmem:[%s9503_s14 + $0x1048] sm:$0xff] }
 0x7a0   : > { %6878 = vmatpush1.bf16.xpose.msra.mxu1 %v8116_v13  ;;  %6574 = vmatprep.subr.bf16.mxu0 %v9037_v57  ;;  %v8125_v6 = vcombine.high %v3311_v43, %v3311_v43  ;;  %v8124_v10 = vcombine.low %v3311_v43, %v3311_v43 }
 0x7a1   : > { %6879 = vmatprep.subr.bf16.mxu1 %v9040_v42  ;;  %6897 = vmatprep.mubr.bf16.mxu1 %v11761_v23  ;;  %v8120_v23 = vcombine.low %v3309_v3, %v3309_v3 }
 0x7a7   : > { %6575 = vmatpush2.bf16.xpose.msra.mxu0 %v9035_v58 }
 0x7a8   : > { %6880 = vmatpush1.bf16.xpose.msra.mxu1 %v9038_v34  ;;  %6917 = vmatprep.subr.bf16.mxu0 %v8119_v21 }
 0x7a9   : > { %6957 = vmatprep.subr.bf16.mxu1 %v8121_v54 }
 0x7ae   : > { %6577 = vmatmul.mubr.bf16.vlgmr.msra.gmra.mxu0 %v12221_v44 }
 0x7af   : > { %6898 = vmatmul.mubr.bf16.vlgmr.msra.gmra.mxu1 %v11848_v40  ;;  %6918 = vmatpush1.bf16.xpose.msra.mxu0 %v8118_v38  ;;  %v8122_v40 = vcombine.low %v3310_v41, %v3310_v41 }
 0x7b0   : > { %6958 = vmatpush1.bf16.xpose.msra.mxu1 %v8120_v23  ;;  %6919 = vmatprep.subr.bf16.mxu0 %v9047_v47 }
 0x7b1   : > { %6959 = vmatprep.subr.bf16.mxu1 %v9050_v60  ;;  %6937 = vmatprep.mubr.bf16.mxu0 %v11856_v25  ;;  %v9060_v25 = vld [vmem:[%s9503_s14 + $0xf5c] ss:$120 sps:$4 sm:$0xff]  }
 0x7b2   : > { %6977 = vmatprep.mubr.bf16.mxu1 %v11858_v39  ;;  %v3312_v39 = vld [vmem:[%s9503_s14 + $0x1050] sm:$0xff] }
 0x7b3   : > { %v8127_v36 = vcombine.high %v3312_v39, %v3312_v39 }
 0x7b7   : > { %6920 = vmatpush1.bf16.xpose.msra.mxu0 %v9045_v28 }
 0x7b8   : > { %6960 = vmatpush1.bf16.xpose.msra.mxu1 %v9048_v2  ;;  %6997 = vmatprep.subr.bf16.mxu0 %v8123_v7 }
 0x7b9   : > { %7037 = vmatprep.subr.bf16.mxu1 %v8125_v6 }
 0x7be   : > { %6938 = vmatmul.mubr.bf16.vlgmr.msra.gmra.mxu0 %v11941_v0  ;;  %v8126_v0 = vcombine.low %v3312_v39, %v3312_v39 }
 0x7bf   : > { %6978 = vmatmul.mubr.bf16.vlgmr.msra.gmra.mxu1 %v11945_v49  ;;  %6998 = vmatpush1.bf16.xpose.msra.mxu0 %v8122_v40  ;;  %v8128_v49 = vcombine.low %v3313_v55, %v3313_v55 }
 0x7c0   : > { %7038 = vmatpush1.bf16.xpose.msra.mxu1 %v8124_v10  ;;  %6999 = vmatprep.subr.bf16.mxu0 %v9057_v12 }
 0x7c1   : > { %7039 = vmatprep.subr.bf16.mxu1 %v9060_v25  ;;  %7017 = vmatprep.mubr.bf16.mxu0 %v11953_v19  ;;  %v3314_v19 = vld [vmem:[%s9503_s14 + $0x1060] sm:$0xff] }
 0x7c2   : > { %7057 = vmatprep.mubr.bf16.mxu1 %v11955_v61  ;;  %v9065_v61 = vld [vmem:[%s9503_s14 + $0xf60] ss:$120 sps:$4 sm:$0xff]   ;;  %v8131_v48 = vcombine.high %v3314_v19, %v3314_v19 }
 0x7c7   : > { %7000 = vmatpush1.bf16.xpose.msra.mxu0 %v9055_v59 }
 0x7c8   : > { %7040 = vmatpush1.bf16.xpose.msra.mxu1 %v9058_v8  ;;  %7077 = vmatprep.subr.bf16.mxu0 %v8127_v36 }
 0x7c9   : > { %7117 = vmatprep.subr.bf16.mxu1 %v8129_v16 }
 0x7ce   : > { %7018 = vmatmul.mubr.bf16.vlgmr.msra.gmra.mxu0 %v12038_v62  ;;  %v8130_v62 = vcombine.low %v3314_v19, %v3314_v19 }
 0x7cf   : > { %7058 = vmatmul.mubr.bf16.vlgmr.msra.gmra.mxu1 %v12042_v45  ;;  %7078 = vmatpush1.bf16.xpose.msra.mxu0 %v8126_v0  ;;  %v9073_v45 = vld [vmem:[%s9503_s14 + $0xf70] ss:$120 sps:$4 sm:$0xff]  }
 0x7d0   : > { %7118 = vmatpush1.bf16.xpose.msra.mxu1 %v8128_v49  ;;  %7079 = vmatprep.subr.bf16.mxu0 %v9067_v46 }
 0x7d1   : > { %7119 = vmatprep.subr.bf16.mxu1 %v9070_v1  ;;  %7097 = vmatprep.mubr.bf16.mxu0 %v12050_v50 }
 0x7d2   : > { %7137 = vmatprep.mubr.bf16.mxu1 %v12052_v20 }
 0x7d7   : > { %7080 = vmatpush1.bf16.xpose.msra.mxu0 %v9065_v61 }
 0x7d8   : > { %7120 = vmatpush1.bf16.xpose.msra.mxu1 %v9068_v11  ;;  %7157 = vmatprep.subr.bf16.mxu0 %v8131_v48 }
 0x7de   : > { %7098 = vmatmul.mubr.bf16.vlgmr.msra.gmra.mxu0 %v12131_v22 }
 0x7df   : > { %7138 = vmatmul.mubr.bf16.vlgmr.msra.gmra.mxu1 %v12135_v30  ;;  %7158 = vmatpush1.bf16.xpose.msra.mxu0 %v8130_v62 }
 0x7e0   : > { %7177 = vmatprep.mubr.bf16.mxu0 %v12140_v31  ;;  %7159 = vmatprep.subr.bf16.mxu0 %v9075_v18 }
 0x7e7   : > { %7160 = vmatpush1.bf16.xpose.msra.mxu0 %v9073_v45 }
 0x7ee   : > { %v6496_v50 = vpop.f32.mrf.mxu0  ;;  %7178 = vmatmul.mubr.bf16.vlgmr.msra.gmra.mxu0 %v12221_v44 }
 0x7ef   : > { %v6537_v20 = vpop.f32.mrf.mxu1  ;;  %v6497_v63 = vadd.f32 %v6496_v50, %v12183_v51 }
 0x7f0   : > { %v6498_v24 = vpop.f32.mrf.mxu0 }
 0x7f1   : > { %v6539_v17 = vpop.f32.mrf.mxu1  ;;  %v6499_v27 = vadd.f32 %v6498_v24, %v12187_v56  ;;  %v6538_v33 = vadd.f32 %v6537_v20, %v6497_v63 }
 0x7f2   : > { %v6500_v22 = vpop.f32.mrf.mxu0 }
 0x7f3   : > { %v6541_v15 = vpop.f32.mrf.mxu1  ;;  %v6540_v30 = vadd.f32 %v6539_v17, %v6499_v27 }
 0x7f4   : > { %v6501_v4 = vpop.f32.mrf.mxu0 }
 0x7f5   : > { %v6542_v53 = vpop.f32.mrf.mxu1 }
 0x7ff   : > { %v6619_v31 = vpop.f32.mrf.mxu1 }
 0x801   : > { %v6621_v5 = vpop.f32.mrf.mxu1 }
 0x803   : > { %v6622_v26 = vpop.f32.mrf.mxu1 }
 0x805   : > { %v6623_v52 = vpop.f32.mrf.mxu1 }
 0x80f   : > { %v6659_v35 = vpop.f32.mrf.mxu1 }
 0x810   : > { %v6660_v9 = vadd.f32 %v6659_v35, %v6619_v31 }
 0x811   : > { %v6661_v37 = vpop.f32.mrf.mxu1 }
 0x813   : > { %v6662_v13 = vpop.f32.mrf.mxu1 }
 0x815   : > { %v6663_v57 = vpop.f32.mrf.mxu1 }
 0x81f   : > { %v6699_v51 = vpop.f32.mrf.mxu1 }
 0x820   : > { %v6700_v42 = vadd.f32 %v6699_v51, %v6660_v9 }
 0x821   : > { %v6701_v29 = vpop.f32.mrf.mxu1 }
 0x823   : > { %v6702_v3 = vpop.f32.mrf.mxu1 }
 0x825   : > { %v6703_v56 = vpop.f32.mrf.mxu1 }
 0x82f   : > { %v6739_v58 = vpop.f32.mrf.mxu1 }
 0x830   : > { %v6740_v34 = vadd.f32 %v6739_v58, %v6700_v42 }
 0x831   : > { %v6741_v21 = vpop.f32.mrf.mxu1 }
 0x833   : > { %v6742_v54 = vpop.f32.mrf.mxu1 }
 0x835   : > { %v6743_v44 = vpop.f32.mrf.mxu1 }
 0x83f   : > { %v6779_v38 = vpop.f32.mrf.mxu1 }
 0x840   : > { %v6780_v23 = vadd.f32 %v6779_v38, %v6740_v34  ;;  %v2789_v38 = vld [vmem:[#allocation3] sm:$0x3f] }
 0x841   : > { %v6781_v47 = vpop.f32.mrf.mxu1 }
 0x843   : > { %v6782_v60 = vpop.f32.mrf.mxu1 }
 0x845   : > { %v6783_v41 = vpop.f32.mrf.mxu1 }
 0x84f   : > { %v6819_v43 = vpop.f32.mrf.mxu1 }
 0x850   : > { %v6820_v28 = vadd.f32 %v6819_v43, %v6780_v23 }
 0x851   : > { %v6821_v2 = vpop.f32.mrf.mxu1 }
 0x853   : > { %v6822_v7 = vpop.f32.mrf.mxu1 }
 0x855   : > { %v6823_v6 = vpop.f32.mrf.mxu1 }
 0x85f   : > { %v6859_v40 = vpop.f32.mrf.mxu1 }
 0x860   : > { %v6860_v10 = vadd.f32 %v6859_v40, %v6820_v28 }
 0x861   : > { %v6861_v12 = vpop.f32.mrf.mxu1 }
 0x863   : > { %v6862_v25 = vpop.f32.mrf.mxu1 }
 0x865   : > { %v6863_v39 = vpop.f32.mrf.mxu1 }
 0x86e   : > { %v6578_v55 = vpop.f32.mrf.mxu0 }
 0x86f   : > { %v6899_v59 = vpop.f32.mrf.mxu1  ;;  %v6579_v16 = vadd.f32 %v6578_v55, %v6538_v33 }
 0x870   : > { %v6580_v8 = vpop.f32.mrf.mxu0  ;;  %v6900_v53 = vadd.f32 %v6899_v59, %v6860_v10 }
 0x871   : > { %v6901_v36 = vpop.f32.mrf.mxu1  ;;  %v6581_v0 = vadd.f32 %v6580_v8, %v6540_v30 }
 0x872   : > { %v6582_v49 = vpop.f32.mrf.mxu0 }
 0x873   : > { %v6902_v46 = vpop.f32.mrf.mxu1  ;;  %v7188_v1 = vcombine.low %v6579_v16, %v6581_v0 }
 0x874   : > { %v6583_v19 = vpop.f32.mrf.mxu0 }
 0x875   : > { %v6903_v61 = vpop.f32.mrf.mxu1  ;;  %v7195_v54 = vrot.slane %v7188_v1, %v11487_v14 }
 0x87e   : > { %v6939_v11 = vpop.f32.mrf.mxu0 }
 0x87f   : > { %v6979_v48 = vpop.f32.mrf.mxu1  ;;  %v6940_v31 = vadd.f32 %v6939_v11, %v6900_v53 }
 0x880   : > { %v6941_v62 = vpop.f32.mrf.mxu0 }
 0x881   : > { %v6981_v18 = vpop.f32.mrf.mxu1  ;;  %v6980_v9 = vadd.f32 %v6979_v48, %v6940_v31 }
 0x882   : > { %v6942_v45 = vpop.f32.mrf.mxu0 }
 0x883   : > { %v6982_v50 = vpop.f32.mrf.mxu1 }
 0x884   : > { %v6943_v20 = vpop.f32.mrf.mxu0 }
 0x885   : > { %v6983_v63 = vpop.f32.mrf.mxu1 }
 0x88e   : > { %v7019_v24 = vpop.f32.mrf.mxu0 }
 0x88f   : > { %v7059_v17 = vpop.f32.mrf.mxu1  ;;  %v7020_v57 = vadd.f32 %v7019_v24, %v6980_v9 }
 0x890   : > { %v7021_v27 = vpop.f32.mrf.mxu0 }
 0x891   : > { %v7061_v22 = vpop.f32.mrf.mxu1  ;;  %v7060_v29 = vadd.f32 %v7059_v17, %v7020_v57 }
 0x892   : > { %v7022_v15 = vpop.f32.mrf.mxu0 }
 0x893   : > { %v7062_v33 = vpop.f32.mrf.mxu1 }
 0x894   : > { %v7023_v30 = vpop.f32.mrf.mxu0 }
 0x895   : > { %v7063_v4 = vpop.f32.mrf.mxu1 }
 0x89e   : > { %v7099_v5 = vpop.f32.mrf.mxu0 }
 0x89f   : > { %v7139_v26 = vpop.f32.mrf.mxu1  ;;  %v7100_v3 = vadd.f32 %v7099_v5, %v7060_v29 }
 0x8a0   : > { %v7101_v52 = vpop.f32.mrf.mxu0 }
 0x8a1   : > { %v7141_v35 = vpop.f32.mrf.mxu1  ;;  %v7140_v56 = vadd.f32 %v7139_v26, %v7100_v3 }
 0x8a2   : > { %v7102_v37 = vpop.f32.mrf.mxu0 }
 0x8a3   : > { %v7142_v13 = vpop.f32.mrf.mxu1 }
 0x8a4   : > { %v7103_v51 = vpop.f32.mrf.mxu0 }
 0x8a5   : > { %v7143_v42 = vpop.f32.mrf.mxu1 }
 0x8ae   : > { %v7179_v58 = vpop.f32.mrf.mxu0 }
 0x8af   : > { %v7180_v34 = vadd.f32 %v7179_v58, %v7140_v56 }
 0x8b0   : > { %v7181_v21 = vpop.f32.mrf.mxu0 }
 0x8b1   : > { %v7202_v44 = vrot.slane %v7180_v34, %v11487_v14 }
 0x8b2   : > { %v7182_v23 = vpop.f32.mrf.mxu0 }
 0x8b3   : > { %v7203_v47 = vcombine.low %v7195_v54, %v7202_v44  ;;  %7215 = sbr.rel (%p8132_p3) target bundleno = 2762 (0xaca), region = 76 }
 0x8b4   : > { %v7183_v60 = vpop.f32.mrf.mxu0 }
 0x8b5   : > { %v7205_v41 = vadd.f32 %v7203_v47, %v2789_v38 }
 0x8b7   : > { %7211 = vst.msk [vmem:[#allocation3] sm:$0x3f] %vm7210_vm0, %v7205_v41 }
 0x8b8   : > { %v7254_v43 = vld [vmem:[#allocation10 + $0x20] sm:$0x3]  ;;  %v7253_v28 = vld [vmem:[#allocation10 + $0x18] sm:$0x3]  ;;  %vm7282_vm5 = vcmask 195584   ;;  %v9320_v2 = vmov 0.0  }
 0x8b9   : > { %7319 = vmatprep.subr.mxu0 %v7254_v43  ;;  %8146 = vmatprep.subr.mxu1 %v9320_v2  ;;  %v7255_v7 = vld [vmem:[#allocation10 + $0x28] sm:$0x3]  ;;  %v7221_v40 = vsub.s32 0, %v11482_v32  ;;  %v7225_v10 = vsub.s32 1, %v11482_v32  ;;  %v7217_v12 = vld [vmem:[#allocation9] sm:$0x7] }
 0x8ba   : > { %v7251_v6 = vld [vmem:[#allocation10 + $0x8] sm:$0xff]  ;;  %7320 = vmatpush1.xpose.msra.mxu0 %v7253_v28  ;;  %8147 = vmatpush3.xpose.msk.msra.mxu1 %vm7282_vm5, %v7255_v7  ;;  %v7229_v25 = vsub.s32 2, %v11482_v32  ;;  %v7250_v39 = vld [vmem:[#allocation10] sm:$0xff]  ;;  %v7252_v55 = vld [vmem:[#allocation10 + $0x10] sm:$0xff]  ;;  %vm9321_vm6 = vmmov 0   ;;  %vm7431_vm2 = vcmask 74752  }
 0x8bb   : > { %7321 = vmatprep.subr.mxu0 %v7251_v6  ;;  %8148 = vmatprep.subr.mxu1 %v9320_v2  ;;  %v7222_v59 = vrot.slane %v7217_v12, %v7221_v40  ;;  %v7226_v8 = vrot.slane %v7217_v12, %v7225_v10  ;;  %v8133_v18 = vld [vmem:[#allocation12] ss:$0 sm:$0xff] }
 0x8bc   : > { %v7230_v36 = vrot.slane %v7217_v12, %v7229_v25  ;;  %8150 = vmatprep.mubr.msk.f32.mxu1 %vm9321_vm6, %v9320_v2 }
 0x8bd   : > { %v7231_v16 = vcombine.low %v7222_v59, %v7226_v8 }
 0x8be   : > { %7322 = vmatpush1.xpose.msra.mxu0 %v7250_v39  ;;  %8149 = vmatpush3.xpose.msk.msra.mxu1 %vm7282_vm5, %v7252_v55  ;;  %v7245_v0 = vrot.slane %v7230_v36, %v11487_v14  ;;  %v7216_v46 = vld [vmem:[#allocation3] sm:$0x3f] }
 0x8bf   : > { %v7238_v49 = vrot.slane %v7231_v16, %v11487_v14 }
 0x8c1   : > { %v7246_v1 = vcombine.low %v7238_v49, %v7245_v0 }
 0x8c3   : > { %v7248_v32 = vadd.f32 %v7246_v1, %v7216_v46 }
 0x8c5   : > { %v7249_v19 = vmax.f32 %v7248_v32, 0.0 }
 0x8c7   : > { %v7264_v61 = vcombine.high %v7249_v19, %v7249_v19  ;;  %v7271_v11 = vrot.slane %v7249_v19, %v11487_v14 }
 0x8c9   : > { %v7278_v48 = vrot.slane %v7264_v61, %v11487_v14  ;;  %v7279_v62 = vcombine.high %v7271_v11, %v7271_v11 }
 0x8cb   : > { %7355 = vmatprep.mubr.f32.mxu0 %v7279_v62  ;;  %8151 = vmatmul.mubr.msk.f32.vlgmr.msra.gmra.mxu1 %vm7282_vm5, %v7278_v48 }
 0x8cc   : > { %7356 = vmatmul.mubr.f32.vlgmr.msra.gmra.mxu0 %v7271_v11 }
 0x98b   : > { %v7427_v45 = vpop.f32.mrf.mxu1 }
 0x98c   : > { %v7357_v50 = vpop.f32.mrf.mxu0 }
 0x98d   : > { %v7358_v20 = vadd.f32 %v8133_v18, %v7357_v50  ;;  %v8152_v63 = vpop.f32.mrf.mxu1 }
 0x98e   : > { %v7359_v24 = vpop.f32.mrf.mxu0 }
 0x98f   : > { %v7428_v17 = vadd.f32 %v7427_v45, %v7358_v20 }
 0x991   : > { %v7432_v27 = vsel %vm7431_vm2, %v7428_v17, -inf }
 0x992   : > { %7433 = vmax.xlane.f32.xlu0 %v7432_v27 }
 0xa1b   : > { %v7434_v22 = vpop.xlane.xlu0 %7433 }
 0xa1c   : > { %v7435_v15 = vsub.f32 %v7428_v17, %v7434_v22 }
 0xa1e   : > { %v7436_v33 = vmul.f32 1.442695, %v7435_v15 }
 0xa20   : > { %9076 = vpow2.f32 %v7436_v33 }
 0xa2d   : > { %v9077_v14 = vpop.eup %9076 }
 0xa2e   : > { %v7438_v30 = vsel %vm7431_vm2, %v9077_v14, 0.0 }
 0xa2f   : > { %7439 = vadd.xlane.f32.xlu0 %v7438_v30 }
 0xab8   : > { %v7440_v4 = vpop.xlane.xlu0 %7439 }
 0xab9   : > { %9078 = vrcp.f32 %v7440_v4 }
 0xac6   : > { %v9079_v53 = vpop.eup %9078 }
 0xac7   : > { %v7442_v31 = vmul.f32 %v9079_v53, %v9077_v14 }
 0xac9   : > { %7443 = vst.msk [vmem:[#allocation13] sm:$0x3] %vm7431_vm2, %v7442_v31 }
 0xaca PF: > { %p8203_p5 = scmp.eq.s32.totalorder %s9382_s28, 1  ;;  %s9322_s14 = smov [#allocation13]  }
 0xacb   : > { %s7451_s20 = sshll.u32 %s9322_s14, 4  ;;  %s7452_s20 = int_to_ptr.vmem [resolvable:$true] %s7451_s20 }
 0xacc   : > { %s9212_s17 = scalar_lea.vmem %s7452_s20, 32  ;;  %p9219_p8 = scmp.lt.s32.totalorder %s7452_s20, %s7452_s20 }
 0xacd   : > { %p9213_p9 = scmp.ne.s32.totalorder %s7452_s20, %s9212_s17  ;;  %p9220_p0 = scmp.lt.s32.totalorder %s9212_s17, %s9212_s17 }
 0xacf   : > { %p9214_p1 = pnand %p9213_p9, %p8203_p5  ;;  %p9221_p6 = por %p9220_p0, %p9219_p8 }
 0xad1   : > { %p9215_p10 = pneg %p9214_p1 }
 0xad3   : > { %p9222_p7 = pnand %p9221_p6, %p9215_p10 }
 0xad5   : > { %9225 = shalt.err (!%p9222_p7)
}
 0xad6   : > { %8174 = dma.vmem_to_hbm [thread:$0]  (%p8203_p5), %s7452_s20, 32, %s12305_s7, [#allocation6]  }
 0xad7   : > { %9269 = dma.done.wait (%p8203_p5), [#allocation6], 32  }
 0xad8   : > { %9271 = vsyncadd (%p8203_p5), [#allocation6], 4294967264 }
 0xad9 PF: > { %p20_p13 = scmp.ge.s32.totalorder %s9385_s29, 4   ;;  %s12711_s24 = smov %s9278_s25 }
 0xada   : > { %s12712_s25 = smov %s9282_s26  ;;  %s12713_s26 = smov %s9395_s9 }
 0xadb   : > { %s12714_s27 = smov %s9385_s29  ;;  %22 = sbr.rel (!%p20_p13) target bundleno = 6 (0x6), region = 130 }
 0xae0   :  { %7464 = vsyncpa [#allocation5], 1 }
 0xae1   :  { %7466 = vsyncpa [#allocation5 + $0x1], 1 }
 0xae2   :  { %7467 = vsyncpa [#allocation8], 1 }
 0xae3   :  { %7469 = vsyncpa [#allocation8 + $0x1], 1 }
 0xae4   :  { %7470 = vsyncpa [#allocation11], 1 }
 0xae5   :  { %7471 = vsyncpa [#allocation6], 1 }
 0xae6   :  { %7473 = vsyncpa [#allocation6 + $0x1], 1 }

</bundles_post_ra>
